<compile_context>
chip_gen: v7x
topology: tpu7x:2x2x1
jax: 0.10.0
libtpu: 0.0.40
codegen_flags: <defaults>
</compile_context>

<pallas_src>
import jax
import jax.numpy as jnp
import numpy as np
from jax import lax
from jax.experimental import pallas as pl
from jax.experimental.pallas import tpu as pltpu

# ---- problem constants (from the PyTorch module) ----
IMG = 28                    # fc1 in_features = 20*12*12 forces 28x28 inputs
KK = 5                      # conv kernel size
CONV_C = 20                 # conv output channels
POOL_HW = 12                # pooled spatial extent (28 -> 24 -> 12)
FC1_OUT = 500
FC1_OUT_P = 512             # fc1 width zero-padded to a lane multiple
FC2_OUT = 10

# ---- derived kernel layout constants ----
PWC = POOL_HW * CONV_C      # 240 lanes: index = pw*20 + c
PWC_P = 256                 # zero-padded to a lane multiple
WBIG_N = KK * 2 * PWC_P     # 2560 stage-1 columns: (kh, dw, pw, c)
FLAT_P = POOL_HW * PWC_P    # 3072 padded flattened pooled features per image


# ----------------------------------------------------------------------------
# Fused kernel: conv(5x5) + bias + maxpool(2x2) + fc1 + relu + fc2 + softmax.
#   x_ref   : (TI, 28, 28) f32   raw images
#   wbig_ref: (28, 2560)   f32   conv weight folded over (kw, dw, pw, c)
#   z_ref   : (2, 5, 12, 28) f32 0/1 row-selection matrices (dh, kh)
#   bc_ref  : (1, 256)     f32   conv bias tiled over pw (lanes pw*20+c)
#   w1_ref  : (3072, 512)  bf16  fc1 weight, rows in (ph, pw, c) order
#   b1_ref  : (1, 512)     f32
#   w2_ref  : (512, 10)    bf16
#   b2_ref  : (1, 10)      f32
#   o_ref   : (TI, 10)     f32   softmax probabilities
#   flat_scr: (TI, 3072)   bf16  VMEM scratch for the pooled->flat relayout
# ----------------------------------------------------------------------------
def fused_convnet_kernel(x_ref, wbig_ref, z_ref, bc_ref, w1_ref, b1_ref,
                         w2_ref, b2_ref, o_ref, flat_scr):
    ti = x_ref.shape[0]
    x = x_ref[...]                                            # (TI, 28, 28)

    # ---- stage 1: contract width; kw taps, column parity, channels folded in
    wb = jnp.broadcast_to(wbig_ref[...], (ti, IMG, WBIG_N))
    y = lax.dot_general(x, wb, (((2,), (1,)), ((0,), (0,))),
                        preferred_element_type=jnp.float32)   # (TI, 28, 2560)

    # ---- stage 2: contract height via 0/1 selection matmuls (kh taps, dh)
    def height_contract(dh):
        acc = None
        for kh in range(KK):
            zb = jnp.broadcast_to(z_ref[dh, kh], (ti, POOL_HW, IMG))
            blk = y[:, :, kh * 2 * PWC_P:(kh + 1) * 2 * PWC_P]    # (TI,28,512)
            t = lax.dot_general(zb, blk, (((2,), (1,)), ((0,), (0,))),
                                preferred_element_type=jnp.float32)
            acc = t if acc is None else acc + t
        return acc                                            # (TI, 12, 512)

    p0 = height_contract(0)
    p1 = height_contract(1)
    # max over the 4 pool parities (dh, dw) == 2x2 maxpool; add bias once after
    pooled = jnp.maximum(jnp.maximum(p0[:, :, :PWC_P], p0[:, :, PWC_P:]),
                         jnp.maximum(p1[:, :, :PWC_P], p1[:, :, PWC_P:]))
    pooled = pooled + bc_ref[...]                             # (TI, 12, 256)

    # ---- flatten to a lane-dense (TI, 3072) bf16 slab (feeds fc1 directly)
    pooled_bf = pooled.astype(jnp.bfloat16)
    for ph in range(POOL_HW):
        flat_scr[:, ph * PWC_P:(ph + 1) * PWC_P] = pooled_bf[:, ph, :]
    flat = flat_scr[...]                                      # (TI, 3072) bf16

    # ---- fused MLP head: fc1 + bias + relu + fc2 + bias + softmax(dim=1)
    h = jnp.dot(flat, w1_ref[...], preferred_element_type=jnp.float32)
    h = jnp.maximum(h + b1_ref[...], 0.0)                     # (TI, 512)
    logits = jnp.dot(h.astype(jnp.bfloat16), w2_ref[...],
                     preferred_element_type=jnp.float32) + b2_ref[...]
    m = jnp.max(logits, axis=-1, keepdims=True)               # stable softmax
    e = jnp.exp(logits - m)
    o_ref[...] = e * pl.reciprocal(jnp.sum(e, axis=-1, keepdims=True),
                                   approx=True)


# ----------------------------------------------------------------------------
# One-time host-side weight re-layout (outside the jitted forward).
# ----------------------------------------------------------------------------
def prepare_params(conv_w, conv_b, fc1_w, fc1_b, fc2_w, fc2_b):
    conv_w = np.asarray(conv_w, np.float32)        # (20, 1, 5, 5)
    conv_b = np.asarray(conv_b, np.float32)        # (20,)
    fc1_w = np.asarray(fc1_w, np.float32)          # (500, 2880)
    fc1_b = np.asarray(fc1_b, np.float32)          # (500,)
    fc2_w = np.asarray(fc2_w, np.float32)          # (10, 500)
    fc2_b = np.asarray(fc2_b, np.float32)          # (10,)

    w = conv_w[:, 0]                               # (20, 5, 5)  [c, kh, kw]

    # Stage-1 weight: wbig[wcol, kh, dw, pw*20+c] = w[c, kh, wcol - (2*pw+dw)]
    wbig = np.zeros((IMG, KK, 2, POOL_HW, CONV_C), np.float32)
    for kh in range(KK):
        for dw in range(2):
            for pw in range(POOL_HW):
                for kw in range(KK):
                    wbig[2 * pw + dw + kw, kh, dw, pw, :] = w[:, kh, kw]
    wbig = wbig.reshape(IMG, KK, 2, PWC)
    wbig = np.pad(wbig, ((0, 0), (0, 0), (0, 0), (0, PWC_P - PWC)))
    wbig = wbig.reshape(IMG, WBIG_N)                            # (28, 2560)

    # Stage-2 0/1 row-selection: z[dh, kh, ph, h] = (h == 2*ph + dh + kh)
    zsel = np.zeros((2, KK, POOL_HW, IMG), np.float32)
    for dh in range(2):
        for kh in range(KK):
            for ph in range(POOL_HW):
                zsel[dh, kh, ph, 2 * ph + dh + kh] = 1.0

    # conv bias tiled over pw (lane layout pw*20+c), zero-padded 240 -> 256
    bc = np.tile(conv_b[None, :], (POOL_HW, 1)).reshape(PWC)
    bc = np.pad(bc, (0, PWC_P - PWC)).reshape(1, PWC_P)

    # fc1: rows reordered from PyTorch's (c, ph, pw) flatten to the kernel's
    # (ph, pw, c) layout with lane padding; cols zero-padded 500 -> 512; bf16.
    w1 = fc1_w.reshape(FC1_OUT, CONV_C, POOL_HW, POOL_HW)       # (o, c, ph, pw)
    w1 = w1.transpose(2, 3, 1, 0).reshape(POOL_HW, PWC, FC1_OUT)
    w1 = np.pad(w1, ((0, 0), (0, PWC_P - PWC), (0, FC1_OUT_P - FC1_OUT)))
    w1 = w1.reshape(FLAT_P, FC1_OUT_P)                          # (3072, 512)
    b1 = np.pad(fc1_b, (0, FC1_OUT_P - FC1_OUT)).reshape(1, FC1_OUT_P)

    w2 = np.pad(fc2_w.T, ((0, FC1_OUT_P - FC1_OUT), (0, 0)))    # (512, 10)
    b2 = fc2_b.reshape(1, FC2_OUT)

    return (jnp.asarray(wbig), jnp.asarray(zsel), jnp.asarray(bc),
            jnp.asarray(w1, dtype=jnp.bfloat16), jnp.asarray(b1),
            jnp.asarray(w2, dtype=jnp.bfloat16), jnp.asarray(b2))


def _pick_image_tile(n):
    if n <= 8:
        return n           # single block (tiny batches / the unit test)
    if n <= 16:
        return 8           # >= 2 grid steps so v7x uses both TensorCores
    return 16              # bounded VMEM; see TODO for v5e/v6e tile growth


@jax.jit
def simple_conv_net_forward(x, params):
    wbig, zsel, bc, w1, b1, w2, b2 = params
    n = x.shape[0]
    xs = x.reshape(n, IMG, IMG)                    # drop the channel dim (1)

    ti = _pick_image_tile(n)
    n_pad = ((n + ti - 1) // ti) * ti
    if n_pad != n:                                 # static trace-time padding
        xs = jnp.pad(xs, ((0, n_pad - n), (0, 0), (0, 0)))

    flops = 2 * n_pad * (IMG * IMG * WBIG_N
                         + 2 * KK * POOL_HW * IMG * 2 * PWC_P
                         + FLAT_P * FC1_OUT_P + FC1_OUT_P * FC2_OUT)
    bytes_accessed = (xs.size * 4 + wbig.size * 4 + zsel.size * 4 + bc.size * 4
                      + w1.size * 2 + b1.size * 4 + w2.size * 2 + b2.size * 4
                      + n_pad * FC2_OUT * 4)
    cost = pl.CostEstimate(flops=int(flops),
                           transcendentals=int(n_pad * FC2_OUT),
                           bytes_accessed=int(bytes_accessed))

    out = pl.pallas_call(
        fused_convnet_kernel,
        out_shape=jax.ShapeDtypeStruct((n_pad, FC2_OUT), jnp.float32),
        grid=(n_pad // ti,),
        in_specs=[
            pl.BlockSpec((ti, IMG, IMG), lambda i: (i, 0, 0)),            # x
            pl.BlockSpec((IMG, WBIG_N), lambda i: (0, 0)),                # wbig
            pl.BlockSpec((2, KK, POOL_HW, IMG), lambda i: (0, 0, 0, 0)),  # zsel
            pl.BlockSpec((1, PWC_P), lambda i: (0, 0)),                   # bc
            pl.BlockSpec((FLAT_P, FC1_OUT_P), lambda i: (0, 0)),          # w1
            pl.BlockSpec((1, FC1_OUT_P), lambda i: (0, 0)),               # b1
            pl.BlockSpec((FC1_OUT_P, FC2_OUT), lambda i: (0, 0)),         # w2
            pl.BlockSpec((1, FC2_OUT), lambda i: (0, 0)),                 # b2
        ],
        out_specs=pl.BlockSpec((ti, FC2_OUT), lambda i: (i, 0)),
        scratch_shapes=[pltpu.VMEM((ti, FLAT_P), jnp.bfloat16)],
        compiler_params=pltpu.CompilerParams(
            dimension_semantics=("parallel",),
            vmem_limit_bytes=32 * 1024 * 1024),
        cost_estimate=cost,
    )(xs, wbig, zsel, bc, w1, b1, w2, b2)

    return out[:n]


def reference_forward(x, conv_w, conv_b, fc1_w, fc1_b, fc2_w, fc2_b):
    """Pure-JAX reference mirroring the PyTorch forward (full precision)."""
    conv = lax.conv_general_dilated(
        x, conv_w, window_strides=(1, 1), padding="VALID",
        dimension_numbers=("NCHW", "OIHW", "NCHW"),
        precision=lax.Precision.HIGHEST) + conv_b[None, :, None, None]
    pooled = lax.reduce_window(conv, -jnp.inf, lax.max,
                               (1, 1, 2, 2), (1, 1, 2, 2), "VALID")
    flat = pooled.reshape(x.shape[0], -1)
    h = jnp.maximum(jnp.dot(flat, fc1_w.T, precision=lax.Precision.HIGHEST)
                    + fc1_b, 0.0)
    logits = jnp.dot(h, fc2_w.T, precision=lax.Precision.HIGHEST) + fc2_b
    return jax.nn.softmax(logits, axis=1)


if __name__ == "__main__":
    key = jax.random.PRNGKey(0)
    kx, k0, k1, k2, k3, k4, k5 = jax.random.split(key, 7)

    # input: batch=2, 1 channel, 28x28 (fc1 in_features = 20*12*12 forces 28x28)
    x = jax.random.normal(kx, (2, 1, 28, 28), dtype=jnp.float32)

    # deterministic parameter init (shapes from the module __init__)
    conv_w = jax.random.uniform(k0, (20, 1, 5, 5), jnp.float32, -0.2, 0.2)
    conv_b = jax.random.uniform(k1, (20,), jnp.float32, -0.2, 0.2)
    fc1_w = jax.random.uniform(k2, (500, 20 * 12 * 12), jnp.float32, -0.02, 0.02)
    fc1_b = jax.random.uniform(k3, (500,), jnp.float32, -0.02, 0.02)
    fc2_w = jax.random.uniform(k4, (10, 500), jnp.float32, -0.05, 0.05)
    fc2_b = jax.random.uniform(k5, (10,), jnp.float32, -0.05, 0.05)

    # one-time weight re-layout (outside the per-step forward)
    params = prepare_params(conv_w, conv_b, fc1_w, fc1_b, fc2_w, fc2_b)
    params = jax.block_until_ready(params)

    out = simple_conv_net_forward(x, params)
    out = jax.block_until_ready(out)

    ref = reference_forward(x, conv_w, conv_b, fc1_w, fc1_b, fc2_w, fc2_b)
    assert out.shape == (2, 10)
    assert bool(jnp.all(jnp.isfinite(out)))
    # approx reciprocal in the softmax denominator -> rows sum to 1 +/- ~2e-4
    assert bool(jnp.allclose(jnp.sum(out, axis=1), 1.0, atol=2e-3))
    assert bool(jnp.allclose(out, ref, atol=5e-3)), "mismatch vs pure-JAX reference"

    print("KERNEL_OK")
</pallas_src>

<mosaic_0001>
module attributes {stable_mosaic.version = 11 : i64} {
  func.func @fused_convnet_kernel(%arg0: i32, %arg1: memref<2x28x28xf32, #tpu.memory_space<vmem>>, %arg2: memref<28x2560xf32, #tpu.memory_space<vmem>>, %arg3: memref<2x5x12x28xf32, #tpu.memory_space<vmem>>, %arg4: memref<1x256xf32, #tpu.memory_space<vmem>>, %arg5: memref<3072x512xbf16, #tpu.memory_space<vmem>>, %arg6: memref<1x512xf32, #tpu.memory_space<vmem>>, %arg7: memref<512x10xbf16, #tpu.memory_space<vmem>>, %arg8: memref<1x10xf32, #tpu.memory_space<vmem>>, %arg9: memref<2x10xf32, #tpu.memory_space<vmem>>, %arg10: memref<2x3072xbf16, #tpu.memory_space<vmem>>) attributes {dimension_semantics = [#tpu.dimension_semantics<parallel>], iteration_bounds = array<i64: 1>, scalar_prefetch = 0 : i64, scratch_operands = 1 : i64, tpu.core_type = #tpu.core_type<tc>, window_params = [{transform_indices = @transform_0, window_bounds = array<i64: 2, 28, 28>}, {pipeline_mode = #tpu.pipeline_mode<synchronous>, transform_indices = @transform_1, window_bounds = array<i64: 28, 2560>}, {pipeline_mode = #tpu.pipeline_mode<synchronous>, transform_indices = @transform_2, window_bounds = array<i64: 2, 5, 12, 28>}, {pipeline_mode = #tpu.pipeline_mode<synchronous>, transform_indices = @transform_3, window_bounds = array<i64: 1, 256>}, {pipeline_mode = #tpu.pipeline_mode<synchronous>, transform_indices = @transform_4, window_bounds = array<i64: 3072, 512>}, {pipeline_mode = #tpu.pipeline_mode<synchronous>, transform_indices = @transform_5, window_bounds = array<i64: 1, 512>}, {pipeline_mode = #tpu.pipeline_mode<synchronous>, transform_indices = @transform_6, window_bounds = array<i64: 512, 10>}, {pipeline_mode = #tpu.pipeline_mode<synchronous>, transform_indices = @transform_7, window_bounds = array<i64: 1, 10>}, {transform_indices = @transform_8, window_bounds = array<i64: 2, 10>}]} {
    %c0 = arith.constant 0 : index
    %c0_0 = arith.constant 0 : index
    %c0_1 = arith.constant 0 : index
    %0 = vector.load %arg1[%c0, %c0_0, %c0_1] : memref<2x28x28xf32, #tpu.memory_space<vmem>>, vector<2x28x28xf32>
    %c0_2 = arith.constant 0 : index
    %c0_3 = arith.constant 0 : index
    %1 = vector.load %arg2[%c0_2, %c0_3] : memref<28x2560xf32, #tpu.memory_space<vmem>>, vector<28x2560xf32>
    %2 = vector.shape_cast %1 : vector<28x2560xf32> to vector<1x28x2560xf32>
    %3 = vector.broadcast %2 : vector<1x28x2560xf32> to vector<2x28x2560xf32>
    %cst = arith.constant dense<0.000000e+00> : vector<2x28x2560xf32>
    %4 = tpu.matmul %0, %3, %cst {dimension_numbers = #tpu.dot_dimension_numbers<[2], [1], [1], [2], [0, 0, 0, 1, 1, 2], [0], [0]>} : vector<2x28x28xf32>, vector<2x28x2560xf32>, vector<2x28x2560xf32> -> vector<2x28x2560xf32>
    %c0_4 = arith.constant 0 : index
    %c0_5 = arith.constant 0 : index
    %c0_6 = arith.constant 0 : index
    %c0_7 = arith.constant 0 : index
    %5 = vector.load %arg3[%c0_4, %c0_5, %c0_6, %c0_7] : memref<2x5x12x28xf32, #tpu.memory_space<vmem>>, vector<1x1x12x28xf32>
    %6 = vector.shape_cast %5 : vector<1x1x12x28xf32> to vector<12x28xf32>
    %7 = vector.shape_cast %6 : vector<12x28xf32> to vector<1x12x28xf32>
    %8 = vector.broadcast %7 : vector<1x12x28xf32> to vector<2x12x28xf32>
    %9 = vector.extract_strided_slice %4 {offsets = [0, 0, 0], sizes = [2, 28, 512], strides = [1, 1, 1]} : vector<2x28x2560xf32> to vector<2x28x512xf32>
    %cst_8 = arith.constant dense<0.000000e+00> : vector<2x12x512xf32>
    %10 = tpu.matmul %8, %9, %cst_8 {dimension_numbers = #tpu.dot_dimension_numbers<[2], [1], [1], [2], [0, 0, 0, 1, 1, 2], [0], [0]>} : vector<2x12x28xf32>, vector<2x28x512xf32>, vector<2x12x512xf32> -> vector<2x12x512xf32>
    %c0_9 = arith.constant 0 : index
    %c1 = arith.constant 1 : index
    %c0_10 = arith.constant 0 : index
    %c0_11 = arith.constant 0 : index
    %11 = vector.load %arg3[%c0_9, %c1, %c0_10, %c0_11] : memref<2x5x12x28xf32, #tpu.memory_space<vmem>>, vector<1x1x12x28xf32>
    %12 = vector.shape_cast %11 : vector<1x1x12x28xf32> to vector<12x28xf32>
    %13 = vector.shape_cast %12 : vector<12x28xf32> to vector<1x12x28xf32>
    %14 = vector.broadcast %13 : vector<1x12x28xf32> to vector<2x12x28xf32>
    %15 = vector.extract_strided_slice %4 {offsets = [0, 0, 512], sizes = [2, 28, 512], strides = [1, 1, 1]} : vector<2x28x2560xf32> to vector<2x28x512xf32>
    %cst_12 = arith.constant dense<0.000000e+00> : vector<2x12x512xf32>
    %16 = tpu.matmul %14, %15, %cst_12 {dimension_numbers = #tpu.dot_dimension_numbers<[2], [1], [1], [2], [0, 0, 0, 1, 1, 2], [0], [0]>} : vector<2x12x28xf32>, vector<2x28x512xf32>, vector<2x12x512xf32> -> vector<2x12x512xf32>
    %17 = arith.addf %10, %16 : vector<2x12x512xf32>
    %c0_13 = arith.constant 0 : index
    %c2 = arith.constant 2 : index
    %c0_14 = arith.constant 0 : index
    %c0_15 = arith.constant 0 : index
    %18 = vector.load %arg3[%c0_13, %c2, %c0_14, %c0_15] : memref<2x5x12x28xf32, #tpu.memory_space<vmem>>, vector<1x1x12x28xf32>
    %19 = vector.shape_cast %18 : vector<1x1x12x28xf32> to vector<12x28xf32>
    %20 = vector.shape_cast %19 : vector<12x28xf32> to vector<1x12x28xf32>
    %21 = vector.broadcast %20 : vector<1x12x28xf32> to vector<2x12x28xf32>
    %22 = vector.extract_strided_slice %4 {offsets = [0, 0, 1024], sizes = [2, 28, 512], strides = [1, 1, 1]} : vector<2x28x2560xf32> to vector<2x28x512xf32>
    %cst_16 = arith.constant dense<0.000000e+00> : vector<2x12x512xf32>
    %23 = tpu.matmul %21, %22, %cst_16 {dimension_numbers = #tpu.dot_dimension_numbers<[2], [1], [1], [2], [0, 0, 0, 1, 1, 2], [0], [0]>} : vector<2x12x28xf32>, vector<2x28x512xf32>, vector<2x12x512xf32> -> vector<2x12x512xf32>
    %24 = arith.addf %17, %23 : vector<2x12x512xf32>
    %c0_17 = arith.constant 0 : index
    %c3 = arith.constant 3 : index
    %c0_18 = arith.constant 0 : index
    %c0_19 = arith.constant 0 : index
    %25 = vector.load %arg3[%c0_17, %c3, %c0_18, %c0_19] : memref<2x5x12x28xf32, #tpu.memory_space<vmem>>, vector<1x1x12x28xf32>
    %26 = vector.shape_cast %25 : vector<1x1x12x28xf32> to vector<12x28xf32>
    %27 = vector.shape_cast %26 : vector<12x28xf32> to vector<1x12x28xf32>
    %28 = vector.broadcast %27 : vector<1x12x28xf32> to vector<2x12x28xf32>
    %29 = vector.extract_strided_slice %4 {offsets = [0, 0, 1536], sizes = [2, 28, 512], strides = [1, 1, 1]} : vector<2x28x2560xf32> to vector<2x28x512xf32>
    %cst_20 = arith.constant dense<0.000000e+00> : vector<2x12x512xf32>
    %30 = tpu.matmul %28, %29, %cst_20 {dimension_numbers = #tpu.dot_dimension_numbers<[2], [1], [1], [2], [0, 0, 0, 1, 1, 2], [0], [0]>} : vector<2x12x28xf32>, vector<2x28x512xf32>, vector<2x12x512xf32> -> vector<2x12x512xf32>
    %31 = arith.addf %24, %30 : vector<2x12x512xf32>
    %c0_21 = arith.constant 0 : index
    %c4 = arith.constant 4 : index
    %c0_22 = arith.constant 0 : index
    %c0_23 = arith.constant 0 : index
    %32 = vector.load %arg3[%c0_21, %c4, %c0_22, %c0_23] : memref<2x5x12x28xf32, #tpu.memory_space<vmem>>, vector<1x1x12x28xf32>
    %33 = vector.shape_cast %32 : vector<1x1x12x28xf32> to vector<12x28xf32>
    %34 = vector.shape_cast %33 : vector<12x28xf32> to vector<1x12x28xf32>
    %35 = vector.broadcast %34 : vector<1x12x28xf32> to vector<2x12x28xf32>
    %36 = vector.extract_strided_slice %4 {offsets = [0, 0, 2048], sizes = [2, 28, 512], strides = [1, 1, 1]} : vector<2x28x2560xf32> to vector<2x28x512xf32>
    %cst_24 = arith.constant dense<0.000000e+00> : vector<2x12x512xf32>
    %37 = tpu.matmul %35, %36, %cst_24 {dimension_numbers = #tpu.dot_dimension_numbers<[2], [1], [1], [2], [0, 0, 0, 1, 1, 2], [0], [0]>} : vector<2x12x28xf32>, vector<2x28x512xf32>, vector<2x12x512xf32> -> vector<2x12x512xf32>
    %38 = arith.addf %31, %37 : vector<2x12x512xf32>
    %c1_25 = arith.constant 1 : index
    %c0_26 = arith.constant 0 : index
    %c0_27 = arith.constant 0 : index
    %c0_28 = arith.constant 0 : index
    %39 = vector.load %arg3[%c1_25, %c0_26, %c0_27, %c0_28] : memref<2x5x12x28xf32, #tpu.memory_space<vmem>>, vector<1x1x12x28xf32>
    %40 = vector.shape_cast %39 : vector<1x1x12x28xf32> to vector<12x28xf32>
    %41 = vector.shape_cast %40 : vector<12x28xf32> to vector<1x12x28xf32>
    %42 = vector.broadcast %41 : vector<1x12x28xf32> to vector<2x12x28xf32>
    %43 = vector.extract_strided_slice %4 {offsets = [0, 0, 0], sizes = [2, 28, 512], strides = [1, 1, 1]} : vector<2x28x2560xf32> to vector<2x28x512xf32>
    %cst_29 = arith.constant dense<0.000000e+00> : vector<2x12x512xf32>
    %44 = tpu.matmul %42, %43, %cst_29 {dimension_numbers = #tpu.dot_dimension_numbers<[2], [1], [1], [2], [0, 0, 0, 1, 1, 2], [0], [0]>} : vector<2x12x28xf32>, vector<2x28x512xf32>, vector<2x12x512xf32> -> vector<2x12x512xf32>
    %c1_30 = arith.constant 1 : index
    %c1_31 = arith.constant 1 : index
    %c0_32 = arith.constant 0 : index
    %c0_33 = arith.constant 0 : index
    %45 = vector.load %arg3[%c1_30, %c1_31, %c0_32, %c0_33] : memref<2x5x12x28xf32, #tpu.memory_space<vmem>>, vector<1x1x12x28xf32>
    %46 = vector.shape_cast %45 : vector<1x1x12x28xf32> to vector<12x28xf32>
    %47 = vector.shape_cast %46 : vector<12x28xf32> to vector<1x12x28xf32>
    %48 = vector.broadcast %47 : vector<1x12x28xf32> to vector<2x12x28xf32>
    %49 = vector.extract_strided_slice %4 {offsets = [0, 0, 512], sizes = [2, 28, 512], strides = [1, 1, 1]} : vector<2x28x2560xf32> to vector<2x28x512xf32>
    %cst_34 = arith.constant dense<0.000000e+00> : vector<2x12x512xf32>
    %50 = tpu.matmul %48, %49, %cst_34 {dimension_numbers = #tpu.dot_dimension_numbers<[2], [1], [1], [2], [0, 0, 0, 1, 1, 2], [0], [0]>} : vector<2x12x28xf32>, vector<2x28x512xf32>, vector<2x12x512xf32> -> vector<2x12x512xf32>
    %51 = arith.addf %44, %50 : vector<2x12x512xf32>
    %c1_35 = arith.constant 1 : index
    %c2_36 = arith.constant 2 : index
    %c0_37 = arith.constant 0 : index
    %c0_38 = arith.constant 0 : index
    %52 = vector.load %arg3[%c1_35, %c2_36, %c0_37, %c0_38] : memref<2x5x12x28xf32, #tpu.memory_space<vmem>>, vector<1x1x12x28xf32>
    %53 = vector.shape_cast %52 : vector<1x1x12x28xf32> to vector<12x28xf32>
    %54 = vector.shape_cast %53 : vector<12x28xf32> to vector<1x12x28xf32>
    %55 = vector.broadcast %54 : vector<1x12x28xf32> to vector<2x12x28xf32>
    %56 = vector.extract_strided_slice %4 {offsets = [0, 0, 1024], sizes = [2, 28, 512], strides = [1, 1, 1]} : vector<2x28x2560xf32> to vector<2x28x512xf32>
    %cst_39 = arith.constant dense<0.000000e+00> : vector<2x12x512xf32>
    %57 = tpu.matmul %55, %56, %cst_39 {dimension_numbers = #tpu.dot_dimension_numbers<[2], [1], [1], [2], [0, 0, 0, 1, 1, 2], [0], [0]>} : vector<2x12x28xf32>, vector<2x28x512xf32>, vector<2x12x512xf32> -> vector<2x12x512xf32>
    %58 = arith.addf %51, %57 : vector<2x12x512xf32>
    %c1_40 = arith.constant 1 : index
    %c3_41 = arith.constant 3 : index
    %c0_42 = arith.constant 0 : index
    %c0_43 = arith.constant 0 : index
    %59 = vector.load %arg3[%c1_40, %c3_41, %c0_42, %c0_43] : memref<2x5x12x28xf32, #tpu.memory_space<vmem>>, vector<1x1x12x28xf32>
    %60 = vector.shape_cast %59 : vector<1x1x12x28xf32> to vector<12x28xf32>
    %61 = vector.shape_cast %60 : vector<12x28xf32> to vector<1x12x28xf32>
    %62 = vector.broadcast %61 : vector<1x12x28xf32> to vector<2x12x28xf32>
    %63 = vector.extract_strided_slice %4 {offsets = [0, 0, 1536], sizes = [2, 28, 512], strides = [1, 1, 1]} : vector<2x28x2560xf32> to vector<2x28x512xf32>
    %cst_44 = arith.constant dense<0.000000e+00> : vector<2x12x512xf32>
    %64 = tpu.matmul %62, %63, %cst_44 {dimension_numbers = #tpu.dot_dimension_numbers<[2], [1], [1], [2], [0, 0, 0, 1, 1, 2], [0], [0]>} : vector<2x12x28xf32>, vector<2x28x512xf32>, vector<2x12x512xf32> -> vector<2x12x512xf32>
    %65 = arith.addf %58, %64 : vector<2x12x512xf32>
    %c1_45 = arith.constant 1 : index
    %c4_46 = arith.constant 4 : index
    %c0_47 = arith.constant 0 : index
    %c0_48 = arith.constant 0 : index
    %66 = vector.load %arg3[%c1_45, %c4_46, %c0_47, %c0_48] : memref<2x5x12x28xf32, #tpu.memory_space<vmem>>, vector<1x1x12x28xf32>
    %67 = vector.shape_cast %66 : vector<1x1x12x28xf32> to vector<12x28xf32>
    %68 = vector.shape_cast %67 : vector<12x28xf32> to vector<1x12x28xf32>
    %69 = vector.broadcast %68 : vector<1x12x28xf32> to vector<2x12x28xf32>
    %70 = vector.extract_strided_slice %4 {offsets = [0, 0, 2048], sizes = [2, 28, 512], strides = [1, 1, 1]} : vector<2x28x2560xf32> to vector<2x28x512xf32>
    %cst_49 = arith.constant dense<0.000000e+00> : vector<2x12x512xf32>
    %71 = tpu.matmul %69, %70, %cst_49 {dimension_numbers = #tpu.dot_dimension_numbers<[2], [1], [1], [2], [0, 0, 0, 1, 1, 2], [0], [0]>} : vector<2x12x28xf32>, vector<2x28x512xf32>, vector<2x12x512xf32> -> vector<2x12x512xf32>
    %72 = arith.addf %65, %71 : vector<2x12x512xf32>
    %73 = vector.extract_strided_slice %38 {offsets = [0, 0, 0], sizes = [2, 12, 256], strides = [1, 1, 1]} : vector<2x12x512xf32> to vector<2x12x256xf32>
    %74 = vector.extract_strided_slice %38 {offsets = [0, 0, 256], sizes = [2, 12, 256], strides = [1, 1, 1]} : vector<2x12x512xf32> to vector<2x12x256xf32>
    %75 = arith.maximumf %73, %74 : vector<2x12x256xf32>
    %76 = vector.extract_strided_slice %72 {offsets = [0, 0, 0], sizes = [2, 12, 256], strides = [1, 1, 1]} : vector<2x12x512xf32> to vector<2x12x256xf32>
    %77 = vector.extract_strided_slice %72 {offsets = [0, 0, 256], sizes = [2, 12, 256], strides = [1, 1, 1]} : vector<2x12x512xf32> to vector<2x12x256xf32>
    %78 = arith.maximumf %76, %77 : vector<2x12x256xf32>
    %79 = arith.maximumf %75, %78 : vector<2x12x256xf32>
    %c0_50 = arith.constant 0 : index
    %c0_51 = arith.constant 0 : index
    %80 = vector.load %arg4[%c0_50, %c0_51] : memref<1x256xf32, #tpu.memory_space<vmem>>, vector<1x256xf32>
    %81 = vector.shape_cast %80 : vector<1x256xf32> to vector<1x1x256xf32>
    %82 = vector.broadcast %81 : vector<1x1x256xf32> to vector<2x12x256xf32>
    %83 = arith.addf %79, %82 : vector<2x12x256xf32>
    %84 = arith.truncf %83 : vector<2x12x256xf32> to vector<2x12x256xbf16>
    %85 = vector.extract_strided_slice %84 {offsets = [0, 0, 0], sizes = [2, 1, 256], strides = [1, 1, 1]} : vector<2x12x256xbf16> to vector<2x1x256xbf16>
    %86 = vector.shape_cast %85 : vector<2x1x256xbf16> to vector<2x256xbf16>
    %c0_52 = arith.constant 0 : index
    %c0_53 = arith.constant 0 : index
    %87 = vector.load %arg10[%c0_52, %c0_53] : memref<2x3072xbf16, #tpu.memory_space<vmem>>, vector<2x256xbf16>
    tpu.vector_store %arg10[%c0_52, %c0_53], %86 {strides = array<i32>} : memref<2x3072xbf16, #tpu.memory_space<vmem>>, vector<2x256xbf16>,
    %88 = vector.extract_strided_slice %84 {offsets = [0, 1, 0], sizes = [2, 1, 256], strides = [1, 1, 1]} : vector<2x12x256xbf16> to vector<2x1x256xbf16>
    %89 = vector.shape_cast %88 : vector<2x1x256xbf16> to vector<2x256xbf16>
    %c0_54 = arith.constant 0 : index
    %c256 = arith.constant 256 : index
    %90 = vector.load %arg10[%c0_54, %c256] : memref<2x3072xbf16, #tpu.memory_space<vmem>>, vector<2x256xbf16>
    tpu.vector_store %arg10[%c0_54, %c256], %89 {strides = array<i32>} : memref<2x3072xbf16, #tpu.memory_space<vmem>>, vector<2x256xbf16>,
    %91 = vector.extract_strided_slice %84 {offsets = [0, 2, 0], sizes = [2, 1, 256], strides = [1, 1, 1]} : vector<2x12x256xbf16> to vector<2x1x256xbf16>
    %92 = vector.shape_cast %91 : vector<2x1x256xbf16> to vector<2x256xbf16>
    %c0_55 = arith.constant 0 : index
    %c512 = arith.constant 512 : index
    %93 = vector.load %arg10[%c0_55, %c512] : memref<2x3072xbf16, #tpu.memory_space<vmem>>, vector<2x256xbf16>
    tpu.vector_store %arg10[%c0_55, %c512], %92 {strides = array<i32>} : memref<2x3072xbf16, #tpu.memory_space<vmem>>, vector<2x256xbf16>,
    %94 = vector.extract_strided_slice %84 {offsets = [0, 3, 0], sizes = [2, 1, 256], strides = [1, 1, 1]} : vector<2x12x256xbf16> to vector<2x1x256xbf16>
    %95 = vector.shape_cast %94 : vector<2x1x256xbf16> to vector<2x256xbf16>
    %c0_56 = arith.constant 0 : index
    %c768 = arith.constant 768 : index
    %96 = vector.load %arg10[%c0_56, %c768] : memref<2x3072xbf16, #tpu.memory_space<vmem>>, vector<2x256xbf16>
    tpu.vector_store %arg10[%c0_56, %c768], %95 {strides = array<i32>} : memref<2x3072xbf16, #tpu.memory_space<vmem>>, vector<2x256xbf16>,
    %97 = vector.extract_strided_slice %84 {offsets = [0, 4, 0], sizes = [2, 1, 256], strides = [1, 1, 1]} : vector<2x12x256xbf16> to vector<2x1x256xbf16>
    %98 = vector.shape_cast %97 : vector<2x1x256xbf16> to vector<2x256xbf16>
    %c0_57 = arith.constant 0 : index
    %c1024 = arith.constant 1024 : index
    %99 = vector.load %arg10[%c0_57, %c1024] : memref<2x3072xbf16, #tpu.memory_space<vmem>>, vector<2x256xbf16>
    tpu.vector_store %arg10[%c0_57, %c1024], %98 {strides = array<i32>} : memref<2x3072xbf16, #tpu.memory_space<vmem>>, vector<2x256xbf16>,
    %100 = vector.extract_strided_slice %84 {offsets = [0, 5, 0], sizes = [2, 1, 256], strides = [1, 1, 1]} : vector<2x12x256xbf16> to vector<2x1x256xbf16>
    %101 = vector.shape_cast %100 : vector<2x1x256xbf16> to vector<2x256xbf16>
    %c0_58 = arith.constant 0 : index
    %c1280 = arith.constant 1280 : index
    %102 = vector.load %arg10[%c0_58, %c1280] : memref<2x3072xbf16, #tpu.memory_space<vmem>>, vector<2x256xbf16>
    tpu.vector_store %arg10[%c0_58, %c1280], %101 {strides = array<i32>} : memref<2x3072xbf16, #tpu.memory_space<vmem>>, vector<2x256xbf16>,
    %103 = vector.extract_strided_slice %84 {offsets = [0, 6, 0], sizes = [2, 1, 256], strides = [1, 1, 1]} : vector<2x12x256xbf16> to vector<2x1x256xbf16>
    %104 = vector.shape_cast %103 : vector<2x1x256xbf16> to vector<2x256xbf16>
    %c0_59 = arith.constant 0 : index
    %c1536 = arith.constant 1536 : index
    %105 = vector.load %arg10[%c0_59, %c1536] : memref<2x3072xbf16, #tpu.memory_space<vmem>>, vector<2x256xbf16>
    tpu.vector_store %arg10[%c0_59, %c1536], %104 {strides = array<i32>} : memref<2x3072xbf16, #tpu.memory_space<vmem>>, vector<2x256xbf16>,
    %106 = vector.extract_strided_slice %84 {offsets = [0, 7, 0], sizes = [2, 1, 256], strides = [1, 1, 1]} : vector<2x12x256xbf16> to vector<2x1x256xbf16>
    %107 = vector.shape_cast %106 : vector<2x1x256xbf16> to vector<2x256xbf16>
    %c0_60 = arith.constant 0 : index
    %c1792 = arith.constant 1792 : index
    %108 = vector.load %arg10[%c0_60, %c1792] : memref<2x3072xbf16, #tpu.memory_space<vmem>>, vector<2x256xbf16>
    tpu.vector_store %arg10[%c0_60, %c1792], %107 {strides = array<i32>} : memref<2x3072xbf16, #tpu.memory_space<vmem>>, vector<2x256xbf16>,
    %109 = vector.extract_strided_slice %84 {offsets = [0, 8, 0], sizes = [2, 1, 256], strides = [1, 1, 1]} : vector<2x12x256xbf16> to vector<2x1x256xbf16>
    %110 = vector.shape_cast %109 : vector<2x1x256xbf16> to vector<2x256xbf16>
    %c0_61 = arith.constant 0 : index
    %c2048 = arith.constant 2048 : index
    %111 = vector.load %arg10[%c0_61, %c2048] : memref<2x3072xbf16, #tpu.memory_space<vmem>>, vector<2x256xbf16>
    tpu.vector_store %arg10[%c0_61, %c2048], %110 {strides = array<i32>} : memref<2x3072xbf16, #tpu.memory_space<vmem>>, vector<2x256xbf16>,
    %112 = vector.extract_strided_slice %84 {offsets = [0, 9, 0], sizes = [2, 1, 256], strides = [1, 1, 1]} : vector<2x12x256xbf16> to vector<2x1x256xbf16>
    %113 = vector.shape_cast %112 : vector<2x1x256xbf16> to vector<2x256xbf16>
    %c0_62 = arith.constant 0 : index
    %c2304 = arith.constant 2304 : index
    %114 = vector.load %arg10[%c0_62, %c2304] : memref<2x3072xbf16, #tpu.memory_space<vmem>>, vector<2x256xbf16>
    tpu.vector_store %arg10[%c0_62, %c2304], %113 {strides = array<i32>} : memref<2x3072xbf16, #tpu.memory_space<vmem>>, vector<2x256xbf16>,
    %115 = vector.extract_strided_slice %84 {offsets = [0, 10, 0], sizes = [2, 1, 256], strides = [1, 1, 1]} : vector<2x12x256xbf16> to vector<2x1x256xbf16>
    %116 = vector.shape_cast %115 : vector<2x1x256xbf16> to vector<2x256xbf16>
    %c0_63 = arith.constant 0 : index
    %c2560 = arith.constant 2560 : index
    %117 = vector.load %arg10[%c0_63, %c2560] : memref<2x3072xbf16, #tpu.memory_space<vmem>>, vector<2x256xbf16>
    tpu.vector_store %arg10[%c0_63, %c2560], %116 {strides = array<i32>} : memref<2x3072xbf16, #tpu.memory_space<vmem>>, vector<2x256xbf16>,
    %118 = vector.extract_strided_slice %84 {offsets = [0, 11, 0], sizes = [2, 1, 256], strides = [1, 1, 1]} : vector<2x12x256xbf16> to vector<2x1x256xbf16>
    %119 = vector.shape_cast %118 : vector<2x1x256xbf16> to vector<2x256xbf16>
    %c0_64 = arith.constant 0 : index
    %c2816 = arith.constant 2816 : index
    %120 = vector.load %arg10[%c0_64, %c2816] : memref<2x3072xbf16, #tpu.memory_space<vmem>>, vector<2x256xbf16>
    tpu.vector_store %arg10[%c0_64, %c2816], %119 {strides = array<i32>} : memref<2x3072xbf16, #tpu.memory_space<vmem>>, vector<2x256xbf16>,
    %c0_65 = arith.constant 0 : index
    %c0_66 = arith.constant 0 : index
    %121 = vector.load %arg10[%c0_65, %c0_66] : memref<2x3072xbf16, #tpu.memory_space<vmem>>, vector<2x3072xbf16>
    %c0_67 = arith.constant 0 : index
    %c0_68 = arith.constant 0 : index
    %122 = vector.load %arg5[%c0_67, %c0_68] : memref<3072x512xbf16, #tpu.memory_space<vmem>>, vector<3072x512xbf16>
    %cst_69 = arith.constant dense<0.000000e+00> : vector<2x512xf32>
    %123 = tpu.matmul %121, %122, %cst_69 {dimension_numbers = #tpu.dot_dimension_numbers<[1], [0], [0], [1], [0, 0, 1, 1], [], []>} : vector<2x3072xbf16>, vector<3072x512xbf16>, vector<2x512xf32> -> vector<2x512xf32>
    %c0_70 = arith.constant 0 : index
    %c0_71 = arith.constant 0 : index
    %124 = vector.load %arg6[%c0_70, %c0_71] : memref<1x512xf32, #tpu.memory_space<vmem>>, vector<1x512xf32>
    %125 = vector.broadcast %124 : vector<1x512xf32> to vector<2x512xf32>
    %126 = arith.addf %123, %125 : vector<2x512xf32>
    %cst_72 = arith.constant 0.000000e+00 : f32
    %127 = vector.broadcast %cst_72 : f32 to vector<2x512xf32>
    %128 = arith.maximumf %126, %127 : vector<2x512xf32>
    %129 = arith.truncf %128 : vector<2x512xf32> to vector<2x512xbf16>
    %c0_73 = arith.constant 0 : index
    %c0_74 = arith.constant 0 : index
    %130 = vector.load %arg7[%c0_73, %c0_74] : memref<512x10xbf16, #tpu.memory_space<vmem>>, vector<512x10xbf16>
    %cst_75 = arith.constant dense<0.000000e+00> : vector<2x10xf32>
    %131 = tpu.matmul %129, %130, %cst_75 {dimension_numbers = #tpu.dot_dimension_numbers<[1], [0], [0], [1], [0, 0, 1, 1], [], []>} : vector<2x512xbf16>, vector<512x10xbf16>, vector<2x10xf32> -> vector<2x10xf32>
    %c0_76 = arith.constant 0 : index
    %c0_77 = arith.constant 0 : index
    %132 = vector.load %arg8[%c0_76, %c0_77] : memref<1x10xf32, #tpu.memory_space<vmem>>, vector<1x10xf32>
    %133 = vector.broadcast %132 : vector<1x10xf32> to vector<2x10xf32>
    %134 = arith.addf %131, %133 : vector<2x10xf32>
    %cst_78 = arith.constant dense<0xFF800000> : vector<2xf32>
    %135 = vector.multi_reduction <maximumf>, %134, %cst_78 [1] : vector<2x10xf32> to vector<2xf32>
    %136 = vector.shape_cast %135 : vector<2xf32> to vector<2x1xf32>
    %137 = vector.broadcast %136 : vector<2x1xf32> to vector<2x10xf32>
    %138 = arith.subf %134, %137 : vector<2x10xf32>
    %139 = math.exp %138 : vector<2x10xf32>
    %cst_79 = arith.constant dense<0.000000e+00> : vector<2xf32>
    %140 = vector.multi_reduction <add>, %139, %cst_79 [1] : vector<2x10xf32> to vector<2xf32>
    %141 = vector.shape_cast %140 : vector<2xf32> to vector<2x1xf32>
    %142 = tpu.reciprocal %141 {approx = true} : vector<2x1xf32> -> vector<2x1xf32>
    %143 = vector.broadcast %142 : vector<2x1xf32> to vector<2x10xf32>
    %144 = arith.mulf %139, %143 : vector<2x10xf32>
    %c0_80 = arith.constant 0 : index
    %c0_81 = arith.constant 0 : index
    %145 = vector.load %arg9[%c0_80, %c0_81] : memref<2x10xf32, #tpu.memory_space<vmem>>, vector<2x10xf32>
    tpu.vector_store %arg9[%c0_80, %c0_81], %144 {strides = array<i32>} : memref<2x10xf32, #tpu.memory_space<vmem>>, vector<2x10xf32>,
    return
  }
  func.func @transform_0(%arg0: i32) -> (i32, i32, i32) {
    %c0_i32 = arith.constant 0 : i32
    %c0_i32_0 = arith.constant 0 : i32
    %c0_i32_1 = arith.constant 0 : i32
    return %arg0, %c0_i32, %c0_i32_0 : i32, i32, i32
  }
  func.func @transform_1(%arg0: i32) -> (i32, i32) {
    %c0_i32 = arith.constant 0 : i32
    %c0_i32_0 = arith.constant 0 : i32
    %c0_i32_1 = arith.constant 0 : i32
    return %c0_i32, %c0_i32_0 : i32, i32
  }
  func.func @transform_2(%arg0: i32) -> (i32, i32, i32, i32) {
    %c0_i32 = arith.constant 0 : i32
    %c0_i32_0 = arith.constant 0 : i32
    %c0_i32_1 = arith.constant 0 : i32
    %c0_i32_2 = arith.constant 0 : i32
    %c0_i32_3 = arith.constant 0 : i32
    return %c0_i32, %c0_i32_0, %c0_i32_1, %c0_i32_2 : i32, i32, i32, i32
  }
  func.func @transform_3(%arg0: i32) -> (i32, i32) {
    %c0_i32 = arith.constant 0 : i32
    %c0_i32_0 = arith.constant 0 : i32
    %c0_i32_1 = arith.constant 0 : i32
    return %c0_i32, %c0_i32_0 : i32, i32
  }
  func.func @transform_4(%arg0: i32) -> (i32, i32) {
    %c0_i32 = arith.constant 0 : i32
    %c0_i32_0 = arith.constant 0 : i32
    %c0_i32_1 = arith.constant 0 : i32
    return %c0_i32, %c0_i32_0 : i32, i32
  }
  func.func @transform_5(%arg0: i32) -> (i32, i32) {
    %c0_i32 = arith.constant 0 : i32
    %c0_i32_0 = arith.constant 0 : i32
    %c0_i32_1 = arith.constant 0 : i32
    return %c0_i32, %c0_i32_0 : i32, i32
  }
  func.func @transform_6(%arg0: i32) -> (i32, i32) {
    %c0_i32 = arith.constant 0 : i32
    %c0_i32_0 = arith.constant 0 : i32
    %c0_i32_1 = arith.constant 0 : i32
    return %c0_i32, %c0_i32_0 : i32, i32
  }
  func.func @transform_7(%arg0: i32) -> (i32, i32) {
    %c0_i32 = arith.constant 0 : i32
    %c0_i32_0 = arith.constant 0 : i32
    %c0_i32_1 = arith.constant 0 : i32
    return %c0_i32, %c0_i32_0 : i32, i32
  }
  func.func @transform_8(%arg0: i32) -> (i32, i32) {
    %c0_i32 = arith.constant 0 : i32
    %c0_i32_0 = arith.constant 0 : i32
    return %arg0, %c0_i32 : i32, i32
  }
}

</mosaic_0001>

<bundles_post_ra>
// kernel: simple_conv_net_forward.1
= control target key start
LH: loop header
LB: loop body
LE: loop exit
PB: predicated region body
PF: predicated region fallthrough
CT: control target
= control target key end

     0   :  { %13 = vsyncpa [#allocation4], 0  ;;  %s17289_s0 = inlined_call_operand.vmem [shape: f32[2,28,28], index: 0, kind: input, shape index: {}]   ;;  %s17290_s1 = inlined_call_operand.hbm [shape: f32[28,2560], index: 1, kind: input, shape index: {}]   ;;  %s17291_s2 = inlined_call_operand.vmem [shape: f32[2,5,12,28], index: 2, kind: input, shape index: {}]   ;;  %s17292_s3 = inlined_call_operand.hbm [shape: f32[1,256], index: 3, kind: input, shape index: {}]   ;;  %s17293_s4 = inlined_call_operand.hbm [shape: bf16[3072,512], index: 4, kind: input, shape index: {}]   ;;  %s17294_s5 = inlined_call_operand.hbm [shape: f32[1,512], index: 5, kind: input, shape index: {}]   ;;  %s17295_s6 = inlined_call_operand.vmem [shape: bf16[512,10], index: 6, kind: input, shape index: {}]   ;;  %s17296_s7 = inlined_call_operand.hbm [shape: f32[1,10], index: 7, kind: input, shape index: {}]   ;;  %s17297_s8 = inlined_call_operand.hbm [shape: f32[2,10], index: 8, kind: output, shape index: {}]  }
   0x1   :  { %14 = vsyncpa [#allocation7], 0 }
   0x2   :  { %15 = vsyncpa [#allocation10], 0 }
   0x3   :  { %16 = vsyncpa [#allocation5], 0  ;;  %s15521_s27 = smov [#allocation6]   ;;  %s15522_s29 = smov [#allocation9]  }
   0x4   :  { %s39_s28 = sshll.u32 %s15521_s27, 4  ;;  %s61_s30 = sshll.u32 %s15522_s29, 4  ;;  %s40_s28 = int_to_ptr.vmem [resolvable:$true] %s39_s28  ;;  %s62_s30 = int_to_ptr.vmem [resolvable:$true] %s61_s30 }
   0x5   :  { %s15381_s11 = scalar_lea.hbm %s17292_s3, 32 }
   0x6   :  { %p15382_p0 = scmp.ne.s32.totalorder %s17292_s3, %s15381_s11  ;;  %p15385_p1 = scmp.lt.u32.totalorder %s15381_s11, %s17292_s3 }
   0x8   :  { %p15387_p2 = pnand %p15385_p1, %p15382_p0 }
   0xa   :  { %15390 = shalt.err (!%p15387_p2)
}
   0xb   :  { %s15391_s16 = scalar_lea.vmem %s40_s28, 32  ;;  %p15396_p4 = scmp.lt.s32.totalorder %s40_s28, %s40_s28 }
   0xc   :  { %p15392_p3 = scmp.ne.s32.totalorder %s40_s28, %s15391_s16  ;;  %p15397_p5 = scmp.lt.s32.totalorder %s15391_s16, %s15391_s16 }
   0xe   :  { %p15398_p6 = por %p15397_p5, %p15396_p4 }
  0x10   :  { %p15399_p7 = pnand %p15398_p6, %p15392_p3 }
  0x12   :  { %15402 = shalt.err (!%p15399_p7)
}
  0x13   :  { %42 = dma.hbm_to_vmem [thread:$0]  %s17292_s3, 32, %s40_s28, [#allocation7]  }
  0x14   :  { %s15403_s21 = scalar_lea.hbm %s17294_s5, 64 }
  0x15   :  { %p15404_p8 = scmp.ne.s32.totalorder %s17294_s5, %s15403_s21  ;;  %p15407_p9 = scmp.lt.u32.totalorder %s15403_s21, %s17294_s5 }
  0x17   :  { %p15409_p10 = pnand %p15407_p9, %p15404_p8 }
  0x19   :  { %15412 = shalt.err (!%p15409_p10)
}
  0x1a   :  { %s15413_s26 = scalar_lea.vmem %s62_s30, 64  ;;  %p15418_p12 = scmp.lt.s32.totalorder %s62_s30, %s62_s30 }
  0x1b   :  { %p15414_p11 = scmp.ne.s32.totalorder %s62_s30, %s15413_s26  ;;  %p15419_p13 = scmp.lt.s32.totalorder %s15413_s26, %s15413_s26 }
  0x1d   :  { %p15420_p0 = por %p15419_p13, %p15418_p12 }
  0x1f   :  { %p15421_p1 = pnand %p15420_p0, %p15414_p11 }
  0x21   :  { %15424 = shalt.err (!%p15421_p1)
}
  0x22   :  { %64 = dma.hbm_to_vmem [thread:$0]  %s17294_s5, 64, %s62_s30, [#allocation10]  }
  0x23   :  { %s15523_s28 = smov [#allocation3]   ;;  %s15425_s11 = scalar_lea.hbm %s17290_s1, 10240 }
  0x24   :  { %s24_s29 = sshll.u32 %s15523_s28, 4  ;;  %p15426_p2 = scmp.ne.s32.totalorder %s17290_s1, %s15425_s11  ;;  %s25_s29 = int_to_ptr.vmem [resolvable:$true] %s24_s29 }
  0x25   :  { %p15429_p3 = scmp.lt.u32.totalorder %s15425_s11, %s17290_s1 }
  0x27   :  { %p15431_p4 = pnand %p15429_p3, %p15426_p2 }
  0x29   :  { %15434 = shalt.err (!%p15431_p4)
}
  0x2a   :  { %s15435_s16 = scalar_lea.vmem %s25_s29, 10240  ;;  %p15440_p6 = scmp.lt.s32.totalorder %s25_s29, %s25_s29 }
  0x2b   :  { %p15436_p5 = scmp.ne.s32.totalorder %s25_s29, %s15435_s16  ;;  %p15441_p7 = scmp.lt.s32.totalorder %s15435_s16, %s15435_s16 }
  0x2d   :  { %p15442_p8 = por %p15441_p7, %p15440_p6 }
  0x2f   :  { %p15443_p9 = pnand %p15442_p8, %p15436_p5 }
  0x31   :  { %15446 = shalt.err (!%p15443_p9)
}
  0x32   :  { %s15524_s5 = smov 2560   ;;  %s15525_s30 = smov 160  }
  0x33   :  { %30 = dma.hbm_to_vmem [thread:$0]  %s17290_s1, 10240, %s25_s29, [#allocation4], %s15524_s5, %s15524_s5, %s15525_s30  }
  0x34   :  { %s15526_s19 = smov [#allocation8]   ;;  %s15447_s23 = scalar_lea.hbm %s17293_s4, 98304 }
  0x35   :  { %s48_s20 = sshll.u32 %s15526_s19, 4  ;;  %p15448_p10 = scmp.ne.s32.totalorder %s17293_s4, %s15447_s23  ;;  %s49_s20 = int_to_ptr.vmem [resolvable:$true] %s48_s20 }
  0x36   :  { %p15451_p11 = scmp.lt.u32.totalorder %s15447_s23, %s17293_s4 }
  0x38   :  { %p15453_p12 = pnand %p15451_p11, %p15448_p10 }
  0x3a   :  { %15456 = shalt.err (!%p15453_p12)
}
  0x3b   :  { %s15457_s27 = scalar_lea.vmem %s49_s20, 98304  ;;  %p15462_p0 = scmp.lt.s32.totalorder %s49_s20, %s49_s20 }
  0x3c   :  { %p15458_p13 = scmp.ne.s32.totalorder %s49_s20, %s15457_s27  ;;  %p15463_p1 = scmp.lt.s32.totalorder %s15457_s27, %s15457_s27 }
  0x3e   :  { %p15464_p2 = por %p15463_p1, %p15462_p0 }
  0x40   :  { %p15465_p3 = pnand %p15464_p2, %p15458_p13 }
  0x42   :  { %15468 = shalt.err (!%p15465_p3)
}
  0x43   :  { %s15527_s1 = smov 256   ;;  %s15528_s28 = smov 16  }
  0x44   :  { %54 = dma.hbm_to_vmem [thread:$0]  %s17293_s4, 98304, %s49_s20, [#allocation7], %s15527_s1, %s15527_s1, %s15528_s28  }
  0x45   :  { %s15529_s10 = smov [#allocation11]   ;;  %s15469_s14 = scalar_lea.hbm %s17296_s7, 16 }
  0x46   :  { %s73_s11 = sshll.u32 %s15529_s10, 4  ;;  %p15470_p4 = scmp.ne.s32.totalorder %s17296_s7, %s15469_s14  ;;  %s74_s11 = int_to_ptr.vmem [resolvable:$true] %s73_s11 }
  0x47   :  { %p15473_p5 = scmp.lt.u32.totalorder %s15469_s14, %s17296_s7 }
  0x49   :  { %p15475_p6 = pnand %p15473_p5, %p15470_p4 }
  0x4b   :  { %15478 = shalt.err (!%p15475_p6)
}
  0x4c   :  { %s15479_s17 = scalar_lea.vmem %s74_s11, 16  ;;  %s15483_s4 = scalar_lea.vmem %s74_s11, 32 }
  0x4d   :  { %p15480_p7 = scmp.ne.s32.totalorder %s74_s11, %s15479_s17  ;;  %p15484_p8 = scmp.lt.s32.totalorder %s74_s11, %s74_s11 }
  0x4e   :  { %p15485_p9 = scmp.lt.s32.totalorder %s15483_s4, %s15479_s17 }
  0x50   :  { %p15486_p10 = por %p15485_p9, %p15484_p8 }
  0x52   :  { %p15487_p11 = pnand %p15486_p10, %p15480_p7 }
  0x54   :  { %15490 = shalt.err (!%p15487_p11)
}
  0x55   :  { %76 = dma.hbm_to_vmem [thread:$0]  %s17296_s7, 16, %s74_s11, [#allocation10]  }
  0x56   :  { %15513 = dma.done.wait [#allocation4], 10240  }
  0x57   :  { %15514 = vsyncadd [#allocation4], 4294957056 }
  0x58   :  { %15515 = dma.done.wait [#allocation7], 98336  }
  0x59   :  { %15516 = vsyncadd [#allocation7], 4294868960 }
  0x5a   :  { %15517 = dma.done.wait [#allocation10], 80  }
  0x5b   :  { %15518 = vsyncadd [#allocation10], 4294967216  ;;  %v17298_v0 = vmov 0.0   ;;  %vm194_vm0 = vcmask 1043456   ;;  %vm15531_vm1 = vmmov 1   ;;  %v102_v2 = vld [vmem:[#allocation3 + $0x8] sm:$0xff] }
  0x5c   :  { %319 = vmatprep.mubr.f32.mxu0 %v17298_v0  ;;  %408 = vmatprep.mubr.f32.mxu1 %v17298_v0  ;;  %vm15642_vm2 = vmpackc.low %vm194_vm0, %vm15531_vm1  ;;  %v122_v3 = vld [vmem:[#allocation3 + $0xa8] sm:$0xff]  ;;  %v104_v4 = vld [vmem:[#allocation3 + $0x18] sm:$0xff]  ;;  %vm181_vm3 = vcmask 228352   ;;  %vm5547_vm4 = vcmask 1041409   ;;  %vm12167_vm5 = vcmask 74752  }
  0x5d   :  { %v15646_v5 = vpack.c.bf16 %v122_v3, %v102_v2  ;;  %v124_v6 = vld [vmem:[#allocation3 + $0xb8] sm:$0xff]  ;;  %v101_v7 = vld [vmem:[#allocation3] sm:$0xff]  ;;  %v103_v11 = vld [vmem:[#allocation3 + $0x10] sm:$0xff] }
  0x5e   :  { %v121_v8 = vld [vmem:[#allocation3 + $0xa0] sm:$0xff]  ;;  %v15648_v9 = vpack.c.bf16 %v124_v6, %v104_v4  ;;  %v123_v12 = vld [vmem:[#allocation3 + $0xb0] sm:$0xff]  ;;  %v142_v13 = vld [vmem:[#allocation3 + $0x148] sm:$0xff] }
  0x5f   :  { %v15650_v10 = vpack.c.bf16 %v121_v8, %v101_v7  ;;  %13357 = vmatprep.subr.bf16.mxu0 %v15646_v5  ;;  %v15653_v14 = vpack.c.bf16 %v123_v12, %v103_v11  ;;  %v162_v15 = vld [vmem:[#allocation3 + $0x1e8] sm:$0xf]  ;;  %v144_v16 = vld [vmem:[#allocation3 + $0x158] sm:$0xff]  ;;  %v141_v20 = vld [vmem:[#allocation3 + $0x140] sm:$0xff] }
  0x60   :  { %v164_v17 = vld [vmem:[#allocation3 + $0x1f8] sm:$0xf]  ;;  %13367 = vmatprep.subr.bf16.mxu1 %v15648_v9  ;;  %v15657_v18 = vpack.c.bf16 %v162_v15, %v142_v13  ;;  %v161_v21 = vld [vmem:[#allocation3 + $0x1e0] sm:$0xf]  ;;  %v143_v22 = vld [vmem:[#allocation3 + $0x150] sm:$0xff] }
  0x61   :  { %13359 = vmatpush1.bf16.msra.mxu0 %v15650_v10  ;;  %v15659_v19 = vpack.c.bf16 %v164_v17, %v144_v16  ;;  %13369 = vmatpush1.bf16.msra.mxu1 %v15653_v14  ;;  %v15662_v23 = vpack.c.bf16 %v161_v21, %v141_v20  ;;  %v163_v24 = vld [vmem:[#allocation3 + $0x1f0] sm:$0xf]  ;;  %v106_v25 = vld [vmem:[#allocation3 + $0x28] sm:$0xff]  ;;  %v108_v28 = vld [vmem:[#allocation3 + $0x38] sm:$0xff] }
  0x62   :  { %13362 = vmatprep.subr.msk.bf16.mxu0 %vm15642_vm2, %v15657_v18  ;;  %v15670_v26 = vpack.c.bf16 %v163_v24, %v143_v22  ;;  %v126_v27 = vld [vmem:[#allocation3 + $0xc8] sm:$0xff]  ;;  %v128_v29 = vld [vmem:[#allocation3 + $0xd8] sm:$0xff]  ;;  %v105_v32 = vld [vmem:[#allocation3 + $0x20] sm:$0xff] }
  0x63   :  { %13372 = vmatprep.subr.msk.bf16.mxu1 %vm15642_vm2, %v15659_v19  ;;  %v15672_v30 = vpack.c.bf16 %v126_v27, %v106_v25  ;;  %v15674_v31 = vpack.c.bf16 %v128_v29, %v108_v28  ;;  %v125_v33 = vld [vmem:[#allocation3 + $0xc0] sm:$0xff]  ;;  %v107_v34 = vld [vmem:[#allocation3 + $0x30] sm:$0xff]  ;;  %v15682_v35 = vld [vmem:[%s17289_s0] sm:$0xff] }
  0x64   :  { %v15684_v36 = vpack.c.bf16 %v125_v33, %v105_v32  ;;  %v127_v37 = vld [vmem:[#allocation3 + $0xd0] sm:$0xff]  ;;  %v146_v39 = vld [vmem:[#allocation3 + $0x168] sm:$0xff]  ;;  %v148_v41 = vld [vmem:[#allocation3 + $0x178] sm:$0xff] }
  0x65   :  { %13365 = vmatpush1.bf16.msk.msra.mxu0 %vm15642_vm2, %v15662_v23  ;;  %13375 = vmatpush1.bf16.msk.msra.mxu1 %vm15642_vm2, %v15670_v26  ;;  %v15690_v38 = vpack.c.bf16 %v127_v37, %v107_v34  ;;  %v166_v40 = vld [vmem:[#allocation3 + $0x208] sm:$0xf]  ;;  %v168_v43 = vld [vmem:[#allocation3 + $0x218] sm:$0xf]  ;;  %v145_v44 = vld [vmem:[#allocation3 + $0x160] sm:$0xff] }
  0x66   :  { %13377 = vmatprep.subr.bf16.mxu0 %v15672_v30  ;;  %13387 = vmatprep.subr.bf16.mxu1 %v15674_v31  ;;  %v15693_v42 = vpack.c.bf16 %v166_v40, %v146_v39  ;;  %v165_v45 = vld [vmem:[#allocation3 + $0x200] sm:$0xf]  ;;  %v15700_v46 = vld [vmem:[%s17289_s0 + $0x8] sm:$0xff]  ;;  %v15702_v47 = vpack.c.bf16 %v168_v43, %v148_v41  ;;  %v110_v50 = vld [vmem:[#allocation3 + $0x48] sm:$0xff] }
  0x67   :  { %v147_v48 = vld [vmem:[#allocation3 + $0x170] sm:$0xff]  ;;  %v130_v51 = vld [vmem:[#allocation3 + $0xe8] sm:$0xff]  ;;  %v112_v52 = vld [vmem:[#allocation3 + $0x58] sm:$0xff]  ;;  %v15709_v53 = vpack.c.bf16 %v165_v45, %v145_v44 }
  0x68   :  { %12199 = vmatmul.mubr.msk.f32.vlgmr.msra.gmra.mrb[0].mxu0 %vm181_vm3, %v15682_v35  ;;  %v167_v49 = vld [vmem:[#allocation3 + $0x210] sm:$0xf]  ;;  %12205 = vmatmul.mubr.msk.f32.vlgmr.msra.gmra.mrb[0].mxu1 %vm181_vm3, %v15682_v35  ;;  %v132_v54 = vld [vmem:[#allocation3 + $0xf8] sm:$0xff]  ;;  %v15717_v56 = vpack.c.bf16 %v130_v51, %v110_v50  ;;  %v15751_v59 = vld [vmem:[%s17289_s0 + $0x18] sm:$0xf] }
  0x69   :  { %13379 = vmatpush1.bf16.msra.mxu0 %v15684_v36  ;;  %13389 = vmatpush1.bf16.msra.mxu1 %v15690_v38  ;;  %v15715_v55 = vpack.c.bf16 %v167_v49, %v147_v48  ;;  %v15724_v57 = vpack.c.bf16 %v132_v54, %v112_v52  ;;  %v15732_v58 = vld [vmem:[%s17289_s0 + $0x10] sm:$0xff]  ;;  %v109_v60 = vld [vmem:[#allocation3 + $0x40] sm:$0xff]  ;;  %v111_v62 = vld [vmem:[#allocation3 + $0x50] sm:$0xff] }
  0x6a   :  { %325 = vmatprep.mubr.f32.mxu0 %v17298_v0  ;;  %414 = vmatprep.mubr.f32.mxu1 %v17298_v0  ;;  %v129_v61 = vld [vmem:[#allocation3 + $0xe0] sm:$0xff]  ;;  %v131_v63 = vld [vmem:[#allocation3 + $0xf0] sm:$0xff]  ;;  %v150_v2 = vld [vmem:[#allocation3 + $0x188] sm:$0xff] }
  0x6b   :  { %13382 = vmatprep.subr.msk.bf16.mxu0 %vm15642_vm2, %v15693_v42  ;;  %13392 = vmatprep.subr.msk.bf16.mxu1 %vm15642_vm2, %v15702_v47  ;;  %v170_v3 = vld [vmem:[#allocation3 + $0x228] sm:$0xf]  ;;  %v15759_v4 = vpack.c.bf16 %v129_v61, %v109_v60  ;;  %v152_v6 = vld [vmem:[#allocation3 + $0x198] sm:$0xff]  ;;  %v15762_v8 = vpack.c.bf16 %v131_v63, %v111_v62  ;;  %v149_v12 = vld [vmem:[#allocation3 + $0x180] sm:$0xff] }
  0x6c   :  { %12200 = vmatmul.mubr.msk.f32.gmra.mrb[2].mxu0 %vm181_vm3, %v15700_v46  ;;  %12206 = vmatmul.mubr.msk.f32.gmra.mrb[2].mxu1 %vm181_vm3, %v15700_v46  ;;  %v172_v7 = vld [vmem:[#allocation3 + $0x238] sm:$0xf]  ;;  %v15764_v11 = vpack.c.bf16 %v170_v3, %v150_v2  ;;  %v169_v13 = vld [vmem:[#allocation3 + $0x220] sm:$0xf]  ;;  %v151_v15 = vld [vmem:[#allocation3 + $0x190] sm:$0xff] }
  0x6d   :  { %331 = vmatprep.mubr.f32.mxu0 %v17298_v0  ;;  %420 = vmatprep.mubr.f32.mxu1 %v17298_v0  ;;  %v15768_v16 = vpack.c.bf16 %v172_v7, %v152_v6  ;;  %v171_v17 = vld [vmem:[#allocation3 + $0x230] sm:$0xf]  ;;  %v114_v20 = vld [vmem:[#allocation3 + $0x68] sm:$0xff]  ;;  %v116_v22 = vld [vmem:[#allocation3 + $0x78] sm:$0xff]  ;;  %v15775_v25 = vpack.c.bf16 %v169_v13, %v149_v12 }
  0x6e   :  { %13385 = vmatpush1.bf16.msk.msra.mxu0 %vm15642_vm2, %v15709_v53  ;;  %13395 = vmatpush1.bf16.msk.msra.mxu1 %vm15642_vm2, %v15715_v55  ;;  %v134_v21 = vld [vmem:[#allocation3 + $0x108] sm:$0xff]  ;;  %v136_v24 = vld [vmem:[#allocation3 + $0x118] sm:$0xff]  ;;  %v15781_v27 = vpack.c.bf16 %v171_v17, %v151_v15  ;;  %v113_v32 = vld [vmem:[#allocation3 + $0x60] sm:$0xff] }
  0x6f   :  { %13397 = vmatprep.subr.bf16.mxu0 %v15717_v56  ;;  %13407 = vmatprep.subr.bf16.mxu1 %v15724_v57  ;;  %v15783_v28 = vpack.c.bf16 %v134_v21, %v114_v20  ;;  %v15790_v29 = vpack.c.bf16 %v136_v24, %v116_v22  ;;  %v133_v33 = vld [vmem:[#allocation3 + $0x100] sm:$0xff]  ;;  %v115_v34 = vld [vmem:[#allocation3 + $0x70] sm:$0xff]  ;;  %v154_v39 = vld [vmem:[#allocation3 + $0x1a8] sm:$0xff] }
  0x70   :  { %12201 = vmatmul.mubr.msk.f32.gmra.mrb[4].mxu0 %vm181_vm3, %v15732_v58  ;;  %12207 = vmatmul.mubr.msk.f32.gmra.mrb[4].mxu1 %vm181_vm3, %v15732_v58  ;;  %v135_v37 = vld [vmem:[#allocation3 + $0x110] sm:$0xff]  ;;  %v174_v40 = vld [vmem:[#allocation3 + $0x248] sm:$0xf]  ;;  %v156_v41 = vld [vmem:[#allocation3 + $0x1b8] sm:$0xff]  ;;  %v15815_v44 = vpack.c.bf16 %v133_v33, %v113_v32 }
  0x71   :  { %337 = vmatprep.mubr.f32.mxu0 %v17298_v0  ;;  %426 = vmatprep.mubr.f32.mxu1 %v17298_v0  ;;  %v176_v43 = vld [vmem:[#allocation3 + $0x258] sm:$0xf]  ;;  %v153_v45 = vld [vmem:[#allocation3 + $0x1a0] sm:$0xff]  ;;  %v15818_v49 = vpack.c.bf16 %v135_v37, %v115_v34  ;;  %v155_v50 = vld [vmem:[#allocation3 + $0x1b0] sm:$0xff]  ;;  %v15820_v60 = vpack.c.bf16 %v174_v40, %v154_v39 }
  0x72   :  { %v173_v48 = vld [vmem:[#allocation3 + $0x240] sm:$0xf]  ;;  %v175_v51 = vld [vmem:[#allocation3 + $0x250] sm:$0xf]  ;;  %v118_v52 = vld [vmem:[#allocation3 + $0x88] sm:$0xff]  ;;  %v15824_v63 = vpack.c.bf16 %v176_v43, %v156_v41 }
  0x73   :  { %v138_v54 = vld [vmem:[#allocation3 + $0x128] sm:$0xff]  ;;  %v120_v61 = vld [vmem:[#allocation3 + $0x98] sm:$0xff]  ;;  %v15831_v2 = vpack.c.bf16 %v173_v48, %v153_v45  ;;  %v15837_v3 = vpack.c.bf16 %v175_v51, %v155_v50  ;;  %v117_v12 = vld [vmem:[#allocation3 + $0x80] sm:$0xff] }
  0x74   :  { %12202 = vmatmul.mubr.msk.f32.gmra.mrb[6].mxu0 %vm181_vm3, %v15751_v59  ;;  %12208 = vmatmul.mubr.msk.f32.gmra.mrb[6].mxu1 %vm181_vm3, %v15751_v59  ;;  %v140_v62 = vld [vmem:[#allocation3 + $0x138] sm:$0xff]  ;;  %v15839_v6 = vpack.c.bf16 %v138_v54, %v118_v52  ;;  %v137_v13 = vld [vmem:[#allocation3 + $0x120] sm:$0xff]  ;;  %v119_v15 = vld [vmem:[#allocation3 + $0x90] sm:$0xff] }
  0x75   :  { %497 = vmatprep.mubr.f32.mxu0 %v17298_v0  ;;  %586 = vmatprep.mubr.f32.mxu1 %v17298_v0  ;;  %v15846_v7 = vpack.c.bf16 %v140_v62, %v120_v61  ;;  %v139_v17 = vld [vmem:[#allocation3 + $0x130] sm:$0xff]  ;;  %v158_v20 = vld [vmem:[#allocation3 + $0x1c8] sm:$0xff]  ;;  %v160_v22 = vld [vmem:[#allocation3 + $0x1d8] sm:$0xff]  ;;  %v15871_v32 = vpack.c.bf16 %v137_v13, %v117_v12 }
  0x76   :  { %v178_v21 = vld [vmem:[#allocation3 + $0x268] sm:$0xf]  ;;  %v180_v24 = vld [vmem:[#allocation3 + $0x278] sm:$0xf]  ;;  %v157_v33 = vld [vmem:[#allocation3 + $0x1c0] sm:$0xff]  ;;  %v15874_v37 = vpack.c.bf16 %v139_v17, %v119_v15 }
  0x77   :  { %v177_v34 = vld [vmem:[#allocation3 + $0x260] sm:$0xf]  ;;  %v159_v39 = vld [vmem:[#allocation3 + $0x1d0] sm:$0xff]  ;;  %v15876_v41 = vpack.c.bf16 %v178_v21, %v158_v20  ;;  %v15880_v43 = vpack.c.bf16 %v180_v24, %v160_v22  ;;  %v14193_v1 = vld [vmem:[#allocation8 + $0x8] ss:$16 sps:$4 sm:$0xff]  }
  0x78   :  { %12211 = vmatmul.mubr.msk.f32.vlgmr.msra.gmra.mrb[8].mxu0 %vm181_vm3, %v15682_v35  ;;  %12217 = vmatmul.mubr.msk.f32.vlgmr.msra.gmra.mrb[8].mxu1 %vm181_vm3, %v15682_v35  ;;  %v179_v40 = vld [vmem:[#allocation3 + $0x270] sm:$0xf]  ;;  %v15887_v45 = vpack.c.bf16 %v177_v34, %v157_v33  ;;  %v16208_v33 = vld [vmem:[%s17291_s2 + $0x10] sm:$0xff] }
  0x79   :  { %13399 = vmatpush1.bf16.msra.mxu0 %v15759_v4  ;;  %13409 = vmatpush1.bf16.msra.mxu1 %v15762_v8  ;;  %v15893_v48 = vpack.c.bf16 %v179_v40, %v159_v39  ;;  %v16222_v40 = vld [vmem:[%s17291_s2 + $0x18] sm:$0xf] }
  0x7a   :  { %503 = vmatprep.mubr.f32.mxu0 %v17298_v0  ;;  %592 = vmatprep.mubr.f32.mxu1 %v17298_v0 }
  0x7b   :  { %13402 = vmatprep.subr.msk.bf16.mxu0 %vm15642_vm2, %v15764_v11  ;;  %13412 = vmatprep.subr.msk.bf16.mxu1 %vm15642_vm2, %v15768_v16 }
  0x7c   :  { %12212 = vmatmul.mubr.msk.f32.gmra.mrb[10].mxu0 %vm181_vm3, %v15700_v46  ;;  %12218 = vmatmul.mubr.msk.f32.gmra.mrb[10].mxu1 %vm181_vm3, %v15700_v46 }
  0x7d   :  { %509 = vmatprep.mubr.f32.mxu0 %v17298_v0  ;;  %598 = vmatprep.mubr.f32.mxu1 %v17298_v0 }
  0x7e   :  { %13405 = vmatpush1.bf16.msk.msra.mxu0 %vm15642_vm2, %v15775_v25  ;;  %13415 = vmatpush1.bf16.msk.msra.mxu1 %vm15642_vm2, %v15781_v27 }
  0x7f   :  { %13417 = vmatprep.subr.bf16.mxu0 %v15783_v28  ;;  %13427 = vmatprep.subr.bf16.mxu1 %v15790_v29 }
  0x80   :  { %12213 = vmatmul.mubr.msk.f32.gmra.mrb[12].mxu0 %vm181_vm3, %v15732_v58  ;;  %12219 = vmatmul.mubr.msk.f32.gmra.mrb[12].mxu1 %vm181_vm3, %v15732_v58 }
  0x81   :  { %515 = vmatprep.mubr.f32.mxu0 %v17298_v0  ;;  %604 = vmatprep.mubr.f32.mxu1 %v17298_v0 }
  0x84   :  { %12214 = vmatmul.mubr.msk.f32.gmra.mrb[14].mxu0 %vm181_vm3, %v15751_v59  ;;  %12220 = vmatmul.mubr.msk.f32.gmra.mrb[14].mxu1 %vm181_vm3, %v15751_v59 }
  0x85   :  { %675 = vmatprep.mubr.f32.mxu0 %v17298_v0  ;;  %764 = vmatprep.mubr.f32.mxu1 %v17298_v0 }
  0x88   :  { %12223 = vmatmul.mubr.msk.f32.vlgmr.msra.gmra.mrb[16].mxu0 %vm181_vm3, %v15682_v35  ;;  %12229 = vmatmul.mubr.msk.f32.vlgmr.msra.gmra.mrb[16].mxu1 %vm181_vm3, %v15682_v35 }
  0x89   :  { %13419 = vmatpush1.bf16.msra.mxu0 %v15815_v44  ;;  %13429 = vmatpush1.bf16.msra.mxu1 %v15818_v49 }
  0x8a   :  { %681 = vmatprep.mubr.f32.mxu0 %v17298_v0  ;;  %770 = vmatprep.mubr.f32.mxu1 %v17298_v0 }
  0x8b   :  { %13422 = vmatprep.subr.msk.bf16.mxu0 %vm15642_vm2, %v15820_v60  ;;  %13432 = vmatprep.subr.msk.bf16.mxu1 %vm15642_vm2, %v15824_v63 }
  0x8c   :  { %12224 = vmatmul.mubr.msk.f32.gmra.mrb[18].mxu0 %vm181_vm3, %v15700_v46  ;;  %12230 = vmatmul.mubr.msk.f32.gmra.mrb[18].mxu1 %vm181_vm3, %v15700_v46 }
  0x8d   :  { %687 = vmatprep.mubr.f32.mxu0 %v17298_v0  ;;  %776 = vmatprep.mubr.f32.mxu1 %v17298_v0 }
  0x8e   :  { %13425 = vmatpush1.bf16.msk.msra.mxu0 %vm15642_vm2, %v15831_v2  ;;  %13435 = vmatpush1.bf16.msk.msra.mxu1 %vm15642_vm2, %v15837_v3 }
  0x8f   :  { %13437 = vmatprep.subr.bf16.mxu0 %v15839_v6  ;;  %13447 = vmatprep.subr.bf16.mxu1 %v15846_v7 }
  0x90   :  { %12225 = vmatmul.mubr.msk.f32.gmra.mrb[20].mxu0 %vm181_vm3, %v15732_v58  ;;  %12231 = vmatmul.mubr.msk.f32.gmra.mrb[20].mxu1 %vm181_vm3, %v15732_v58 }
  0x91   :  { %693 = vmatprep.mubr.f32.mxu0 %v17298_v0  ;;  %782 = vmatprep.mubr.f32.mxu1 %v17298_v0 }
  0x94   :  { %12226 = vmatmul.mubr.msk.f32.gmra.mrb[22].mxu0 %vm181_vm3, %v15751_v59  ;;  %12232 = vmatmul.mubr.msk.f32.gmra.mrb[22].mxu1 %vm181_vm3, %v15751_v59 }
  0x95   :  { %853 = vmatprep.mubr.f32.mxu0 %v17298_v0  ;;  %942 = vmatprep.mubr.f32.mxu1 %v17298_v0 }
  0x98   :  { %12235 = vmatmul.mubr.msk.f32.vlgmr.msra.gmra.mrb[24].mxu0 %vm181_vm3, %v15682_v35  ;;  %12241 = vmatmul.mubr.msk.f32.vlgmr.msra.gmra.mrb[24].mxu1 %vm181_vm3, %v15682_v35 }
  0x99   :  { %13439 = vmatpush1.bf16.msra.mxu0 %v15871_v32  ;;  %13449 = vmatpush1.bf16.msra.mxu1 %v15874_v37 }
  0x9a   :  { %859 = vmatprep.mubr.f32.mxu0 %v17298_v0  ;;  %948 = vmatprep.mubr.f32.mxu1 %v17298_v0 }
  0x9b   :  { %13442 = vmatprep.subr.msk.bf16.mxu0 %vm15642_vm2, %v15876_v41  ;;  %13452 = vmatprep.subr.msk.bf16.mxu1 %vm15642_vm2, %v15880_v43 }
  0x9c   :  { %12236 = vmatmul.mubr.msk.f32.gmra.mrb[26].mxu0 %vm181_vm3, %v15700_v46  ;;  %12242 = vmatmul.mubr.msk.f32.gmra.mrb[26].mxu1 %vm181_vm3, %v15700_v46 }
  0x9d   :  { %865 = vmatprep.mubr.f32.mxu0 %v17298_v0  ;;  %954 = vmatprep.mubr.f32.mxu1 %v17298_v0 }
  0x9e   :  { %13445 = vmatpush1.bf16.msk.msra.mxu0 %vm15642_vm2, %v15887_v45  ;;  %13455 = vmatpush1.bf16.msk.msra.mxu1 %vm15642_vm2, %v15893_v48 }
  0x9f   :  { %13457 = vmatprep.subr.bf16.mxu0 %v15646_v5  ;;  %13467 = vmatprep.subr.bf16.mxu1 %v15648_v9  ;;  %v15961_v5 = vld [vmem:[%s17289_s0 + $0x20] sm:$0xff]  ;;  %v15972_v9 = vld [vmem:[%s17289_s0 + $0x28] sm:$0xff] }
  0xa0   :  { %12237 = vmatmul.mubr.msk.f32.gmra.mrb[28].mxu0 %vm181_vm3, %v15732_v58  ;;  %12243 = vmatmul.mubr.msk.f32.gmra.mrb[28].mxu1 %vm181_vm3, %v15732_v58 }
  0xa1   :  { %871 = vmatprep.mubr.f32.mxu0 %v17298_v0  ;;  %960 = vmatprep.mubr.f32.mxu1 %v17298_v0 }
  0xa4   :  { %12238 = vmatmul.mubr.msk.f32.gmra.mrb[30].mxu0 %vm181_vm3, %v15751_v59  ;;  %12244 = vmatmul.mubr.msk.f32.gmra.mrb[30].mxu1 %vm181_vm3, %v15751_v59 }
  0xa5   :  { %1031 = vmatprep.mubr.f32.mxu0 %v17298_v0  ;;  %1120 = vmatprep.mubr.f32.mxu1 %v17298_v0 }
  0xa8   :  { %12247 = vmatmul.mubr.msk.f32.vlgmr.msra.gmra.mrb[32].mxu0 %vm181_vm3, %v15682_v35  ;;  %12253 = vmatmul.mubr.msk.f32.vlgmr.msra.gmra.mrb[32].mxu1 %vm181_vm3, %v15682_v35 }
  0xa9   :  { %13459 = vmatpush1.bf16.msra.mxu0 %v15650_v10  ;;  %13469 = vmatpush1.bf16.msra.mxu1 %v15653_v14  ;;  %v15985_v10 = vld [vmem:[%s17289_s0 + $0x30] sm:$0xff]  ;;  %v16008_v14 = vld [vmem:[%s17289_s0 + $0x38] sm:$0xf] }
  0xaa   :  { %1037 = vmatprep.mubr.f32.mxu0 %v17298_v0  ;;  %1126 = vmatprep.mubr.f32.mxu1 %v17298_v0 }
  0xab   :  { %13462 = vmatprep.subr.msk.bf16.mxu0 %vm15642_vm2, %v15657_v18  ;;  %13472 = vmatprep.subr.msk.bf16.mxu1 %vm15642_vm2, %v15659_v19 }
  0xac   :  { %12248 = vmatmul.mubr.msk.f32.gmra.mrb[34].mxu0 %vm181_vm3, %v15700_v46  ;;  %12254 = vmatmul.mubr.msk.f32.gmra.mrb[34].mxu1 %vm181_vm3, %v15700_v46 }
  0xad   :  { %1043 = vmatprep.mubr.f32.mxu0 %v17298_v0  ;;  %1132 = vmatprep.mubr.f32.mxu1 %v17298_v0 }
  0xae   :  { %13465 = vmatpush1.bf16.msk.msra.mxu0 %vm15642_vm2, %v15662_v23  ;;  %13475 = vmatpush1.bf16.msk.msra.mxu1 %vm15642_vm2, %v15670_v26 }
  0xaf   :  { %13477 = vmatprep.subr.bf16.mxu0 %v15672_v30  ;;  %13487 = vmatprep.subr.bf16.mxu1 %v15674_v31 }
  0xb0   :  { %12249 = vmatmul.mubr.msk.f32.gmra.mrb[36].mxu0 %vm181_vm3, %v15732_v58  ;;  %12255 = vmatmul.mubr.msk.f32.gmra.mrb[36].mxu1 %vm181_vm3, %v15732_v58 }
  0xb1   :  { %1049 = vmatprep.mubr.f32.mxu0 %v17298_v0  ;;  %1138 = vmatprep.mubr.f32.mxu1 %v17298_v0 }
  0xb4   :  { %12250 = vmatmul.mubr.msk.f32.gmra.mrb[38].mxu0 %vm181_vm3, %v15751_v59  ;;  %12256 = vmatmul.mubr.msk.f32.gmra.mrb[38].mxu1 %vm181_vm3, %v15751_v59 }
  0xb5   :  { %1221 = vmatprep.mubr.f32.mxu0 %v17298_v0  ;;  %1310 = vmatprep.mubr.f32.mxu1 %v17298_v0 }
  0xb8   :  { %12259 = vmatmul.mubr.msk.f32.vlgmr.msra.gmra.mrb[40].mxu0 %vm181_vm3, %v15961_v5  ;;  %12265 = vmatmul.mubr.msk.f32.vlgmr.msra.gmra.mrb[40].mxu1 %vm181_vm3, %v15961_v5 }
  0xb9   :  { %13479 = vmatpush1.bf16.msra.mxu0 %v15684_v36  ;;  %13489 = vmatpush1.bf16.msra.mxu1 %v15690_v38 }
  0xba   :  { %1227 = vmatprep.mubr.f32.mxu0 %v17298_v0  ;;  %1316 = vmatprep.mubr.f32.mxu1 %v17298_v0 }
  0xbb   :  { %13482 = vmatprep.subr.msk.bf16.mxu0 %vm15642_vm2, %v15693_v42  ;;  %13492 = vmatprep.subr.msk.bf16.mxu1 %vm15642_vm2, %v15702_v47 }
  0xbc   :  { %12260 = vmatmul.mubr.msk.f32.gmra.mrb[42].mxu0 %vm181_vm3, %v15972_v9  ;;  %12266 = vmatmul.mubr.msk.f32.gmra.mrb[42].mxu1 %vm181_vm3, %v15972_v9 }
  0xbd   :  { %1233 = vmatprep.mubr.f32.mxu0 %v17298_v0  ;;  %1322 = vmatprep.mubr.f32.mxu1 %v17298_v0 }
  0xbe   :  { %13485 = vmatpush1.bf16.msk.msra.mxu0 %vm15642_vm2, %v15709_v53  ;;  %13495 = vmatpush1.bf16.msk.msra.mxu1 %vm15642_vm2, %v15715_v55 }
  0xbf   :  { %13497 = vmatprep.subr.bf16.mxu0 %v15717_v56  ;;  %13507 = vmatprep.subr.bf16.mxu1 %v15724_v57 }
  0xc0   :  { %12261 = vmatmul.mubr.msk.f32.gmra.mrb[44].mxu0 %vm181_vm3, %v15985_v10  ;;  %12267 = vmatmul.mubr.msk.f32.gmra.mrb[44].mxu1 %vm181_vm3, %v15985_v10 }
  0xc1   :  { %1239 = vmatprep.mubr.f32.mxu0 %v17298_v0  ;;  %1328 = vmatprep.mubr.f32.mxu1 %v17298_v0 }
  0xc4   :  { %12262 = vmatmul.mubr.msk.f32.gmra.mrb[46].mxu0 %vm181_vm3, %v16008_v14  ;;  %12268 = vmatmul.mubr.msk.f32.gmra.mrb[46].mxu1 %vm181_vm3, %v16008_v14 }
  0xc5   :  { %1399 = vmatprep.mubr.f32.mxu0 %v17298_v0  ;;  %1488 = vmatprep.mubr.f32.mxu1 %v17298_v0 }
  0xc8   :  { %12271 = vmatmul.mubr.msk.f32.vlgmr.msra.gmra.mrb[48].mxu0 %vm181_vm3, %v15961_v5  ;;  %12277 = vmatmul.mubr.msk.f32.vlgmr.msra.gmra.mrb[48].mxu1 %vm181_vm3, %v15961_v5 }
  0xc9   :  { %1405 = vmatprep.mubr.f32.mxu0 %v17298_v0  ;;  %1494 = vmatprep.mubr.f32.mxu1 %v17298_v0 }
  0xca   :  { %13499 = vmatpush1.bf16.msra.mxu0 %v15759_v4  ;;  %13509 = vmatpush1.bf16.msra.mxu1 %v15762_v8 }
  0xcb   :  { %13502 = vmatprep.subr.msk.bf16.mxu0 %vm15642_vm2, %v15764_v11  ;;  %13512 = vmatprep.subr.msk.bf16.mxu1 %vm15642_vm2, %v15768_v16 }
  0xcc   :  { %12272 = vmatmul.mubr.msk.f32.gmra.mrb[50].mxu0 %vm181_vm3, %v15972_v9  ;;  %12278 = vmatmul.mubr.msk.f32.gmra.mrb[50].mxu1 %vm181_vm3, %v15972_v9 }
  0xcd   :  { %1411 = vmatprep.mubr.f32.mxu0 %v17298_v0  ;;  %1500 = vmatprep.mubr.f32.mxu1 %v17298_v0 }
  0xce   :  { %13505 = vmatpush1.bf16.msk.msra.mxu0 %vm15642_vm2, %v15775_v25  ;;  %13515 = vmatpush1.bf16.msk.msra.mxu1 %vm15642_vm2, %v15781_v27 }
  0xcf   :  { %13517 = vmatprep.subr.bf16.mxu0 %v15783_v28  ;;  %13527 = vmatprep.subr.bf16.mxu1 %v15790_v29 }
  0xd0   :  { %12273 = vmatmul.mubr.msk.f32.gmra.mrb[52].mxu0 %vm181_vm3, %v15985_v10  ;;  %12279 = vmatmul.mubr.msk.f32.gmra.mrb[52].mxu1 %vm181_vm3, %v15985_v10 }
  0xd1   :  { %1417 = vmatprep.mubr.f32.mxu0 %v17298_v0  ;;  %1506 = vmatprep.mubr.f32.mxu1 %v17298_v0 }
  0xd4   :  { %12274 = vmatmul.mubr.msk.f32.gmra.mrb[54].mxu0 %vm181_vm3, %v16008_v14  ;;  %12280 = vmatmul.mubr.msk.f32.gmra.mrb[54].mxu1 %vm181_vm3, %v16008_v14 }
  0xd5   :  { %1577 = vmatprep.mubr.f32.mxu0 %v17298_v0  ;;  %1666 = vmatprep.mubr.f32.mxu1 %v17298_v0 }
  0xd8   :  { %12283 = vmatmul.mubr.msk.f32.vlgmr.msra.gmra.mrb[56].mxu0 %vm181_vm3, %v15961_v5  ;;  %12289 = vmatmul.mubr.msk.f32.vlgmr.msra.gmra.mrb[56].mxu1 %vm181_vm3, %v15961_v5 }
  0xd9   :  { %1583 = vmatprep.mubr.f32.mxu0 %v17298_v0  ;;  %1672 = vmatprep.mubr.f32.mxu1 %v17298_v0 }
  0xda   :  { %13519 = vmatpush1.bf16.msra.mxu0 %v15815_v44  ;;  %13529 = vmatpush1.bf16.msra.mxu1 %v15818_v49 }
  0xdb   :  { %13522 = vmatprep.subr.msk.bf16.mxu0 %vm15642_vm2, %v15820_v60  ;;  %13532 = vmatprep.subr.msk.bf16.mxu1 %vm15642_vm2, %v15824_v63 }
  0xdc   :  { %12284 = vmatmul.mubr.msk.f32.gmra.mrb[58].mxu0 %vm181_vm3, %v15972_v9  ;;  %12290 = vmatmul.mubr.msk.f32.gmra.mrb[58].mxu1 %vm181_vm3, %v15972_v9 }
  0xdd   :  { %1589 = vmatprep.mubr.f32.mxu0 %v17298_v0  ;;  %1678 = vmatprep.mubr.f32.mxu1 %v17298_v0 }
  0xde   :  { %13525 = vmatpush1.bf16.msk.msra.mxu0 %vm15642_vm2, %v15831_v2  ;;  %13535 = vmatpush1.bf16.msk.msra.mxu1 %vm15642_vm2, %v15837_v3 }
  0xdf   :  { %13537 = vmatprep.subr.bf16.mxu0 %v15839_v6  ;;  %13547 = vmatprep.subr.bf16.mxu1 %v15846_v7 }
  0xe0   :  { %12285 = vmatmul.mubr.msk.f32.gmra.mrb[60].mxu0 %vm181_vm3, %v15985_v10  ;;  %12291 = vmatmul.mubr.msk.f32.gmra.mrb[60].mxu1 %vm181_vm3, %v15985_v10 }
  0xe1   :  { %1595 = vmatprep.mubr.f32.mxu0 %v17298_v0  ;;  %1684 = vmatprep.mubr.f32.mxu1 %v17298_v0 }
  0xe4   :  { %12286 = vmatmul.mubr.msk.f32.gmra.mrb[62].mxu0 %vm181_vm3, %v16008_v14  ;;  %12292 = vmatmul.mubr.msk.f32.gmra.mrb[62].mxu1 %vm181_vm3, %v16008_v14 }
  0xe5   :  { %1755 = vmatprep.mubr.f32.mxu0 %v17298_v0  ;;  %1844 = vmatprep.mubr.f32.mxu1 %v17298_v0 }
  0xe8   :  { %12295 = vmatmul.mubr.msk.f32.vlgmr.msra.gmra.mrb[64].mxu0 %vm181_vm3, %v15961_v5  ;;  %12301 = vmatmul.mubr.msk.f32.vlgmr.msra.gmra.mrb[64].mxu1 %vm181_vm3, %v15961_v5 }
  0xe9   :  { %1761 = vmatprep.mubr.f32.mxu0 %v17298_v0  ;;  %1850 = vmatprep.mubr.f32.mxu1 %v17298_v0 }
  0xea   :  { %13539 = vmatpush1.bf16.msra.mxu0 %v15871_v32  ;;  %13549 = vmatpush1.bf16.msra.mxu1 %v15874_v37 }
  0xeb   :  { %13542 = vmatprep.subr.msk.bf16.mxu0 %vm15642_vm2, %v15876_v41  ;;  %13552 = vmatprep.subr.msk.bf16.mxu1 %vm15642_vm2, %v15880_v43 }
  0xec   :  { %12296 = vmatmul.mubr.msk.f32.gmra.mrb[66].mxu0 %vm181_vm3, %v15972_v9  ;;  %12302 = vmatmul.mubr.msk.f32.gmra.mrb[66].mxu1 %vm181_vm3, %v15972_v9 }
  0xed   :  { %1767 = vmatprep.mubr.f32.mxu0 %v17298_v0  ;;  %1856 = vmatprep.mubr.f32.mxu1 %v17298_v0 }
  0xee   :  { %13545 = vmatpush1.bf16.msk.msra.mxu0 %vm15642_vm2, %v15887_v45  ;;  %13555 = vmatpush1.bf16.msk.msra.mxu1 %vm15642_vm2, %v15893_v48 }
  0xf0   :  { %12297 = vmatmul.mubr.msk.f32.gmra.mrb[68].mxu0 %vm181_vm3, %v15985_v10  ;;  %12303 = vmatmul.mubr.msk.f32.gmra.mrb[68].mxu1 %vm181_vm3, %v15985_v10 }
  0xf1   :  { %1773 = vmatprep.mubr.f32.mxu0 %v17298_v0  ;;  %1862 = vmatprep.mubr.f32.mxu1 %v17298_v0 }
  0xf4   :  { %12298 = vmatmul.mubr.msk.f32.gmra.mrb[70].mxu0 %vm181_vm3, %v16008_v14  ;;  %12304 = vmatmul.mubr.msk.f32.gmra.mrb[70].mxu1 %vm181_vm3, %v16008_v14 }
  0xf5   :  { %1933 = vmatprep.mubr.f32.mxu0 %v17298_v0  ;;  %2022 = vmatprep.mubr.f32.mxu1 %v17298_v0 }
  0xf8   :  { %12307 = vmatmul.mubr.msk.f32.vlgmr.msra.gmra.mrb[72].mxu0 %vm181_vm3, %v15961_v5  ;;  %12313 = vmatmul.mubr.msk.f32.vlgmr.msra.gmra.mrb[72].mxu1 %vm181_vm3, %v15961_v5 }
  0xf9   :  { %1939 = vmatprep.mubr.f32.mxu0 %v17298_v0  ;;  %2028 = vmatprep.mubr.f32.mxu1 %v17298_v0 }
  0xfc   :  { %12308 = vmatmul.mubr.msk.f32.gmra.mrb[74].mxu0 %vm181_vm3, %v15972_v9  ;;  %12314 = vmatmul.mubr.msk.f32.gmra.mrb[74].mxu1 %vm181_vm3, %v15972_v9 }
  0xfd   :  { %1945 = vmatprep.mubr.f32.mxu0 %v17298_v0  ;;  %2034 = vmatprep.mubr.f32.mxu1 %v17298_v0 }
 0x100   :  { %12309 = vmatmul.mubr.msk.f32.gmra.mrb[76].mxu0 %vm181_vm3, %v15985_v10  ;;  %12315 = vmatmul.mubr.msk.f32.gmra.mrb[76].mxu1 %vm181_vm3, %v15985_v10 }
 0x101   :  { %1951 = vmatprep.mubr.f32.mxu0 %v17298_v0  ;;  %2040 = vmatprep.mubr.f32.mxu1 %v17298_v0 }
 0x104   :  { %12310 = vmatmul.mubr.msk.f32.gmra.mrb[78].mxu0 %vm181_vm3, %v16008_v14  ;;  %12316 = vmatmul.mubr.msk.f32.gmra.mrb[78].mxu1 %vm181_vm3, %v16008_v14 }
 0x105   :  { %2134 = vmatprep.mubr.f32.mxu0 %v17298_v0  ;;  %2211 = vmatprep.mubr.f32.mxu1 %v17298_v0 }
 0x13b   :  { %v321_v18 = vpop.f32.mrb[0].mxu0  ;;  %v410_v19 = vpop.f32.mrb[0].mxu1 }
 0x13c   :  { %v323_v23 = vpop.f32.mrb[1].mxu0  ;;  %v412_v26 = vpop.f32.mrb[1].mxu1 }
 0x13f   :  { %v327_v30 = vpop.f32.mrb[2].mxu0  ;;  %v416_v35 = vpop.f32.mrb[2].mxu1 }
 0x140   :  { %v16166_v31 = vpack.c.bf16 %v327_v30, %v321_v18  ;;  %v329_v36 = vpop.f32.mrb[3].mxu0  ;;  %v16168_v38 = vpack.c.bf16 %v416_v35, %v410_v19  ;;  %v418_v46 = vpop.f32.mrb[3].mxu1 }
 0x141   :  { %v16170_v42 = vpack.c.bf16 %v329_v36, %v323_v23  ;;  %v16172_v47 = vpack.c.bf16 %v418_v46, %v412_v26 }
 0x143   :  { %17329 = vst [vmem:[#allocation17_spill] sm:$0xff] %v16170_v42  ;;  %17330 = vst [vmem:[#allocation18_spill] sm:$0xff] %v16172_v47  ;;  %v333_v53 = vpop.f32.mrb[4].mxu0  ;;  %v422_v55 = vpop.f32.mrb[4].mxu1 }
 0x144   :  { %v335_v56 = vpop.f32.mrb[5].mxu0  ;;  %v424_v57 = vpop.f32.mrb[5].mxu1 }
 0x147   :  { %v339_v58 = vpop.f32.mrb[6].mxu0  ;;  %v428_v4 = vpop.f32.mrb[6].mxu1 }
 0x148   :  { %v16174_v59 = vpack.c.bf16 %v339_v58, %v333_v53  ;;  %v341_v8 = vpop.f32.mrb[7].mxu0  ;;  %v16176_v11 = vpack.c.bf16 %v428_v4, %v422_v55  ;;  %v430_v25 = vpop.f32.mrb[7].mxu1 }
 0x149   :  { %v16178_v16 = vpack.c.bf16 %v341_v8, %v335_v56  ;;  %v16180_v27 = vpack.c.bf16 %v430_v25, %v424_v57 }
 0x14a   :  { %17331 = vst [vmem:[#allocation19_spill] sm:$0xff] %v16174_v59  ;;  %17332 = vst [vmem:[#allocation20_spill] sm:$0xff] %v16176_v11 }
 0x14b   :  { %17333 = vst [vmem:[#allocation21_spill] sm:$0xff] %v16180_v27  ;;  %v499_v28 = vpop.f32.mrb[8].mxu0  ;;  %v588_v29 = vpop.f32.mrb[8].mxu1 }
 0x14c   :  { %v501_v44 = vpop.f32.mrb[9].mxu0  ;;  %v590_v49 = vpop.f32.mrb[9].mxu1 }
 0x14f   :  { %v505_v50 = vpop.f32.mrb[10].mxu0  ;;  %v594_v52 = vpop.f32.mrb[10].mxu1 }
 0x150   :  { %v16182_v51 = vpack.c.bf16 %v505_v50, %v499_v28  ;;  %v507_v54 = vpop.f32.mrb[11].mxu0  ;;  %v16184_v60 = vpack.c.bf16 %v594_v52, %v588_v29  ;;  %v596_v62 = vpop.f32.mrb[11].mxu1 }
 0x151   :  { %v16186_v61 = vpack.c.bf16 %v507_v54, %v501_v44  ;;  %v16188_v63 = vpack.c.bf16 %v596_v62, %v590_v49 }
 0x153   :  { %v511_v2 = vpop.f32.mrb[12].mxu0  ;;  %13557 = vmatprep.subr.bf16.mxu0 %v16186_v61  ;;  %v600_v3 = vpop.f32.mrb[12].mxu1  ;;  %13567 = vmatprep.subr.bf16.mxu1 %v16188_v63 }
 0x154   :  { %v513_v6 = vpop.f32.mrb[13].mxu0  ;;  %13559 = vmatpush1.bf16.msra.mxu0 %v16182_v51  ;;  %v602_v7 = vpop.f32.mrb[13].mxu1  ;;  %13569 = vmatpush1.bf16.msra.mxu1 %v16184_v60 }
 0x157   :  { %v517_v12 = vpop.f32.mrb[14].mxu0  ;;  %v606_v15 = vpop.f32.mrb[14].mxu1 }
 0x158   :  { %v16194_v13 = vpack.c.bf16 %v517_v12, %v511_v2  ;;  %v519_v17 = vpop.f32.mrb[15].mxu0  ;;  %v16196_v20 = vpack.c.bf16 %v606_v15, %v600_v3  ;;  %v608_v22 = vpop.f32.mrb[15].mxu1 }
 0x159   :  { %v16198_v21 = vpack.c.bf16 %v519_v17, %v513_v6  ;;  %v16200_v24 = vpack.c.bf16 %v608_v22, %v602_v7 }
 0x15a   :  { %17334 = vst [vmem:[#allocation22_spill] sm:$0xff] %v16194_v13  ;;  %17335 = vst [vmem:[#allocation23_spill] sm:$0xff] %v16196_v20 }
 0x15b   :  { %17336 = vst [vmem:[#allocation24_spill] sm:$0xff] %v16200_v24  ;;  %v677_v32 = vpop.f32.mrb[16].mxu0  ;;  %13562 = vmatprep.subr.msk.bf16.mxu0 %vm15642_vm2, %v16198_v21  ;;  %v766_v34 = vpop.f32.mrb[16].mxu1  ;;  %13572 = vmatprep.subr.msk.bf16.mxu1 %vm15642_vm2, %v16200_v24 }
 0x15c   :  { %v679_v37 = vpop.f32.mrb[17].mxu0  ;;  %13565 = vmatpush1.bf16.msk.msra.mxu0 %vm15642_vm2, %v16194_v13  ;;  %v768_v39 = vpop.f32.mrb[17].mxu1  ;;  %13575 = vmatpush1.bf16.msk.msra.mxu1 %vm15642_vm2, %v16196_v20 }
 0x15f   :  { %v683_v41 = vpop.f32.mrb[18].mxu0  ;;  %12321 = vmatmul.mubr.msk.f32.vlgmr.msra.gmra.mrb[80].mxu0 %vm181_vm3, %v16208_v33  ;;  %v772_v45 = vpop.f32.mrb[18].mxu1  ;;  %12325 = vmatmul.mubr.msk.f32.vlgmr.msra.gmra.mrb[80].mxu1 %vm181_vm3, %v16208_v33 }
 0x160   :  { %v16226_v43 = vpack.c.bf16 %v683_v41, %v677_v32  ;;  %v685_v48 = vpop.f32.mrb[19].mxu0  ;;  %2140 = vmatprep.mubr.f32.mxu0 %v17298_v0  ;;  %v16231_v5 = vpack.c.bf16 %v772_v45, %v766_v34  ;;  %v774_v10 = vpop.f32.mrb[19].mxu1  ;;  %2217 = vmatprep.mubr.f32.mxu1 %v17298_v0 }
 0x161   :  { %v16233_v9 = vpack.c.bf16 %v685_v48, %v679_v37  ;;  %v16236_v14 = vpack.c.bf16 %v774_v10, %v768_v39 }
 0x163   :  { %17337 = vst [vmem:[#allocation25_spill] sm:$0xff] %v16233_v9  ;;  %17338 = vst [vmem:[#allocation26_spill] sm:$0xff] %v16236_v14  ;;  %v689_v18 = vpop.f32.mrb[20].mxu0  ;;  %12322 = vmatmul.mubr.msk.f32.gmra.mrb[82].mxu0 %vm181_vm3, %v16222_v40  ;;  %v778_v19 = vpop.f32.mrb[20].mxu1  ;;  %12326 = vmatmul.mubr.msk.f32.gmra.mrb[82].mxu1 %vm181_vm3, %v16222_v40 }
 0x164   :  { %v691_v23 = vpop.f32.mrb[21].mxu0  ;;  %2300 = vmatprep.mubr.f32.mxu0 %v17298_v0  ;;  %v780_v26 = vpop.f32.mrb[21].mxu1  ;;  %2377 = vmatprep.mubr.f32.mxu1 %v17298_v0 }
 0x167   :  { %v695_v30 = vpop.f32.mrb[22].mxu0  ;;  %v784_v36 = vpop.f32.mrb[22].mxu1 }
 0x168   :  { %v16244_v35 = vpack.c.bf16 %v695_v30, %v689_v18  ;;  %v697_v46 = vpop.f32.mrb[23].mxu0  ;;  %v16246_v53 = vpack.c.bf16 %v784_v36, %v778_v19  ;;  %v786_v56 = vpop.f32.mrb[23].mxu1 }
 0x169   :  { %v16248_v55 = vpack.c.bf16 %v697_v46, %v691_v23  ;;  %v16250_v57 = vpack.c.bf16 %v786_v56, %v780_v26 }
 0x16a   :  { %17339 = vst [vmem:[#allocation27_spill] sm:$0xff] %v16244_v35  ;;  %17340 = vst [vmem:[#allocation28_spill] sm:$0xff] %v16246_v53 }
 0x16b   :  { %v855_v58 = vpop.f32.mrb[24].mxu0  ;;  %v944_v4 = vpop.f32.mrb[24].mxu1 }
 0x16c   :  { %v857_v8 = vpop.f32.mrb[25].mxu0  ;;  %v946_v25 = vpop.f32.mrb[25].mxu1 }
 0x16f   :  { %v861_v28 = vpop.f32.mrb[26].mxu0  ;;  %v950_v44 = vpop.f32.mrb[26].mxu1 }
 0x170   :  { %v16252_v29 = vpack.c.bf16 %v861_v28, %v855_v58  ;;  %v863_v49 = vpop.f32.mrb[27].mxu0  ;;  %v16254_v50 = vpack.c.bf16 %v950_v44, %v944_v4  ;;  %v952_v54 = vpop.f32.mrb[27].mxu1 }
 0x171   :  { %v16256_v52 = vpack.c.bf16 %v863_v49, %v857_v8  ;;  %v16258_v62 = vpack.c.bf16 %v952_v54, %v946_v25 }
 0x173   :  { %17341 = vst [vmem:[#allocation29_spill] sm:$0xff] %v16256_v52  ;;  %17342 = vst [vmem:[#allocation30_spill] sm:$0xff] %v16258_v62  ;;  %v867_v2 = vpop.f32.mrb[28].mxu0  ;;  %v956_v3 = vpop.f32.mrb[28].mxu1 }
 0x174   :  { %v869_v6 = vpop.f32.mrb[29].mxu0  ;;  %v958_v7 = vpop.f32.mrb[29].mxu1 }
 0x177   :  { %v873_v12 = vpop.f32.mrb[30].mxu0  ;;  %v962_v17 = vpop.f32.mrb[30].mxu1 }
 0x178   :  { %v16260_v15 = vpack.c.bf16 %v873_v12, %v867_v2  ;;  %v875_v22 = vpop.f32.mrb[31].mxu0  ;;  %v16262_v32 = vpack.c.bf16 %v962_v17, %v956_v3  ;;  %v964_v37 = vpop.f32.mrb[31].mxu1 }
 0x179   :  { %v16264_v34 = vpack.c.bf16 %v875_v22, %v869_v6  ;;  %v16266_v39 = vpack.c.bf16 %v964_v37, %v958_v7 }
 0x17a   :  { %17343 = vst [vmem:[#allocation31_spill] sm:$0xff] %v16260_v15  ;;  %17344 = vst [vmem:[#allocation32_spill] sm:$0xff] %v16262_v32 }
 0x17b   :  { %v1033_v41 = vpop.f32.mrb[32].mxu0  ;;  %v1122_v45 = vpop.f32.mrb[32].mxu1 }
 0x17c   :  { %v1035_v48 = vpop.f32.mrb[33].mxu0  ;;  %v1124_v10 = vpop.f32.mrb[33].mxu1 }
 0x17f   :  { %v1039_v18 = vpop.f32.mrb[34].mxu0  ;;  %v1128_v23 = vpop.f32.mrb[34].mxu1 }
 0x180   :  { %v16268_v19 = vpack.c.bf16 %v1039_v18, %v1033_v41  ;;  %v1041_v26 = vpop.f32.mrb[35].mxu0  ;;  %v16270_v30 = vpack.c.bf16 %v1128_v23, %v1122_v45  ;;  %v1130_v46 = vpop.f32.mrb[35].mxu1 }
 0x181   :  { %v16272_v36 = vpack.c.bf16 %v1041_v26, %v1035_v48  ;;  %v16274_v56 = vpack.c.bf16 %v1130_v46, %v1124_v10 }
 0x183   :  { %v1045_v58 = vpop.f32.mrb[36].mxu0  ;;  %v1134_v4 = vpop.f32.mrb[36].mxu1 }
 0x184   :  { %v1047_v8 = vpop.f32.mrb[37].mxu0  ;;  %v1136_v25 = vpop.f32.mrb[37].mxu1 }
 0x187   :  { %v1051_v28 = vpop.f32.mrb[38].mxu0  ;;  %v1140_v49 = vpop.f32.mrb[38].mxu1 }
 0x188   :  { %v16276_v44 = vpack.c.bf16 %v1051_v28, %v1045_v58  ;;  %v1053_v54 = vpop.f32.mrb[39].mxu0  ;;  %v16278_v2 = vpack.c.bf16 %v1140_v49, %v1134_v4  ;;  %v1142_v6 = vpop.f32.mrb[39].mxu1 }
 0x189   :  { %v16280_v3 = vpack.c.bf16 %v1053_v54, %v1047_v8  ;;  %v16282_v7 = vpack.c.bf16 %v1142_v6, %v1136_v25 }
 0x18b   :  { %v1223_v12 = vpop.f32.mrb[40].mxu0  ;;  %v1312_v17 = vpop.f32.mrb[40].mxu1 }
 0x18c   :  { %v1225_v22 = vpop.f32.mrb[41].mxu0  ;;  %v1314_v37 = vpop.f32.mrb[41].mxu1 }
 0x18f   :  { %v1229_v41 = vpop.f32.mrb[42].mxu0  ;;  %v1318_v48 = vpop.f32.mrb[42].mxu1 }
 0x190   :  { %v16284_v45 = vpack.c.bf16 %v1229_v41, %v1223_v12  ;;  %v1231_v10 = vpop.f32.mrb[43].mxu0  ;;  %v16286_v18 = vpack.c.bf16 %v1318_v48, %v1312_v17  ;;  %v1320_v26 = vpop.f32.mrb[43].mxu1 }
 0x191   :  { %v16288_v23 = vpack.c.bf16 %v1231_v10, %v1225_v22  ;;  %v16290_v46 = vpack.c.bf16 %v1320_v26, %v1314_v37 }
 0x193   :  { %17345 = vst [vmem:[#allocation33_spill] sm:$0xff] %v16288_v23  ;;  %17346 = vst [vmem:[#allocation34_spill] sm:$0xff] %v16290_v46  ;;  %v1235_v58 = vpop.f32.mrb[44].mxu0  ;;  %v1324_v4 = vpop.f32.mrb[44].mxu1 }
 0x194   :  { %v1237_v8 = vpop.f32.mrb[45].mxu0  ;;  %v1326_v25 = vpop.f32.mrb[45].mxu1 }
 0x197   :  { %v1241_v28 = vpop.f32.mrb[46].mxu0  ;;  %v1330_v54 = vpop.f32.mrb[46].mxu1 }
 0x198   :  { %v16292_v49 = vpack.c.bf16 %v1241_v28, %v1235_v58  ;;  %v1243_v6 = vpop.f32.mrb[47].mxu0  ;;  %v16294_v12 = vpack.c.bf16 %v1330_v54, %v1324_v4  ;;  %v1332_v17 = vpop.f32.mrb[47].mxu1 }
 0x199   :  { %v16296_v41 = vpack.c.bf16 %v1243_v6, %v1237_v8  ;;  %v16298_v48 = vpack.c.bf16 %v1332_v17, %v1326_v25 }
 0x19a   :  { %17347 = vst [vmem:[#allocation35_spill] sm:$0xff] %v16292_v49  ;;  %17348 = vst [vmem:[#allocation36_spill] sm:$0xff] %v16294_v12 }
 0x19b   :  { %v1401_v22 = vpop.f32.mrb[48].mxu0  ;;  %v1490_v10 = vpop.f32.mrb[48].mxu1 }
 0x19c   :  { %v1403_v37 = vpop.f32.mrb[49].mxu0  ;;  %v1492_v26 = vpop.f32.mrb[49].mxu1 }
 0x19f   :  { %v1407_v0 = vpop.f32.mrb[50].mxu0  ;;  %v1496_v13 = vpop.f32.mrb[50].mxu1 }
 0x1a0   :  { %v16300_v20 = vpack.c.bf16 %v1407_v0, %v1401_v22  ;;  %v1409_v24 = vpop.f32.mrb[51].mxu0  ;;  %v16302_v58 = vpack.c.bf16 %v1496_v13, %v1490_v10  ;;  %v1498_v4 = vpop.f32.mrb[51].mxu1 }
 0x1a1   :  { %v16304_v28 = vpack.c.bf16 %v1409_v24, %v1403_v37  ;;  %v16306_v54 = vpack.c.bf16 %v1498_v4, %v1492_v26 }
 0x1a2   :  { %17349 = vst [vmem:[#allocation37_spill] sm:$0xff] %v16300_v20 }
 0x1a3   :  { %v1413_v8 = vpop.f32.mrb[52].mxu0  ;;  %13577 = vmatprep.subr.bf16.mxu0 %v16304_v28  ;;  %v1502_v25 = vpop.f32.mrb[52].mxu1  ;;  %13587 = vmatprep.subr.bf16.mxu1 %v16306_v54 }
 0x1a4   :  { %v1415_v6 = vpop.f32.mrb[53].mxu0  ;;  %13579 = vmatpush1.bf16.msra.mxu0 %v16300_v20  ;;  %v1504_v0 = vpop.f32.mrb[53].mxu1  ;;  %13589 = vmatpush1.bf16.msra.mxu1 %v16302_v58 }
 0x1a7   :  { %v1419_v17 = vpop.f32.mrb[54].mxu0  ;;  %v1508_v24 = vpop.f32.mrb[54].mxu1 }
 0x1a8   :  { %v16312_v13 = vpack.c.bf16 %v1419_v17, %v1413_v8  ;;  %v1421_v22 = vpop.f32.mrb[55].mxu0  ;;  %v16314_v10 = vpack.c.bf16 %v1508_v24, %v1502_v25  ;;  %v1510_v26 = vpop.f32.mrb[55].mxu1 }
 0x1a9   :  { %v16316_v37 = vpack.c.bf16 %v1421_v22, %v1415_v6  ;;  %v16318_v4 = vpack.c.bf16 %v1510_v26, %v1504_v0 }
 0x1ab   :  { %13582 = vmatprep.subr.msk.bf16.mxu0 %vm15642_vm2, %v16316_v37  ;;  %v1579_v20 = vpop.f32.mrb[56].mxu0  ;;  %13592 = vmatprep.subr.msk.bf16.mxu1 %vm15642_vm2, %v16318_v4  ;;  %v1668_v8 = vpop.f32.mrb[56].mxu1 }
 0x1ac   :  { %13585 = vmatpush1.bf16.msk.msra.mxu0 %vm15642_vm2, %v16312_v13  ;;  %v1581_v25 = vpop.f32.mrb[57].mxu0  ;;  %13595 = vmatpush1.bf16.msk.msra.mxu1 %vm15642_vm2, %v16314_v10  ;;  %v1670_v6 = vpop.f32.mrb[57].mxu1 }
 0x1ad   :  { %13597 = vmatprep.subr.bf16.mxu0 %v16170_v42  ;;  %13607 = vmatprep.subr.bf16.mxu1 %v16172_v47 }
 0x1af   :  { %12329 = vmatmul.mubr.msk.f32.vlgmr.msra.gmra.mrb[84].mxu0 %vm181_vm3, %v16208_v33  ;;  %v1585_v0 = vpop.f32.mrb[58].mxu0  ;;  %12333 = vmatmul.mubr.msk.f32.vlgmr.msra.gmra.mrb[84].mxu1 %vm181_vm3, %v16208_v33  ;;  %v1674_v24 = vpop.f32.mrb[58].mxu1  ;;  %v17351_v33 = vmov 0.0  }
 0x1b0   :  { %13599 = vmatpush1.bf16.msra.mxu0 %v16166_v31  ;;  %v16339_v17 = vpack.c.bf16 %v1585_v0, %v1579_v20  ;;  %v1587_v22 = vpop.f32.mrb[59].mxu0  ;;  %13609 = vmatpush1.bf16.msra.mxu1 %v16168_v38  ;;  %v16345_v26 = vpack.c.bf16 %v1674_v24, %v1668_v8  ;;  %v1676_v42 = vpop.f32.mrb[59].mxu1  ;;  %v2047_v8 = vld [vmem:[%s17291_s2] sm:$0xff]  ;;  %v2048_v24 = vld [vmem:[%s17291_s2 + $0x8] sm:$0xf] }
 0x1b1   :  { %13602 = vmatprep.subr.msk.bf16.mxu0 %vm15642_vm2, %v16178_v16  ;;  %v16347_v47 = vpack.c.bf16 %v1587_v22, %v1581_v25  ;;  %13612 = vmatprep.subr.msk.bf16.mxu1 %vm15642_vm2, %v16180_v27  ;;  %v16353_v20 = vpack.c.bf16 %v1676_v42, %v1670_v6 }
 0x1b2   :  { %2306 = vmatprep.mubr.f32.mxu0 %v17351_v33  ;;  %2383 = vmatprep.mubr.f32.mxu1 %v17351_v33 }
 0x1b3   :  { %17350 = vst [vmem:[#allocation38_spill] sm:$0xff] %v16347_v47  ;;  %17352 = vst [vmem:[#allocation39_spill] sm:$0xff] %v16353_v20  ;;  %12330 = vmatmul.mubr.msk.f32.gmra.mrb[86].mxu0 %vm181_vm3, %v16222_v40  ;;  %v1591_v0 = vpop.f32.mrb[60].mxu0  ;;  %12334 = vmatmul.mubr.msk.f32.gmra.mrb[86].mxu1 %vm181_vm3, %v16222_v40  ;;  %v1680_v25 = vpop.f32.mrb[60].mxu1 }
 0x1b4   :  { %13605 = vmatpush1.bf16.msk.msra.mxu0 %vm15642_vm2, %v16174_v59  ;;  %v1593_v42 = vpop.f32.mrb[61].mxu0  ;;  %13615 = vmatpush1.bf16.msk.msra.mxu1 %vm15642_vm2, %v16176_v11  ;;  %v1682_v6 = vpop.f32.mrb[61].mxu1 }
 0x1b5   :  { %13617 = vmatprep.subr.bf16.mxu0 %v16288_v23  ;;  %13627 = vmatprep.subr.bf16.mxu1 %v16290_v46 }
 0x1b6   :  { %2472 = vmatprep.mubr.f32.mxu0 %v17351_v33  ;;  %2549 = vmatprep.mubr.f32.mxu1 %v17351_v33 }
 0x1b7   :  { %12337 = vmatmul.mubr.msk.f32.vlgmr.msra.gmra.mrb[80].mxu0 %vm181_vm3, %v2047_v8  ;;  %v1597_v40 = vpop.f32.mrb[62].mxu0  ;;  %12341 = vmatmul.mubr.msk.f32.vlgmr.msra.gmra.mrb[80].mxu1 %vm181_vm3, %v2047_v8  ;;  %v1686_v23 = vpop.f32.mrb[62].mxu1 }
 0x1b8   :  { %13619 = vmatpush1.bf16.msra.mxu0 %v16284_v45  ;;  %v16379_v22 = vpack.c.bf16 %v1597_v40, %v1591_v0  ;;  %v1599_v11 = vpop.f32.mrb[63].mxu0  ;;  %13629 = vmatpush1.bf16.msra.mxu1 %v16286_v18  ;;  %v16385_v46 = vpack.c.bf16 %v1686_v23, %v1680_v25  ;;  %v1688_v27 = vpop.f32.mrb[63].mxu1 }
 0x1b9   :  { %13622 = vmatprep.subr.msk.bf16.mxu0 %vm15642_vm2, %v16296_v41  ;;  %v16387_v59 = vpack.c.bf16 %v1599_v11, %v1593_v42  ;;  %13632 = vmatprep.subr.msk.bf16.mxu1 %vm15642_vm2, %v16298_v48  ;;  %v16393_v0 = vpack.c.bf16 %v1688_v27, %v1682_v6 }
 0x1ba   :  { %17353 = vst [vmem:[#allocation40_spill] sm:$0xff] %v16379_v22  ;;  %17354 = vst [vmem:[#allocation41_spill] sm:$0xff] %v16385_v46  ;;  %2478 = vmatprep.mubr.f32.mxu0 %v17351_v33  ;;  %2555 = vmatprep.mubr.f32.mxu1 %v17351_v33 }
 0x1bb   :  { %12338 = vmatmul.mubr.msk.f32.gmra.mrb[82].mxu0 %vm181_vm3, %v2048_v24  ;;  %v1757_v40 = vpop.f32.mrb[64].mxu0  ;;  %12342 = vmatmul.mubr.msk.f32.gmra.mrb[82].mxu1 %vm181_vm3, %v2048_v24  ;;  %v1846_v11 = vpop.f32.mrb[64].mxu1 }
 0x1bc   :  { %13625 = vmatpush1.bf16.msk.msra.mxu0 %vm15642_vm2, %v16292_v49  ;;  %v1759_v23 = vpop.f32.mrb[65].mxu0  ;;  %13635 = vmatpush1.bf16.msk.msra.mxu1 %vm15642_vm2, %v16294_v12  ;;  %v1848_v27 = vpop.f32.mrb[65].mxu1 }
 0x1bd   :  { %13637 = vmatprep.subr.bf16.mxu0 %v16233_v9  ;;  %13647 = vmatprep.subr.bf16.mxu1 %v16236_v14 }
 0x1be   :  { %2638 = vmatprep.mubr.f32.mxu0 %v17351_v33  ;;  %2715 = vmatprep.mubr.f32.mxu1 %v17351_v33 }
 0x1bf   :  { %12345 = vmatmul.mubr.msk.f32.vlgmr.msra.gmra.mrb[84].mxu0 %vm181_vm3, %v2047_v8  ;;  %v1763_v25 = vpop.f32.mrb[66].mxu0  ;;  %12349 = vmatmul.mubr.msk.f32.vlgmr.msra.gmra.mrb[84].mxu1 %vm181_vm3, %v2047_v8  ;;  %v1852_v6 = vpop.f32.mrb[66].mxu1 }
 0x1c0   :  { %13639 = vmatpush1.bf16.msra.mxu0 %v16226_v43  ;;  %v16411_v42 = vpack.c.bf16 %v1763_v25, %v1757_v40  ;;  %v1765_v12 = vpop.f32.mrb[67].mxu0  ;;  %13649 = vmatpush1.bf16.msra.mxu1 %v16231_v5  ;;  %v16417_v14 = vpack.c.bf16 %v1852_v6, %v1846_v11  ;;  %v1854_v49 = vpop.f32.mrb[67].mxu1 }
 0x1c1   :  { %13642 = vmatprep.subr.msk.bf16.mxu0 %vm15642_vm2, %v16248_v55  ;;  %v16419_v9 = vpack.c.bf16 %v1765_v12, %v1759_v23  ;;  %13652 = vmatprep.subr.msk.bf16.mxu1 %vm15642_vm2, %v16250_v57  ;;  %v16425_v8 = vpack.c.bf16 %v1854_v49, %v1848_v27  ;;  %v12351_v12 = vld [vmem:[%s17291_s2 + $0x20] sm:$0xff]  ;;  %v12352_v27 = vld [vmem:[%s17291_s2 + $0x28] sm:$0xf] }
 0x1c2   :  { %2644 = vmatprep.mubr.f32.mxu0 %v17351_v33  ;;  %2721 = vmatprep.mubr.f32.mxu1 %v17351_v33 }
 0x1c3   :  { %17355 = vst [vmem:[#allocation42_spill] sm:$0xff] %v16419_v9  ;;  %17356 = vst [vmem:[#allocation43_spill] sm:$0xff] %v16425_v8  ;;  %12346 = vmatmul.mubr.msk.f32.gmra.mrb[86].mxu0 %vm181_vm3, %v2048_v24  ;;  %v1769_v40 = vpop.f32.mrb[68].mxu0  ;;  %12350 = vmatmul.mubr.msk.f32.gmra.mrb[86].mxu1 %vm181_vm3, %v2048_v24  ;;  %v1858_v11 = vpop.f32.mrb[68].mxu1 }
 0x1c4   :  { %13645 = vmatpush1.bf16.msk.msra.mxu0 %vm15642_vm2, %v16244_v35  ;;  %v1771_v23 = vpop.f32.mrb[69].mxu0  ;;  %13655 = vmatpush1.bf16.msk.msra.mxu1 %vm15642_vm2, %v16246_v53  ;;  %v1860_v49 = vpop.f32.mrb[69].mxu1 }
 0x1c5   :  { %13657 = vmatprep.subr.bf16.mxu0 %v16347_v47  ;;  %13667 = vmatprep.subr.bf16.mxu1 %v16353_v20 }
 0x1c6   :  { %2813 = vmatprep.mubr.f32.mxu0 %v17351_v33  ;;  %2890 = vmatprep.mubr.f32.mxu1 %v17351_v33 }
 0x1c7   :  { %12355 = vmatmul.mubr.msk.f32.vlgmr.msra.gmra.mrb[80].mxu0 %vm181_vm3, %v12351_v12  ;;  %v1775_v24 = vpop.f32.mrb[70].mxu0  ;;  %12359 = vmatmul.mubr.msk.f32.vlgmr.msra.gmra.mrb[80].mxu1 %vm181_vm3, %v12351_v12  ;;  %v1864_v6 = vpop.f32.mrb[70].mxu1 }
 0x1c8   :  { %13659 = vmatpush1.bf16.msra.mxu0 %v16339_v17  ;;  %v16449_v25 = vpack.c.bf16 %v1775_v24, %v1769_v40  ;;  %v1777_v47 = vpop.f32.mrb[71].mxu0  ;;  %13669 = vmatpush1.bf16.msra.mxu1 %v16345_v26  ;;  %v16455_v20 = vpack.c.bf16 %v1864_v6, %v1858_v11  ;;  %v1866_v35 = vpop.f32.mrb[71].mxu1 }
 0x1c9   :  { %13662 = vmatprep.subr.msk.bf16.mxu0 %vm15642_vm2, %v16387_v59  ;;  %v16457_v53 = vpack.c.bf16 %v1777_v47, %v1771_v23  ;;  %13672 = vmatprep.subr.msk.bf16.mxu1 %vm15642_vm2, %v16393_v0  ;;  %v16463_v40 = vpack.c.bf16 %v1866_v35, %v1860_v49 }
 0x1ca   :  { %2819 = vmatprep.mubr.f32.mxu0 %v17351_v33  ;;  %2896 = vmatprep.mubr.f32.mxu1 %v17351_v33 }
 0x1cb   :  { %12356 = vmatmul.mubr.msk.f32.gmra.mrb[82].mxu0 %vm181_vm3, %v12352_v27  ;;  %v1935_v24 = vpop.f32.mrb[72].mxu0  ;;  %12360 = vmatmul.mubr.msk.f32.gmra.mrb[82].mxu1 %vm181_vm3, %v12352_v27  ;;  %v2024_v47 = vpop.f32.mrb[72].mxu1 }
 0x1cc   :  { %13665 = vmatpush1.bf16.msk.msra.mxu0 %vm15642_vm2, %v16379_v22  ;;  %v1937_v11 = vpop.f32.mrb[73].mxu0  ;;  %13675 = vmatpush1.bf16.msk.msra.mxu1 %vm15642_vm2, %v16385_v46  ;;  %v2026_v35 = vpop.f32.mrb[73].mxu1 }
 0x1cd   :  { %13677 = vmatprep.subr.bf16.mxu0 %v16256_v52  ;;  %13687 = vmatprep.subr.bf16.mxu1 %v16258_v62 }
 0x1ce   :  { %2979 = vmatprep.mubr.f32.mxu0 %v17351_v33  ;;  %3056 = vmatprep.mubr.f32.mxu1 %v17351_v33 }
 0x1cf   :  { %12363 = vmatmul.mubr.msk.f32.vlgmr.msra.gmra.mrb[84].mxu0 %vm181_vm3, %v12351_v12  ;;  %v1941_v23 = vpop.f32.mrb[74].mxu0  ;;  %12367 = vmatmul.mubr.msk.f32.vlgmr.msra.gmra.mrb[84].mxu1 %vm181_vm3, %v12351_v12  ;;  %v2030_v6 = vpop.f32.mrb[74].mxu1 }
 0x1d0   :  { %13679 = vmatpush1.bf16.msra.mxu0 %v16252_v29  ;;  %v16481_v49 = vpack.c.bf16 %v1941_v23, %v1935_v24  ;;  %v1943_v46 = vpop.f32.mrb[75].mxu0  ;;  %13689 = vmatpush1.bf16.msra.mxu1 %v16254_v50  ;;  %v16487_v62 = vpack.c.bf16 %v2030_v6, %v2024_v47  ;;  %v2032_v22 = vpop.f32.mrb[75].mxu1 }
 0x1d1   :  { %13682 = vmatprep.subr.msk.bf16.mxu0 %vm15642_vm2, %v16264_v34  ;;  %v16489_v52 = vpack.c.bf16 %v1943_v46, %v1937_v11  ;;  %13692 = vmatprep.subr.msk.bf16.mxu1 %vm15642_vm2, %v16266_v39  ;;  %v16495_v12 = vpack.c.bf16 %v2032_v22, %v2026_v35  ;;  %v12369_v46 = vld [vmem:[%s17291_s2 + $0x30] sm:$0xff]  ;;  %v12370_v35 = vld [vmem:[%s17291_s2 + $0x38] sm:$0xf] }
 0x1d2   :  { %2985 = vmatprep.mubr.f32.mxu0 %v17351_v33  ;;  %3062 = vmatprep.mubr.f32.mxu1 %v17351_v33 }
 0x1d3   :  { %12364 = vmatmul.mubr.msk.f32.gmra.mrb[86].mxu0 %vm181_vm3, %v12352_v27  ;;  %v1947_v24 = vpop.f32.mrb[76].mxu0  ;;  %12368 = vmatmul.mubr.msk.f32.gmra.mrb[86].mxu1 %vm181_vm3, %v12352_v27  ;;  %v2036_v47 = vpop.f32.mrb[76].mxu1 }
 0x1d4   :  { %13685 = vmatpush1.bf16.msk.msra.mxu0 %vm15642_vm2, %v16260_v15  ;;  %v1949_v11 = vpop.f32.mrb[77].mxu0  ;;  %13695 = vmatpush1.bf16.msk.msra.mxu1 %vm15642_vm2, %v16262_v32  ;;  %v2038_v22 = vpop.f32.mrb[77].mxu1 }
 0x1d5   :  { %13697 = vmatprep.subr.bf16.mxu0 %v16419_v9  ;;  %13707 = vmatprep.subr.bf16.mxu1 %v16425_v8 }
 0x1d6   :  { %3170 = vmatprep.mubr.f32.mxu0 %v17351_v33  ;;  %3247 = vmatprep.mubr.f32.mxu1 %v17351_v33 }
 0x1d7   :  { %12373 = vmatmul.mubr.msk.f32.vlgmr.msra.gmra.mrb[80].mxu0 %vm181_vm3, %v12369_v46  ;;  %v1953_v27 = vpop.f32.mrb[78].mxu0  ;;  %12377 = vmatmul.mubr.msk.f32.vlgmr.msra.gmra.mrb[80].mxu1 %vm181_vm3, %v12369_v46  ;;  %v2042_v6 = vpop.f32.mrb[78].mxu1 }
 0x1d8   :  { %13699 = vmatpush1.bf16.msra.mxu0 %v16411_v42  ;;  %v16519_v23 = vpack.c.bf16 %v1953_v27, %v1947_v24  ;;  %v1955_v9 = vpop.f32.mrb[79].mxu0  ;;  %13709 = vmatpush1.bf16.msra.mxu1 %v16417_v14  ;;  %v16525_v8 = vpack.c.bf16 %v2042_v6, %v2036_v47  ;;  %v2044_v15 = vpop.f32.mrb[79].mxu1  ;;  %v12442_v47 = vld [vmem:[%s17291_s2 + $0x78] sm:$0xf]  ;;  %v14222_v27 = vld [vmem:[#allocation8 + $0xa4] ss:$16 sps:$4 sm:$0xff]  }
 0x1d9   :  { %13702 = vmatprep.subr.msk.bf16.mxu0 %vm15642_vm2, %v16457_v53  ;;  %v16527_v32 = vpack.c.bf16 %v1955_v9, %v1949_v11  ;;  %13712 = vmatprep.subr.msk.bf16.mxu1 %vm15642_vm2, %v16463_v40  ;;  %v16533_v24 = vpack.c.bf16 %v2044_v15, %v2038_v22  ;;  %v12387_v9 = vld [vmem:[%s17291_s2 + $0x40] sm:$0xff]  ;;  %v12388_v15 = vld [vmem:[%s17291_s2 + $0x48] sm:$0xf] }
 0x1da   :  { %3176 = vmatprep.mubr.f32.mxu0 %v17351_v33  ;;  %3253 = vmatprep.mubr.f32.mxu1 %v17351_v33  ;;  %v17379_v11 = vld [vmem:[#allocation30_spill] sm:$0xff]  ;;  %v14223_v6 = vld [vmem:[#allocation8 + $0xa8] ss:$16 sps:$4 sm:$0xff]  }
 0x1db   :  { %12374 = vmatmul.mubr.msk.f32.gmra.mrb[82].mxu0 %vm181_vm3, %v12370_v35  ;;  %12378 = vmatmul.mubr.msk.f32.gmra.mrb[82].mxu1 %vm181_vm3, %v12370_v35  ;;  %v12460_v22 = vld [vmem:[%s17291_s2 + $0x88] sm:$0xf] }
 0x1dc   :  { %13705 = vmatpush1.bf16.msk.msra.mxu0 %vm15642_vm2, %v16449_v25  ;;  %13715 = vmatpush1.bf16.msk.msra.mxu1 %vm15642_vm2, %v16455_v20 }
 0x1dd   :  { %13717 = vmatprep.subr.bf16.mxu0 %v16272_v36  ;;  %13727 = vmatprep.subr.bf16.mxu1 %v16274_v56 }
 0x1de   :  { %3336 = vmatprep.mubr.f32.mxu0 %v17351_v33  ;;  %3413 = vmatprep.mubr.f32.mxu1 %v17351_v33 }
 0x1df   :  { %12381 = vmatmul.mubr.msk.f32.vlgmr.msra.gmra.mrb[84].mxu0 %vm181_vm3, %v12369_v46  ;;  %12385 = vmatmul.mubr.msk.f32.vlgmr.msra.gmra.mrb[84].mxu1 %vm181_vm3, %v12369_v46  ;;  %v17357_v46 = vld [vmem:[#allocation24_spill] sm:$0xff] }
 0x1e0   :  { %13719 = vmatpush1.bf16.msra.mxu0 %v16268_v19  ;;  %13729 = vmatpush1.bf16.msra.mxu1 %v16270_v30 }
 0x1e1   :  { %13722 = vmatprep.subr.msk.bf16.mxu0 %vm15642_vm2, %v16280_v3  ;;  %13732 = vmatprep.subr.msk.bf16.mxu1 %vm15642_vm2, %v16282_v7 }
 0x1e2   :  { %3342 = vmatprep.mubr.f32.mxu0 %v17351_v33  ;;  %3419 = vmatprep.mubr.f32.mxu1 %v17351_v33 }
 0x1e3   :  { %12382 = vmatmul.mubr.msk.f32.gmra.mrb[86].mxu0 %vm181_vm3, %v12370_v35  ;;  %12386 = vmatmul.mubr.msk.f32.gmra.mrb[86].mxu1 %vm181_vm3, %v12370_v35  ;;  %v14225_v35 = vld [vmem:[#allocation8 + $0xac] ss:$16 sps:$4 sm:$0xff]  }
 0x1e4   :  { %13725 = vmatpush1.bf16.msk.msra.mxu0 %vm15642_vm2, %v16276_v44  ;;  %13735 = vmatpush1.bf16.msk.msra.mxu1 %vm15642_vm2, %v16278_v2 }
 0x1e5   :  { %13737 = vmatprep.subr.bf16.mxu0 %v16489_v52  ;;  %13747 = vmatprep.subr.bf16.mxu1 %v16495_v12 }
 0x1e6   :  { %3527 = vmatprep.mubr.f32.mxu0 %v17351_v33  ;;  %3604 = vmatprep.mubr.f32.mxu1 %v17351_v33 }
 0x1e7   :  { %12391 = vmatmul.mubr.msk.f32.vlgmr.msra.gmra.mrb[80].mxu0 %vm181_vm3, %v12387_v9  ;;  %12395 = vmatmul.mubr.msk.f32.vlgmr.msra.gmra.mrb[80].mxu1 %vm181_vm3, %v12387_v9 }
 0x1e8   :  { %13739 = vmatpush1.bf16.msra.mxu0 %v16481_v49  ;;  %13749 = vmatpush1.bf16.msra.mxu1 %v16487_v62 }
 0x1e9   :  { %13742 = vmatprep.subr.msk.bf16.mxu0 %vm15642_vm2, %v16527_v32  ;;  %13752 = vmatprep.subr.msk.bf16.mxu1 %vm15642_vm2, %v16533_v24 }
 0x1ea   :  { %3533 = vmatprep.mubr.f32.mxu0 %v17351_v33  ;;  %3610 = vmatprep.mubr.f32.mxu1 %v17351_v33 }
 0x1eb   :  { %12392 = vmatmul.mubr.msk.f32.gmra.mrb[82].mxu0 %vm181_vm3, %v12388_v15  ;;  %12396 = vmatmul.mubr.msk.f32.gmra.mrb[82].mxu1 %vm181_vm3, %v12388_v15 }
 0x1ec   :  { %13745 = vmatpush1.bf16.msk.msra.mxu0 %vm15642_vm2, %v16519_v23  ;;  %13755 = vmatpush1.bf16.msk.msra.mxu1 %vm15642_vm2, %v16525_v8 }
 0x1ed   :  { %13757 = vmatprep.subr.bf16.mxu0 %v16186_v61  ;;  %13767 = vmatprep.subr.bf16.mxu1 %v16188_v63  ;;  %v17358_v61 = vld [vmem:[#allocation22_spill] sm:$0xff]  ;;  %v17360_v63 = vld [vmem:[#allocation37_spill] sm:$0xff] }
 0x1ee   :  { %3693 = vmatprep.mubr.f32.mxu0 %v17351_v33  ;;  %3770 = vmatprep.mubr.f32.mxu1 %v17351_v33 }
 0x1ef   :  { %12399 = vmatmul.mubr.msk.f32.vlgmr.msra.gmra.mrb[84].mxu0 %vm181_vm3, %v12387_v9  ;;  %12403 = vmatmul.mubr.msk.f32.vlgmr.msra.gmra.mrb[84].mxu1 %vm181_vm3, %v12387_v9  ;;  %v14231_v9 = vld [vmem:[#allocation8 + $0xcc] ss:$16 sps:$4 sm:$0xff]  }
 0x1f0   :  { %13759 = vmatpush1.bf16.msra.mxu0 %v16182_v51  ;;  %13769 = vmatpush1.bf16.msra.mxu1 %v16184_v60  ;;  %v12407_v51 = vld [vmem:[%s17291_s2 + $0x60] sm:$0xff]  ;;  %v17359_v60 = vld [vmem:[#allocation23_spill] sm:$0xff] }
 0x1f1   :  { %13762 = vmatprep.subr.msk.bf16.mxu0 %vm15642_vm2, %v16198_v21  ;;  %13772 = vmatprep.subr.msk.bf16.mxu1 %vm15642_vm2, %v17357_v46  ;;  %v12408_v21 = vld [vmem:[%s17291_s2 + $0x68] sm:$0xf]  ;;  %v14229_v46 = vld [vmem:[#allocation8 + $0xc8] ss:$16 sps:$4 sm:$0xff]  }
 0x1f2   :  { %3699 = vmatprep.mubr.f32.mxu0 %v17351_v33  ;;  %3776 = vmatprep.mubr.f32.mxu1 %v17351_v33 }
 0x1f3   :  { %12400 = vmatmul.mubr.msk.f32.gmra.mrb[86].mxu0 %vm181_vm3, %v12388_v15  ;;  %12404 = vmatmul.mubr.msk.f32.gmra.mrb[86].mxu1 %vm181_vm3, %v12388_v15  ;;  %v14226_v15 = vld [vmem:[#allocation8 + $0xc0] ss:$16 sps:$4 sm:$0xff]  }
 0x1f4   :  { %13765 = vmatpush1.bf16.msk.msra.mxu0 %vm15642_vm2, %v17358_v61  ;;  %13775 = vmatpush1.bf16.msk.msra.mxu1 %vm15642_vm2, %v17359_v60  ;;  %v14234_v61 = vld [vmem:[#allocation8 + $0xe4] ss:$16 sps:$4 sm:$0xff]   ;;  %v14232_v60 = vld [vmem:[#allocation8 + $0xe0] ss:$16 sps:$4 sm:$0xff]  }
 0x1f5   :  { %13777 = vmatprep.subr.bf16.mxu0 %v16304_v28  ;;  %13787 = vmatprep.subr.bf16.mxu1 %v16306_v54  ;;  %v17362_v28 = vld [vmem:[#allocation18_spill] sm:$0xff]  ;;  %v17363_v54 = vld [vmem:[#allocation21_spill] sm:$0xff] }
 0x1f6   :  { %3875 = vmatprep.mubr.f32.mxu0 %v17351_v33  ;;  %3952 = vmatprep.mubr.f32.mxu1 %v17351_v33 }
 0x1f7   :  { %12411 = vmatmul.mubr.msk.f32.vlgmr.msra.gmra.mrb[88].mxu0 %vm181_vm3, %v12407_v51  ;;  %12415 = vmatmul.mubr.msk.f32.vlgmr.msra.gmra.mrb[88].mxu1 %vm181_vm3, %v12407_v51 }
 0x1f8   :  { %13779 = vmatpush1.bf16.msra.mxu0 %v17360_v63  ;;  %13789 = vmatpush1.bf16.msra.mxu1 %v16302_v58  ;;  %v17361_v58 = vld [vmem:[#allocation17_spill] sm:$0xff] }
 0x1f9   :  { %13782 = vmatprep.subr.msk.bf16.mxu0 %vm15642_vm2, %v16316_v37  ;;  %13792 = vmatprep.subr.msk.bf16.mxu1 %vm15642_vm2, %v16318_v4  ;;  %v12406_v37 = vld [vmem:[%s17291_s2 + $0x58] sm:$0xf]  ;;  %v17371_v4 = vld [vmem:[#allocation26_spill] sm:$0xff]  ;;  %v14235_v63 = vld [vmem:[#allocation8 + $0xe8] ss:$16 sps:$4 sm:$0xff]  }
 0x1fa   :  { %3881 = vmatprep.mubr.f32.mxu0 %v17351_v33  ;;  %3958 = vmatprep.mubr.f32.mxu1 %v17351_v33 }
 0x1fb   :  { %12412 = vmatmul.mubr.msk.f32.gmra.mrb[90].mxu0 %vm181_vm3, %v12408_v21  ;;  %12416 = vmatmul.mubr.msk.f32.gmra.mrb[90].mxu1 %vm181_vm3, %v12408_v21 }
 0x1fc   :  { %13785 = vmatpush1.bf16.msk.msra.mxu0 %vm15642_vm2, %v16312_v13  ;;  %13795 = vmatpush1.bf16.msk.msra.mxu1 %vm15642_vm2, %v16314_v10  ;;  %v17364_v13 = vld [vmem:[#allocation19_spill] sm:$0xff]  ;;  %v17367_v10 = vld [vmem:[#allocation34_spill] sm:$0xff] }
 0x1fd   :  { %13797 = vmatprep.subr.bf16.mxu0 %v17361_v58  ;;  %13807 = vmatprep.subr.bf16.mxu1 %v17362_v28  ;;  %v14243_v58 = vld [vmem:[#allocation8 + $0x10c] ss:$16 sps:$4 sm:$0xff]   ;;  %v14238_v28 = vld [vmem:[#allocation8 + $0x100] ss:$16 sps:$4 sm:$0xff]  }
 0x1fe   :  { %4029 = vmatprep.mubr.f32.mxu0 %v17351_v33  ;;  %4106 = vmatprep.mubr.f32.mxu1 %v17351_v33 }
 0x1ff   :  { %12419 = vmatmul.mubr.msk.f32.vlgmr.msra.gmra.mrb[92].mxu0 %vm181_vm3, %v12407_v51  ;;  %12423 = vmatmul.mubr.msk.f32.vlgmr.msra.gmra.mrb[92].mxu1 %vm181_vm3, %v12407_v51  ;;  %v14237_v51 = vld [vmem:[#allocation8 + $0xec] ss:$16 sps:$4 sm:$0xff]  }
 0x200   :  { %13799 = vmatpush1.bf16.msra.mxu0 %v16166_v31  ;;  %13809 = vmatpush1.bf16.msra.mxu1 %v16168_v38  ;;  %v12405_v31 = vld [vmem:[%s17291_s2 + $0x50] sm:$0xff]  ;;  %v17365_v38 = vld [vmem:[#allocation20_spill] sm:$0xff] }
 0x201   :  { %13802 = vmatprep.subr.msk.bf16.mxu0 %vm15642_vm2, %v16178_v16  ;;  %13812 = vmatprep.subr.msk.bf16.mxu1 %vm15642_vm2, %v17363_v54  ;;  %v17366_v16 = vld [vmem:[#allocation33_spill] sm:$0xff] }
 0x202   :  { %4035 = vmatprep.mubr.f32.mxu0 %v17351_v33  ;;  %4112 = vmatprep.mubr.f32.mxu1 %v17351_v33  ;;  %v14241_v54 = vld [vmem:[#allocation8 + $0x108] ss:$16 sps:$4 sm:$0xff]  }
 0x203   :  { %12420 = vmatmul.mubr.msk.f32.gmra.mrb[94].mxu0 %vm181_vm3, %v12408_v21  ;;  %12424 = vmatmul.mubr.msk.f32.gmra.mrb[94].mxu1 %vm181_vm3, %v12408_v21  ;;  %v14240_v21 = vld [vmem:[#allocation8 + $0x104] ss:$16 sps:$4 sm:$0xff]  }
 0x204   :  { %13805 = vmatpush1.bf16.msk.msra.mxu0 %vm15642_vm2, %v17364_v13  ;;  %13815 = vmatpush1.bf16.msk.msra.mxu1 %vm15642_vm2, %v17365_v38  ;;  %v14246_v13 = vld [vmem:[#allocation8 + $0x124] ss:$16 sps:$4 sm:$0xff]   ;;  %v14244_v38 = vld [vmem:[#allocation8 + $0x120] ss:$16 sps:$4 sm:$0xff]  }
 0x205   :  { %13817 = vmatprep.subr.bf16.mxu0 %v17366_v16  ;;  %13827 = vmatprep.subr.bf16.mxu1 %v17367_v10  ;;  %v14247_v16 = vld [vmem:[#allocation8 + $0x128] ss:$16 sps:$4 sm:$0xff]   ;;  %v14252_v10 = vld [vmem:[#allocation8 + $0x144] ss:$16 sps:$4 sm:$0xff]  }
 0x206   :  { %4189 = vmatprep.mubr.f32.mxu0 %v17351_v33  ;;  %4266 = vmatprep.mubr.f32.mxu1 %v17351_v33 }
 0x207   :  { %12427 = vmatmul.mubr.msk.f32.vlgmr.msra.gmra.mrb[88].mxu0 %vm181_vm3, %v12405_v31  ;;  %12431 = vmatmul.mubr.msk.f32.vlgmr.msra.gmra.mrb[88].mxu1 %vm181_vm3, %v12405_v31 }
 0x208   :  { %13819 = vmatpush1.bf16.msra.mxu0 %v16284_v45  ;;  %13829 = vmatpush1.bf16.msra.mxu1 %v16286_v18  ;;  %v17368_v45 = vld [vmem:[#allocation35_spill] sm:$0xff]  ;;  %v17369_v18 = vld [vmem:[#allocation36_spill] sm:$0xff] }
 0x209   :  { %13822 = vmatprep.subr.msk.bf16.mxu0 %vm15642_vm2, %v16296_v41  ;;  %13832 = vmatprep.subr.msk.bf16.mxu1 %vm15642_vm2, %v16298_v48  ;;  %v17370_v41 = vld [vmem:[#allocation25_spill] sm:$0xff]  ;;  %v17372_v48 = vld [vmem:[#allocation27_spill] sm:$0xff] }
 0x20a   :  { %4195 = vmatprep.mubr.f32.mxu0 %v17351_v33  ;;  %4272 = vmatprep.mubr.f32.mxu1 %v17351_v33 }
 0x20b   :  { %12428 = vmatmul.mubr.msk.f32.gmra.mrb[90].mxu0 %vm181_vm3, %v12406_v37  ;;  %12432 = vmatmul.mubr.msk.f32.gmra.mrb[90].mxu1 %vm181_vm3, %v12406_v37 }
 0x20c   :  { %13825 = vmatpush1.bf16.msk.msra.mxu0 %vm15642_vm2, %v17368_v45  ;;  %13835 = vmatpush1.bf16.msk.msra.mxu1 %vm15642_vm2, %v17369_v18  ;;  %v14250_v45 = vld [vmem:[#allocation8 + $0x140] ss:$16 sps:$4 sm:$0xff]   ;;  %v14253_v18 = vld [vmem:[#allocation8 + $0x148] ss:$16 sps:$4 sm:$0xff]  }
 0x20d   :  { %13837 = vmatprep.subr.bf16.mxu0 %v17370_v41  ;;  %13847 = vmatprep.subr.bf16.mxu1 %v17371_v4 }
 0x20e   :  { %4343 = vmatprep.mubr.f32.mxu0 %v17351_v33  ;;  %4420 = vmatprep.mubr.f32.mxu1 %v17351_v33 }
 0x20f   :  { %12435 = vmatmul.mubr.msk.f32.vlgmr.msra.gmra.mrb[92].mxu0 %vm181_vm3, %v12405_v31  ;;  %12439 = vmatmul.mubr.msk.f32.vlgmr.msra.gmra.mrb[92].mxu1 %vm181_vm3, %v12405_v31  ;;  %v14249_v31 = vld [vmem:[#allocation8 + $0x12c] ss:$16 sps:$4 sm:$0xff]  }
 0x210   :  { %13839 = vmatpush1.bf16.msra.mxu0 %v16226_v43  ;;  %13849 = vmatpush1.bf16.msra.mxu1 %v16231_v5  ;;  %v12441_v43 = vld [vmem:[%s17291_s2 + $0x70] sm:$0xff]  ;;  %v17373_v5 = vld [vmem:[#allocation28_spill] sm:$0xff] }
 0x211   :  { %13842 = vmatprep.subr.msk.bf16.mxu0 %vm15642_vm2, %v16248_v55  ;;  %13852 = vmatprep.subr.msk.bf16.mxu1 %vm15642_vm2, %v16250_v57  ;;  %v17374_v55 = vld [vmem:[#allocation38_spill] sm:$0xff]  ;;  %v17375_v57 = vld [vmem:[#allocation39_spill] sm:$0xff] }
 0x212   :  { %4349 = vmatprep.mubr.f32.mxu0 %v17351_v33  ;;  %4426 = vmatprep.mubr.f32.mxu1 %v17351_v33 }
 0x213   :  { %12436 = vmatmul.mubr.msk.f32.gmra.mrb[94].mxu0 %vm181_vm3, %v12406_v37  ;;  %12440 = vmatmul.mubr.msk.f32.gmra.mrb[94].mxu1 %vm181_vm3, %v12406_v37  ;;  %v14255_v37 = vld [vmem:[#allocation8 + $0x14c] ss:$16 sps:$4 sm:$0xff]  }
 0x214   :  { %13845 = vmatpush1.bf16.msk.msra.mxu0 %vm15642_vm2, %v17372_v48  ;;  %13855 = vmatpush1.bf16.msk.msra.mxu1 %vm15642_vm2, %v17373_v5 }
 0x215   :  { %13857 = vmatprep.subr.bf16.mxu0 %v17374_v55  ;;  %13867 = vmatprep.subr.bf16.mxu1 %v17375_v57  ;;  %v14258_v55 = vld [vmem:[#allocation8 + $0x164] ss:$16 sps:$4 sm:$0xff]   ;;  %v14261_v57 = vld [vmem:[#allocation8 + $0x16c] ss:$16 sps:$4 sm:$0xff]  }
 0x216   :  { %4506 = vmatprep.mubr.f32.mxu0 %v17351_v33  ;;  %4583 = vmatprep.mubr.f32.mxu1 %v17351_v33 }
 0x217   :  { %12445 = vmatmul.mubr.msk.f32.vlgmr.msra.gmra.mrb[88].mxu0 %vm181_vm3, %v12441_v43  ;;  %12449 = vmatmul.mubr.msk.f32.vlgmr.msra.gmra.mrb[88].mxu1 %vm181_vm3, %v12441_v43 }
 0x218   :  { %13859 = vmatpush1.bf16.msra.mxu0 %v16339_v17  ;;  %13869 = vmatpush1.bf16.msra.mxu1 %v16345_v26  ;;  %v17376_v17 = vld [vmem:[#allocation40_spill] sm:$0xff]  ;;  %v17377_v26 = vld [vmem:[#allocation41_spill] sm:$0xff] }
 0x219   :  { %13862 = vmatprep.subr.msk.bf16.mxu0 %vm15642_vm2, %v16387_v59  ;;  %13872 = vmatprep.subr.msk.bf16.mxu1 %vm15642_vm2, %v16393_v0  ;;  %v17378_v59 = vld [vmem:[#allocation29_spill] sm:$0xff]  ;;  %v17380_v0 = vld [vmem:[#allocation31_spill] sm:$0xff] }
 0x21a   :  { %4512 = vmatprep.mubr.f32.mxu0 %v17351_v33  ;;  %4589 = vmatprep.mubr.f32.mxu1 %v17351_v33 }
 0x21b   :  { %12446 = vmatmul.mubr.msk.f32.gmra.mrb[90].mxu0 %vm181_vm3, %v12442_v47  ;;  %12450 = vmatmul.mubr.msk.f32.gmra.mrb[90].mxu1 %vm181_vm3, %v12442_v47 }
 0x21c   :  { %13865 = vmatpush1.bf16.msk.msra.mxu0 %vm15642_vm2, %v17376_v17  ;;  %13875 = vmatpush1.bf16.msk.msra.mxu1 %vm15642_vm2, %v17377_v26  ;;  %v14256_v17 = vld [vmem:[#allocation8 + $0x160] ss:$16 sps:$4 sm:$0xff]   ;;  %v14259_v26 = vld [vmem:[#allocation8 + $0x168] ss:$16 sps:$4 sm:$0xff]  }
 0x21d   :  { %13877 = vmatprep.subr.bf16.mxu0 %v17378_v59  ;;  %13887 = vmatprep.subr.bf16.mxu1 %v17379_v11 }
 0x21e   :  { %4660 = vmatprep.mubr.f32.mxu0 %v17351_v33  ;;  %4737 = vmatprep.mubr.f32.mxu1 %v17351_v33 }
 0x21f   :  { %12453 = vmatmul.mubr.msk.f32.vlgmr.msra.gmra.mrb[92].mxu0 %vm181_vm3, %v12441_v43  ;;  %12457 = vmatmul.mubr.msk.f32.vlgmr.msra.gmra.mrb[92].mxu1 %vm181_vm3, %v12441_v43 }
 0x220   :  { %13879 = vmatpush1.bf16.msra.mxu0 %v16252_v29  ;;  %13889 = vmatpush1.bf16.msra.mxu1 %v16254_v50  ;;  %v12459_v29 = vld [vmem:[%s17291_s2 + $0x80] sm:$0xff] }
 0x221   :  { %13882 = vmatprep.subr.msk.bf16.mxu0 %vm15642_vm2, %v16264_v34  ;;  %13892 = vmatprep.subr.msk.bf16.mxu1 %vm15642_vm2, %v16266_v39  ;;  %v17381_v50 = vld [vmem:[#allocation32_spill] sm:$0xff]  ;;  %v17382_v34 = vld [vmem:[#allocation42_spill] sm:$0xff]  ;;  %v17383_v39 = vld [vmem:[#allocation43_spill] sm:$0xff] }
 0x222   :  { %4666 = vmatprep.mubr.f32.mxu0 %v17351_v33  ;;  %4743 = vmatprep.mubr.f32.mxu1 %v17351_v33 }
 0x223   :  { %12454 = vmatmul.mubr.msk.f32.gmra.mrb[94].mxu0 %vm181_vm3, %v12442_v47  ;;  %12458 = vmatmul.mubr.msk.f32.gmra.mrb[94].mxu1 %vm181_vm3, %v12442_v47 }
 0x224   :  { %13885 = vmatpush1.bf16.msk.msra.mxu0 %vm15642_vm2, %v17380_v0  ;;  %13895 = vmatpush1.bf16.msk.msra.mxu1 %vm15642_vm2, %v17381_v50 }
 0x225   :  { %13897 = vmatprep.subr.bf16.mxu0 %v17382_v34  ;;  %13907 = vmatprep.subr.bf16.mxu1 %v17383_v39  ;;  %v14264_v34 = vld [vmem:[#allocation8 + $0x184] ss:$16 sps:$4 sm:$0xff]   ;;  %v14267_v39 = vld [vmem:[#allocation8 + $0x18c] ss:$16 sps:$4 sm:$0xff]  }
 0x226   :  { %4839 = vmatprep.mubr.f32.mxu0 %v17351_v33  ;;  %4916 = vmatprep.mubr.f32.mxu1 %v17351_v33 }
 0x227   :  { %12463 = vmatmul.mubr.msk.f32.vlgmr.msra.gmra.mrb[88].mxu0 %vm181_vm3, %v12459_v29  ;;  %12467 = vmatmul.mubr.msk.f32.vlgmr.msra.gmra.mrb[88].mxu1 %vm181_vm3, %v12459_v29 }
 0x228   :  { %13899 = vmatpush1.bf16.msra.mxu0 %v16411_v42  ;;  %13909 = vmatpush1.bf16.msra.mxu1 %v16417_v14  ;;  %v12477_v14 = vld [vmem:[%s17291_s2 + $0x90] sm:$0xff]  ;;  %v14208_v42 = vld [vmem:[#allocation8 + $0x60] ss:$16 sps:$4 sm:$0xff]  }
 0x229   :  { %13902 = vmatprep.subr.msk.bf16.mxu0 %vm15642_vm2, %v16457_v53  ;;  %13912 = vmatprep.subr.msk.bf16.mxu1 %vm15642_vm2, %v16463_v40  ;;  %v12478_v53 = vld [vmem:[%s17291_s2 + $0x98] sm:$0xf] }
 0x22a   :  { %4845 = vmatprep.mubr.f32.mxu0 %v17351_v33  ;;  %4922 = vmatprep.mubr.f32.mxu1 %v17351_v33  ;;  %v14214_v40 = vld [vmem:[#allocation8 + $0x80] ss:$16 sps:$4 sm:$0xff]  }
 0x22b   :  { %12464 = vmatmul.mubr.msk.f32.gmra.mrb[90].mxu0 %vm181_vm3, %v12460_v22  ;;  %12468 = vmatmul.mubr.msk.f32.gmra.mrb[90].mxu1 %vm181_vm3, %v12460_v22 }
 0x22c   :  { %13905 = vmatpush1.bf16.msk.msra.mxu0 %vm15642_vm2, %v16449_v25  ;;  %13915 = vmatpush1.bf16.msk.msra.mxu1 %vm15642_vm2, %v16455_v20  ;;  %v14213_v20 = vld [vmem:[#allocation8 + $0x6c] ss:$16 sps:$4 sm:$0xff]   ;;  %v14216_v25 = vld [vmem:[#allocation8 + $0x84] ss:$16 sps:$4 sm:$0xff]  }
 0x22d   :  { %13917 = vmatprep.subr.bf16.mxu0 %v16272_v36  ;;  %13927 = vmatprep.subr.bf16.mxu1 %v16274_v56  ;;  %v14196_v36 = vld [vmem:[#allocation8 + $0x20] ss:$16 sps:$4 sm:$0xff]   ;;  %v14199_v56 = vld [vmem:[#allocation8 + $0x28] ss:$16 sps:$4 sm:$0xff]  }
 0x22e   :  { %4993 = vmatprep.mubr.f32.mxu0 %v17351_v33  ;;  %5070 = vmatprep.mubr.f32.mxu1 %v17351_v33 }
 0x22f   :  { %12471 = vmatmul.mubr.msk.f32.vlgmr.msra.gmra.mrb[92].mxu0 %vm181_vm3, %v12459_v29  ;;  %12475 = vmatmul.mubr.msk.f32.vlgmr.msra.gmra.mrb[92].mxu1 %vm181_vm3, %v12459_v29 }
 0x230   :  { %13919 = vmatpush1.bf16.msra.mxu0 %v16268_v19  ;;  %13929 = vmatpush1.bf16.msra.mxu1 %v16270_v30  ;;  %v14198_v19 = vld [vmem:[#allocation8 + $0x24] ss:$16 sps:$4 sm:$0xff]   ;;  %v14201_v30 = vld [vmem:[#allocation8 + $0x2c] ss:$16 sps:$4 sm:$0xff]  }
 0x231   :  { %13922 = vmatprep.subr.msk.bf16.mxu0 %vm15642_vm2, %v16280_v3  ;;  %13932 = vmatprep.subr.msk.bf16.mxu1 %vm15642_vm2, %v16282_v7  ;;  %v14202_v3 = vld [vmem:[#allocation8 + $0x40] ss:$16 sps:$4 sm:$0xff]   ;;  %v14205_v7 = vld [vmem:[#allocation8 + $0x48] ss:$16 sps:$4 sm:$0xff]  }
 0x232   :  { %4999 = vmatprep.mubr.f32.mxu0 %v17351_v33  ;;  %5076 = vmatprep.mubr.f32.mxu1 %v17351_v33 }
 0x233   :  { %12472 = vmatmul.mubr.msk.f32.gmra.mrb[94].mxu0 %vm181_vm3, %v12460_v22  ;;  %12476 = vmatmul.mubr.msk.f32.gmra.mrb[94].mxu1 %vm181_vm3, %v12460_v22 }
 0x234   :  { %13925 = vmatpush1.bf16.msk.msra.mxu0 %vm15642_vm2, %v16276_v44  ;;  %13935 = vmatpush1.bf16.msk.msra.mxu1 %vm15642_vm2, %v16278_v2  ;;  %v14204_v44 = vld [vmem:[#allocation8 + $0x44] ss:$16 sps:$4 sm:$0xff]   ;;  %v14207_v2 = vld [vmem:[#allocation8 + $0x4c] ss:$16 sps:$4 sm:$0xff]  }
 0x235   :  { %13937 = vmatprep.subr.bf16.mxu0 %v16489_v52  ;;  %13947 = vmatprep.subr.bf16.mxu1 %v16495_v12  ;;  %v14190_v52 = vld [vmem:[#allocation8] ss:$16 sps:$4 sm:$0xff]   ;;  %v14219_v12 = vld [vmem:[#allocation8 + $0x8c] ss:$16 sps:$4 sm:$0xff]  }
 0x236   :  { %5172 = vmatprep.mubr.f32.mxu0 %v17351_v33  ;;  %5249 = vmatprep.mubr.f32.mxu1 %v17351_v33 }
 0x237   :  { %12481 = vmatmul.mubr.msk.f32.vlgmr.msra.gmra.mrb[88].mxu0 %vm181_vm3, %v12477_v14  ;;  %12485 = vmatmul.mubr.msk.f32.vlgmr.msra.gmra.mrb[88].mxu1 %vm181_vm3, %v12477_v14 }
 0x238   :  { %13939 = vmatpush1.bf16.msra.mxu0 %v16481_v49  ;;  %13949 = vmatpush1.bf16.msra.mxu1 %v16487_v62  ;;  %v14192_v62 = vld [vmem:[#allocation8 + $0x4] ss:$16 sps:$4 sm:$0xff]   ;;  %v14217_v49 = vld [vmem:[#allocation8 + $0x88] ss:$16 sps:$4 sm:$0xff]  }
 0x239   :  { %13942 = vmatprep.subr.msk.bf16.mxu0 %vm15642_vm2, %v16527_v32  ;;  %13952 = vmatprep.subr.msk.bf16.mxu1 %vm15642_vm2, %v16533_v24  ;;  %v14195_v32 = vld [vmem:[#allocation8 + $0xc] ss:$16 sps:$4 sm:$0xff]   ;;  %v14228_v24 = vld [vmem:[#allocation8 + $0xc4] ss:$16 sps:$4 sm:$0xff]  }
 0x23a   :  { %5178 = vmatprep.mubr.f32.mxu0 %v17351_v33  ;;  %5255 = vmatprep.mubr.f32.mxu1 %v17351_v33 }
 0x23b   :  { %12482 = vmatmul.mubr.msk.f32.gmra.mrb[90].mxu0 %vm181_vm3, %v12478_v53  ;;  %12486 = vmatmul.mubr.msk.f32.gmra.mrb[90].mxu1 %vm181_vm3, %v12478_v53 }
 0x23c   :  { %13945 = vmatpush1.bf16.msk.msra.mxu0 %vm15642_vm2, %v16519_v23  ;;  %13955 = vmatpush1.bf16.msk.msra.mxu1 %vm15642_vm2, %v16525_v8  ;;  %v14211_v8 = vld [vmem:[#allocation8 + $0x68] ss:$16 sps:$4 sm:$0xff]   ;;  %v14220_v23 = vld [vmem:[#allocation8 + $0xa0] ss:$16 sps:$4 sm:$0xff]  }
 0x23d   :  { %5326 = vmatprep.mubr.f32.mxu0 %v17351_v33  ;;  %5403 = vmatprep.mubr.f32.mxu1 %v17351_v33 }
 0x23e   :  { %10832 = vmatprep.subr.bf16.mxu0 %v14192_v62  ;;  %11324 = vmatprep.subr.bf16.mxu1 %v14195_v32 }
 0x23f   :  { %12489 = vmatmul.mubr.msk.f32.vlgmr.msra.gmra.mrb[92].mxu0 %vm181_vm3, %v12477_v14  ;;  %12493 = vmatmul.mubr.msk.f32.vlgmr.msra.gmra.mrb[92].mxu1 %vm181_vm3, %v12477_v14  ;;  %v14262_v14 = vld [vmem:[#allocation8 + $0x180] ss:$16 sps:$4 sm:$0xff]  }
 0x240   :  { %5332 = vmatprep.mubr.f32.mxu0 %v17351_v33  ;;  %5409 = vmatprep.mubr.f32.mxu1 %v17351_v33  ;;  %v14210_v33 = vld [vmem:[#allocation8 + $0x64] ss:$16 sps:$4 sm:$0xff]  }
 0x241   :  { %10833 = vmatpush1.bf16.msra.mxu0 %v14190_v52  ;;  %11325 = vmatpush1.bf16.msra.mxu1 %v14193_v1 }
 0x242   :  { %10834 = vmatprep.subr.bf16.mxu0 %v14198_v19  ;;  %11326 = vmatprep.subr.bf16.mxu1 %v14201_v30  ;;  %v14270_v30 = vld [vmem:[#allocation8 + $0x1a4] ss:$16 sps:$4 sm:$0xff]  }
 0x243   :  { %12490 = vmatmul.mubr.msk.f32.gmra.mrb[94].mxu0 %vm181_vm3, %v12478_v53  ;;  %12494 = vmatmul.mubr.msk.f32.gmra.mrb[94].mxu1 %vm181_vm3, %v12478_v53  ;;  %v14265_v53 = vld [vmem:[#allocation8 + $0x188] ss:$16 sps:$4 sm:$0xff]  }
 0x245   :  { %10835 = vmatpush1.bf16.msra.mxu0 %v14196_v36  ;;  %11327 = vmatpush1.bf16.msra.mxu1 %v14199_v56  ;;  %v14273_v36 = vld [vmem:[#allocation8 + $0x1ac] ss:$16 sps:$4 sm:$0xff]  }
 0x246   :  { %10836 = vmatprep.subr.bf16.mxu0 %v14204_v44  ;;  %11328 = vmatprep.subr.bf16.mxu1 %v14207_v2  ;;  %v14268_v44 = vld [vmem:[#allocation8 + $0x1a0] ss:$16 sps:$4 sm:$0xff]   ;;  %v14271_v2 = vld [vmem:[#allocation8 + $0x1a8] ss:$16 sps:$4 sm:$0xff]  }
 0x249   :  { %10837 = vmatpush1.bf16.msra.mxu0 %v14202_v3  ;;  %11329 = vmatpush1.bf16.msra.mxu1 %v14205_v7 }
 0x24a   :  { %10838 = vmatprep.subr.bf16.mxu0 %v14210_v33  ;;  %11330 = vmatprep.subr.bf16.mxu1 %v14213_v20  ;;  %v14274_v20 = vld [vmem:[#allocation8 + $0x1c0] ss:$16 sps:$4 sm:$0xff]  }
 0x24d   :  { %10839 = vmatpush1.bf16.msra.mxu0 %v14208_v42  ;;  %11331 = vmatpush1.bf16.msra.mxu1 %v14211_v8  ;;  %v14276_v42 = vld [vmem:[#allocation8 + $0x1c4] ss:$16 sps:$4 sm:$0xff]  }
 0x24e   :  { %10840 = vmatprep.subr.bf16.mxu0 %v14216_v25  ;;  %11332 = vmatprep.subr.bf16.mxu1 %v14219_v12 }
 0x251   :  { %10841 = vmatpush1.bf16.msra.mxu0 %v14214_v40  ;;  %11333 = vmatpush1.bf16.msra.mxu1 %v14217_v49  ;;  %v14277_v40 = vld [vmem:[#allocation8 + $0x1c8] ss:$16 sps:$4 sm:$0xff]   ;;  %v14279_v49 = vld [vmem:[#allocation8 + $0x1cc] ss:$16 sps:$4 sm:$0xff]  }
 0x252   :  { %10842 = vmatprep.subr.bf16.mxu0 %v14222_v27  ;;  %11334 = vmatprep.subr.bf16.mxu1 %v14225_v35  ;;  %v14282_v27 = vld [vmem:[#allocation8 + $0x1e4] ss:$16 sps:$4 sm:$0xff]   ;;  %v14285_v35 = vld [vmem:[#allocation8 + $0x1ec] ss:$16 sps:$4 sm:$0xff]  }
 0x255   :  { %10843 = vmatpush1.bf16.msra.mxu0 %v14220_v23  ;;  %11335 = vmatpush1.bf16.msra.mxu1 %v14223_v6  ;;  %v14280_v23 = vld [vmem:[#allocation8 + $0x1e0] ss:$16 sps:$4 sm:$0xff]   ;;  %v14283_v6 = vld [vmem:[#allocation8 + $0x1e8] ss:$16 sps:$4 sm:$0xff]  }
 0x256   :  { %10844 = vmatprep.subr.bf16.mxu0 %v14228_v24  ;;  %11336 = vmatprep.subr.bf16.mxu1 %v14231_v9  ;;  %v14288_v24 = vld [vmem:[#allocation8 + $0x204] ss:$16 sps:$4 sm:$0xff]   ;;  %v14291_v9 = vld [vmem:[#allocation8 + $0x20c] ss:$16 sps:$4 sm:$0xff]  }
 0x259   :  { %10845 = vmatpush1.bf16.msra.mxu0 %v14226_v15  ;;  %11337 = vmatpush1.bf16.msra.mxu1 %v14229_v46  ;;  %v5458_v15 = vlaneseq }
 0x25a   :  { %10846 = vmatprep.subr.bf16.mxu0 %v14234_v61  ;;  %11338 = vmatprep.subr.bf16.mxu1 %v14237_v51  ;;  %v5456_v51 = vld [vmem:[#allocation6] sm:$0x3] }
 0x25b   :  { %v16924_v46 = vshrl.u32 %v5458_v15, 7 }
 0x25d   :  { %10847 = vmatpush1.bf16.msra.mxu0 %v14232_v60  ;;  %11339 = vmatpush1.bf16.msra.mxu1 %v14235_v63  ;;  %v5460_v61 = vsub.s32 0, %v16924_v46  ;;  %v15532_v60 = vmov 1966171168  }
 0x25e   :  { %10848 = vmatprep.subr.bf16.mxu0 %v14240_v21  ;;  %11340 = vmatprep.subr.bf16.mxu1 %v14243_v58  ;;  %v5486_v63 = vunpack.c.l.s4 %v15532_v60  ;;  %v5464_v21 = vsub.s32 1, %v16924_v46 }
 0x261   :  { %10849 = vmatpush1.bf16.msra.mxu0 %v14238_v28  ;;  %11341 = vmatpush1.bf16.msra.mxu1 %v14241_v54 }
 0x262   :  { %10850 = vmatprep.subr.bf16.mxu0 %v14246_v13  ;;  %11342 = vmatprep.subr.bf16.mxu1 %v14249_v31  ;;  %v16930_v31 = vrot.slane %v5456_v51, %v5460_v61 }
 0x265   :  { %10851 = vmatpush1.bf16.msra.mxu0 %v14244_v38  ;;  %11343 = vmatpush1.bf16.msra.mxu1 %v14247_v16  ;;  %v5487_v16 = vunpack.c.0.s8 %v5486_v63 }
 0x266   :  { %10852 = vmatprep.subr.bf16.mxu0 %v14252_v10  ;;  %11344 = vmatprep.subr.bf16.mxu1 %v14255_v37  ;;  %v15533_v10 = vmov 1935823168  }
 0x267   :  { %v5515_v37 = vunpack.c.l.s4 %v15533_v10 }
 0x269   :  { %10853 = vmatpush1.bf16.msra.mxu0 %v14250_v45  ;;  %11345 = vmatpush1.bf16.msra.mxu1 %v14253_v18  ;;  %v16934_v18 = vrot.slane %v5456_v51, %v5464_v21 }
 0x26a   :  { %10854 = vmatprep.subr.bf16.mxu0 %v14258_v55  ;;  %11346 = vmatprep.subr.bf16.mxu1 %v14261_v57 }
 0x26d   :  { %10855 = vmatpush1.bf16.msra.mxu0 %v14256_v17  ;;  %11347 = vmatpush1.bf16.msra.mxu1 %v14259_v26 }
 0x26e   :  { %10856 = vmatprep.subr.bf16.mxu0 %v14264_v34  ;;  %11348 = vmatprep.subr.bf16.mxu1 %v14267_v39 }
 0x271   :  { %10857 = vmatpush1.bf16.msra.mxu0 %v14262_v14  ;;  %11349 = vmatpush1.bf16.msra.mxu1 %v14265_v53 }
 0x272   :  { %10858 = vmatprep.subr.bf16.mxu0 %v14270_v30  ;;  %11350 = vmatprep.subr.bf16.mxu1 %v14273_v36  ;;  %v16944_v30 = vsub.s32 %v5487_v16, %v16924_v46  ;;  %v5516_v36 = vunpack.c.0.s8 %v5515_v37 }
 0x275   :  { %10859 = vmatpush1.bf16.msra.mxu0 %v14268_v44  ;;  %11351 = vmatpush1.bf16.msra.mxu1 %v14271_v2 }
 0x276   :  { %10860 = vmatprep.subr.bf16.mxu0 %v14276_v42  ;;  %11352 = vmatprep.subr.bf16.mxu1 %v14279_v49  ;;  %v16955_v49 = vsub.s32 %v5516_v36, %v16924_v46 }
 0x279   :  { %10861 = vmatpush1.bf16.msra.mxu0 %v14274_v20  ;;  %11353 = vmatpush1.bf16.msra.mxu1 %v14277_v40 }
 0x27a   :  { %10862 = vmatprep.subr.bf16.mxu0 %v14282_v27  ;;  %11354 = vmatprep.subr.bf16.mxu1 %v14285_v35 }
 0x27d   :  { %10863 = vmatpush1.bf16.msra.mxu0 %v14280_v23  ;;  %11355 = vmatpush1.bf16.msra.mxu1 %v14283_v6 }
 0x27e   :  { %10873 = vmatprep.subr.bf16.mxu0 %v14288_v24  ;;  %11365 = vmatprep.subr.bf16.mxu1 %v14291_v9 }
 0x2ba   :  { %v16876_v41 = vpop.f32.mrb[80].mxu0  ;;  %v16878_v4 = vpop.f32.mrb[80].mxu1 }
 0x2bb   :  { %v16880_v48 = vpop.f32.mrb[81].mxu0  ;;  %v5432_v43 = vmax.f32 %v16876_v41, %v16878_v4  ;;  %v16884_v5 = vpop.f32.mrb[81].mxu1 }
 0x2bc   :  { %v5433_v47 = vmax.f32 %v16880_v48, %v16884_v5 }
 0x2be   :  { %v16888_v59 = vpop.f32.mrb[82].mxu0  ;;  %v16890_v11 = vpop.f32.mrb[82].mxu1 }
 0x2bf   :  { %v16892_v0 = vpop.f32.mrb[83].mxu0  ;;  %v5434_v29 = vmax.f32 %v16888_v59, %v16890_v11  ;;  %v16896_v50 = vpop.f32.mrb[83].mxu1 }
 0x2c0   :  { %v5435_v22 = vmax.f32 %v16892_v0, %v16896_v50 }
 0x2c2   :  { %v16900_v52 = vpop.f32.mrb[84].mxu0  ;;  %v16902_v62 = vpop.f32.mrb[84].mxu1 }
 0x2c3   :  { %v16904_v1 = vpop.f32.mrb[85].mxu0  ;;  %v5436_v32 = vmax.f32 %v16900_v52, %v16902_v62  ;;  %v16908_v19 = vpop.f32.mrb[85].mxu1 }
 0x2c4   :  { %v5437_v56 = vmax.f32 %v16904_v1, %v16908_v19 }
 0x2c6   :  { %v16912_v3 = vpop.f32.mrb[86].mxu0  ;;  %v16914_v7 = vpop.f32.mrb[86].mxu1 }
 0x2c7   :  { %v16916_v33 = vpop.f32.mrb[87].mxu0  ;;  %v5438_v8 = vmax.f32 %v16912_v3, %v16914_v7  ;;  %v16920_v25 = vpop.f32.mrb[87].mxu1 }
 0x2c8   :  { %v5439_v12 = vmax.f32 %v16916_v33, %v16920_v25 }
 0x30a   :  { %v5174_v58 = vpop.f32.mrb[88].mxu0  ;;  %v5251_v28 = vpop.f32.mrb[88].mxu1 }
 0x30b   :  { %v5176_v54 = vpop.f32.mrb[89].mxu0  ;;  %v5440_v13 = vmax.f32 %v5174_v58, %v5251_v28  ;;  %v5253_v38 = vpop.f32.mrb[89].mxu1 }
 0x30c   :  { %v5441_v45 = vmax.f32 %v5176_v54, %v5253_v38 }
 0x30d   :  { %v5448_v55 = vmax.f32 %v5432_v43, %v5440_v13 }
 0x30e   :  { %v5180_v57 = vpop.f32.mrb[90].mxu0  ;;  %v5449_v17 = vmax.f32 %v5433_v47, %v5441_v45  ;;  %v5257_v26 = vpop.f32.mrb[90].mxu1 }
 0x30f   :  { %v5182_v34 = vpop.f32.mrb[91].mxu0  ;;  %v5468_v39 = vadd.f32 %v16930_v31, %v5448_v55  ;;  %v5442_v14 = vmax.f32 %v5180_v57, %v5257_v26  ;;  %v5259_v53 = vpop.f32.mrb[91].mxu1 }
 0x310   :  { %v5469_v44 = vadd.f32 %v16934_v18, %v5449_v17  ;;  %v5443_v2 = vmax.f32 %v5182_v34, %v5259_v53 }
 0x311   :  { %v5450_v41 = vmax.f32 %v5434_v29, %v5442_v14 }
 0x312   :  { %v5328_v4 = vpop.f32.mrb[92].mxu0  ;;  %v12495_v48 = vpack.c.bf16 %v5469_v44, %v5468_v39  ;;  %v5451_v43 = vmax.f32 %v5435_v22, %v5443_v2  ;;  %v5405_v5 = vpop.f32.mrb[92].mxu1 }
 0x313   :  { %v5330_v47 = vpop.f32.mrb[93].mxu0  ;;  %v5470_v20 = vadd.f32 %v16930_v31, %v5450_v41  ;;  %v5444_v42 = vmax.f32 %v5328_v4, %v5405_v5  ;;  %v5407_v40 = vpop.f32.mrb[93].mxu1 }
 0x314   :  { %v5491_v27 = vrot.slane %v12495_v48, %v16944_v30  ;;  %v5471_v59 = vadd.f32 %v16934_v18, %v5451_v43  ;;  %v5445_v11 = vmax.f32 %v5330_v47, %v5407_v40 }
 0x315   :  { %v5452_v29 = vmax.f32 %v5436_v32, %v5444_v42 }
 0x316   :  { %v5334_v0 = vpop.f32.mrb[94].mxu0  ;;  %v5498_v50 = vrot.slane %v5491_v27, %v16944_v30  ;;  %v5589_v22 = vcombine.high %v5491_v27, %v5491_v27  ;;  %v12505_v35 = vpack.c.bf16 %v5471_v59, %v5470_v20  ;;  %v5453_v23 = vmax.f32 %v5437_v56, %v5445_v11  ;;  %v5411_v6 = vpop.f32.mrb[94].mxu1 }
 0x317   :  { %v5336_v24 = vpop.f32.mrb[95].mxu0  ;;  %v5472_v9 = vadd.f32 %v16930_v31, %v5452_v29  ;;  %v5446_v15 = vmax.f32 %v5334_v0, %v5411_v6  ;;  %v5413_v51 = vpop.f32.mrb[95].mxu1 }
 0x318   :  { %v5520_v60 = vrot.slane %v5498_v50, %v16955_v49  ;;  %v5596_v52 = vrot.slane %v5589_v22, %v16944_v30  ;;  %v5679_v62 = vcombine.high %v5498_v50, %v5498_v50  ;;  %v5838_v32 = vrot.slane %v12505_v35, %v16944_v30 }
 0x319   :  { %v5473_v63 = vadd.f32 %v16934_v18, %v5453_v23  ;;  %v5454_v1 = vmax.f32 %v5438_v8, %v5446_v15  ;;  %v5447_v19 = vmax.f32 %v5336_v24, %v5413_v51 }
 0x31a   :  { %v5611_v56 = vrot.slane %v5596_v52, %v16955_v49  ;;  %v5687_v58 = vrot.slane %v5679_v62, %v16955_v49  ;;  %v5755_v28 = vcombine.high %v5596_v52, %v5596_v52  ;;  %v5527_v54 = vrot.slane %v5520_v60, %v16955_v49 }
 0x31b   :  { %v12496_v13 = vpack.c.bf16 %v5473_v63, %v5472_v9  ;;  %v5845_v16 = vrot.slane %v5838_v32, %v16944_v30  ;;  %v5935_v10 = vcombine.high %v5838_v32, %v5838_v32  ;;  %v5474_v4 = vadd.f32 %v16930_v31, %v5454_v1 }
 0x31c   :  { %v16978_v38 = vrot.slane %v5611_v56, %v16955_v49  ;;  %v16983_v3 = vrot.slane %v5687_v58, %v16955_v49  ;;  %v5763_v7 = vrot.slane %v5755_v28, %v16955_v49  ;;  %v5542_v8 = vunpack.c.l.b16 %v5527_v54 }
 0x31d   :  { %v5506_v37 = vrot.slane %v12496_v13, %v16944_v30  ;;  %v5543_v45 = vunpack.c.h.b16 %v5527_v54  ;;  %v5867_v57 = vrot.slane %v5845_v16, %v16955_v49  ;;  %v5942_v17 = vrot.slane %v5935_v10, %v16944_v30 }
 0x31e   :  { %v5633_v55 = vunpack.c.l.b16 %v16978_v38  ;;  %v5634_v34 = vunpack.c.h.b16 %v16978_v38  ;;  %v5709_v39 = vunpack.c.l.b16 %v16983_v3  ;;  %v5710_v14 = vunpack.c.h.b16 %v16983_v3 }
 0x31f   :  { %v5513_v26 = vrot.slane %v5506_v37, %v16944_v30  ;;  %v16994_v53 = vrot.slane %v5763_v7, %v16955_v49  ;;  %v5568_v44 = vrot.slane %v5542_v8, 1  ;;  %v5597_v2 = vcombine.high %v5506_v37, %v5506_v37 }
 0x320   :  { %v5570_v48 = vrot.slane %v5543_v45, 1  ;;  %v5658_v43 = vrot.slane %v5633_v55, 1  ;;  %v17001_v5 = vrot.slane %v5867_v57, %v16955_v49  ;;  %v5957_v47 = vrot.slane %v5942_v17, %v16955_v49 }
 0x321   :  { %v5534_v36 = vrot.slane %v5513_v26, %v16955_v49  ;;  %v5680_v41 = vcombine.high %v5513_v26, %v5513_v26  ;;  %v5604_v42 = vrot.slane %v5597_v2, %v16944_v30  ;;  %v5455_v27 = vmax.f32 %v5439_v12, %v5447_v19 }
 0x322   :  { %v5660_v31 = vrot.slane %v5634_v34, 1  ;;  %v5734_v59 = vrot.slane %v5709_v39, 1  ;;  %v5736_v11 = vrot.slane %v5710_v14, 1  ;;  %v5785_v29 = vunpack.c.l.b16 %v16994_v53 }
 0x323   :  { %v5541_v20 = vrot.slane %v5534_v36, %v16955_v49  ;;  %v5701_v40 = vrot.slane %v5680_v41, %v16955_v49  ;;  %v5625_v22 = vrot.slane %v5604_v42, %v16955_v49  ;;  %v5786_v23 = vunpack.c.h.b16 %v16994_v53 }
 0x324   :  { %v17015_v6 = vrot.slane %v5957_v47, %v16955_v49  ;;  %v5756_v24 = vcombine.high %v5604_v42, %v5604_v42  ;;  %v5475_v33 = vadd.f32 %v16934_v18, %v5455_v27  ;;  %v5889_v27 = vunpack.c.l.b16 %v17001_v5 }
 0x325   :  { %v5544_v0 = vunpack.c.l.b16 %v5541_v20  ;;  %v5545_v50 = vunpack.c.h.b16 %v5541_v20  ;;  %v5708_v35 = vrot.slane %v5701_v40, %v16955_v49  ;;  %v5632_v60 = vrot.slane %v5625_v22, %v16955_v49 }
 0x326   :  { %v5777_v1 = vrot.slane %v5756_v24, %v16955_v49  ;;  %v12506_v19 = vpack.c.bf16 %v5475_v33, %v5474_v4 }
 0x327   :  { %v5546_v25 = vrot.slane %v5544_v0, 7  ;;  %v5549_v12 = vrot.slane %v5545_v50, 7  ;;  %v5569_v9 = vsel %vm5547_vm4, %v5544_v0, %v5568_v44  ;;  %v5571_v15 = vsel %vm5547_vm4, %v5545_v50, %v5570_v48 }
 0x328   :  { %v5572_v51 = vpack.c.b16 %v5571_v15, %v5569_v9  ;;  %v5711_v52 = vunpack.c.l.b16 %v5708_v35  ;;  %v5712_v62 = vunpack.c.h.b16 %v5708_v35  ;;  %v5635_v58 = vunpack.c.l.b16 %v5632_v60 }
 0x329   :  { %v5548_v32 = vsel %vm5547_vm4, %v5546_v25, %v5542_v8  ;;  %v5550_v63 = vsel %vm5547_vm4, %v5549_v12, %v5543_v45  ;;  %v5636_v28 = vunpack.c.h.b16 %v5632_v60  ;;  %v5853_v47 = vrot.slane %v12506_v19, %v16944_v30 }
 0x32a   :  { %v5551_v56 = vpack.c.b16 %v5550_v63, %v5548_v32  ;;  %v5579_v18 = vrot.slane %v5572_v51, %v16944_v30  ;;  %v5713_v54 = vrot.slane %v5711_v52, 7  ;;  %v5715_v13 = vrot.slane %v5712_v62, 7 }
 0x32b   :  { %v5735_v16 = vsel %vm5547_vm4, %v5711_v52, %v5734_v59  ;;  %v5737_v10 = vsel %vm5547_vm4, %v5712_v62, %v5736_v11  ;;  %v5637_v3 = vrot.slane %v5635_v58, 7  ;;  %v5639_v7 = vrot.slane %v5636_v28, 7 }
 0x32c   :  { %v5558_v37 = vrot.slane %v5551_v56, %v16944_v30  ;;  %12498 = vst.sshfl [vmem:[#allocation2 + $0x2] sm:$0x5 pattern:$0x73625140] %v5579_v18  ;;  %v5659_v8 = vsel %vm5547_vm4, %v5635_v58, %v5658_v43  ;;  %v5661_v45 = vsel %vm5547_vm4, %v5636_v28, %v5660_v31  ;;  %v5714_v57 = vsel %vm5547_vm4, %v5713_v54, %v5709_v39 }
 0x32d   :  { %v5716_v17 = vsel %vm5547_vm4, %v5715_v13, %v5710_v14  ;;  %v5738_v26 = vpack.c.b16 %v5737_v10, %v5735_v16  ;;  %v5638_v36 = vsel %vm5547_vm4, %v5637_v3, %v5633_v55  ;;  %v5640_v44 = vsel %vm5547_vm4, %v5639_v7, %v5634_v34 }
 0x32e   :  { %12497 = vst.sshfl [vmem:[#allocation2] sm:$0x5 pattern:$0x73625140] %v5558_v37  ;;  %v5662_v2 = vpack.c.b16 %v5661_v45, %v5659_v8  ;;  %v5717_v41 = vpack.c.b16 %v5716_v17, %v5714_v57  ;;  %v5641_v4 = vpack.c.b16 %v5640_v44, %v5638_v36  ;;  %v5784_v43 = vrot.slane %v5777_v1, %v16955_v49 }
 0x32f   :  { %v5745_v48 = vrot.slane %v5738_v26, %v16944_v30  ;;  %v5810_v39 = vrot.slane %v5785_v29, 1  ;;  %v5812_v14 = vrot.slane %v5786_v23, 1  ;;  %v5860_v40 = vrot.slane %v5853_v47, %v16944_v30 }
 0x330   :  { %v5669_v38 = vrot.slane %v5662_v2, %v16944_v30  ;;  %v5724_v55 = vrot.slane %v5717_v41, %v16944_v30  ;;  %v5648_v34 = vrot.slane %v5641_v4, %v16944_v30  ;;  %v5787_v20 = vunpack.c.l.b16 %v5784_v43 }
 0x331   :  { %12502 = vst.sshfl [vmem:[#allocation2 + $0xa] sm:$0x5 pattern:$0x73625140] %v5745_v48  ;;  %v5788_v42 = vunpack.c.h.b16 %v5784_v43  ;;  %v5890_v31 = vunpack.c.h.b16 %v17001_v5  ;;  %v5943_v59 = vcombine.high %v5853_v47, %v5853_v47  ;;  %v5881_v24 = vrot.slane %v5860_v40, %v16955_v49  ;;  %v14286_v47 = vld [vmem:[#allocation8 + $0x200] ss:$16 sps:$4 sm:$0xff]  }
 0x332   :  { %12500 = vst.sshfl [vmem:[#allocation2 + $0x6] sm:$0x5 pattern:$0x73625140] %v5669_v38  ;;  %v5789_v11 = vrot.slane %v5787_v20, 7  ;;  %v5811_v50 = vsel %vm5547_vm4, %v5787_v20, %v5810_v39  ;;  %v5979_v25 = vunpack.c.l.b16 %v17015_v6  ;;  %v5914_v52 = vrot.slane %v5889_v27, 1 }
 0x333   :  { %12501 = vst.sshfl [vmem:[#allocation2 + $0x8] sm:$0x5 pattern:$0x73625140] %v5724_v55  ;;  %v5791_v0 = vrot.slane %v5788_v42, 7  ;;  %v5813_v22 = vsel %vm5547_vm4, %v5788_v42, %v5812_v14  ;;  %v5950_v33 = vrot.slane %v5943_v59, %v16944_v30  ;;  %v5888_v51 = vrot.slane %v5881_v24, %v16955_v49 }
 0x334   :  { %12499 = vst.sshfl [vmem:[#allocation2 + $0x4] sm:$0x5 pattern:$0x73625140] %v5648_v34  ;;  %v5814_v35 = vpack.c.b16 %v5813_v22, %v5811_v50  ;;  %v5790_v5 = vsel %vm5547_vm4, %v5789_v11, %v5785_v29  ;;  %v5916_v62 = vrot.slane %v5890_v31, 1  ;;  %v5980_v32 = vunpack.c.h.b16 %v17015_v6 }
 0x335   :  { %v5792_v12 = vsel %vm5547_vm4, %v5791_v0, %v5786_v23  ;;  %v5971_v60 = vrot.slane %v5950_v33, %v16955_v49  ;;  %v5891_v1 = vunpack.c.l.b16 %v5888_v51  ;;  %v5892_v29 = vunpack.c.h.b16 %v5888_v51  ;;  %v14289_v39 = vld [vmem:[#allocation8 + $0x208] ss:$16 sps:$4 sm:$0xff]   ;;  %v14294_v40 = vld [vmem:[#allocation8 + $0x224] ss:$16 sps:$4 sm:$0xff]   ;;  %v14292_v50 = vld [vmem:[#allocation8 + $0x220] ss:$16 sps:$4 sm:$0xff]  }
 0x336   :  { %v5793_v9 = vpack.c.b16 %v5792_v12, %v5790_v5  ;;  %v5821_v15 = vrot.slane %v5814_v35, %v16944_v30  ;;  %v6004_v19 = vrot.slane %v5979_v25, 1  ;;  %v6006_v10 = vrot.slane %v5980_v32, 1  ;;  %v14295_v22 = vld [vmem:[#allocation8 + $0x228] ss:$16 sps:$4 sm:$0xff]   ;;  %v14300_v24 = vld [vmem:[#allocation8 + $0x244] ss:$16 sps:$4 sm:$0xff]  }
 0x337   :  { %v5978_v53 = vrot.slane %v5971_v60, %v16955_v49  ;;  %v5893_v23 = vrot.slane %v5891_v1, 7  ;;  %v5895_v56 = vrot.slane %v5892_v29, 7  ;;  %v5915_v18 = vsel %vm5547_vm4, %v5891_v1, %v5914_v52  ;;  %v14303_v33 = vld [vmem:[#allocation8 + $0x24c] ss:$16 sps:$4 sm:$0xff]   ;;  %v14298_v12 = vld [vmem:[#allocation8 + $0x240] ss:$16 sps:$4 sm:$0xff]  }
 0x338   :  { %v5800_v63 = vrot.slane %v5793_v9, %v16944_v30  ;;  %12504 = vst.sshfl [vmem:[#allocation2 + $0xe] sm:$0x5 pattern:$0x73625140] %v5821_v15  ;;  %v5917_v58 = vsel %vm5547_vm4, %v5892_v29, %v5916_v62  ;;  %v14301_v9 = vld [vmem:[#allocation8 + $0x248] ss:$16 sps:$4 sm:$0xff]  }
 0x339   :  { %v5918_v54 = vpack.c.b16 %v5917_v58, %v5915_v18  ;;  %v5981_v13 = vunpack.c.l.b16 %v5978_v53  ;;  %v5982_v16 = vunpack.c.h.b16 %v5978_v53  ;;  %v5894_v37 = vsel %vm5547_vm4, %v5893_v23, %v5889_v27  ;;  %v14297_v27 = vld [vmem:[#allocation8 + $0x22c] ss:$16 sps:$4 sm:$0xff]   ;;  %v14306_v60 = vld [vmem:[#allocation8 + $0x264] ss:$16 sps:$4 sm:$0xff]   ;;  %v14307_v1 = vld [vmem:[#allocation8 + $0x268] ss:$16 sps:$4 sm:$0xff]  }
 0x33a   :  { %12503 = vst.sshfl [vmem:[#allocation2 + $0xc] sm:$0x5 pattern:$0x73625140] %v5800_v63  ;;  %v5896_v3 = vsel %vm5547_vm4, %v5895_v56, %v5890_v31  ;;  %v14309_v52 = vld [vmem:[#allocation8 + $0x26c] ss:$16 sps:$4 sm:$0xff]  }
 0x33b   :  { %v6025_v28 = vld [vmem:[#allocation2] sm:$0xff]  ;;  %v5897_v7 = vpack.c.b16 %v5896_v3, %v5894_v37  ;;  %v5925_v8 = vrot.slane %v5918_v54, %v16944_v30  ;;  %v5983_v45 = vrot.slane %v5981_v13, 7  ;;  %v5985_v57 = vrot.slane %v5982_v16, 7  ;;  %v14304_v63 = vld [vmem:[#allocation8 + $0x260] ss:$16 sps:$4 sm:$0xff]  }
 0x33c   :  { %v6828_v6 = vrot.slane %v6025_v28, %v16944_v30  ;;  %v6821_v49 = vcombine.high %v6025_v28, %v6025_v28  ;;  %v6005_v17 = vsel %vm5547_vm4, %v5981_v13, %v6004_v19  ;;  %v6007_v26 = vsel %vm5547_vm4, %v5982_v16, %v6006_v10  ;;  %v14312_v19 = vld [vmem:[#allocation8 + $0x284] ss:$16 sps:$4 sm:$0xff]   ;;  %v14315_v23 = vld [vmem:[#allocation8 + $0x28c] ss:$16 sps:$4 sm:$0xff]   ;;  %v14310_v58 = vld [vmem:[#allocation8 + $0x280] ss:$16 sps:$4 sm:$0xff]  }
 0x33d   :  { %v5904_v44 = vrot.slane %v5897_v7, %v16944_v30  ;;  %12508 = vst.sshfl [vmem:[#allocation2 + $0x12] sm:$0x5 pattern:$0x73625140] %v5925_v8  ;;  %v5984_v2 = vsel %vm5547_vm4, %v5983_v45, %v5979_v25  ;;  %v5986_v41 = vsel %vm5547_vm4, %v5985_v57, %v5980_v32  ;;  %v6008_v4 = vpack.c.b16 %v6007_v26, %v6005_v17  ;;  %v14313_v28 = vld [vmem:[#allocation8 + $0x288] ss:$16 sps:$4 sm:$0xff]  }
 0x33e   :  { %v6836_v36 = vcombine.high %v6828_v6, %v6828_v6  ;;  %v5987_v48 = vpack.c.b16 %v5986_v41, %v5984_v2  ;;  %v6835_v14 = vrot.slane %v6821_v49, %v16944_v30  ;;  %v17081_v55 = vrot.slane %v6828_v6, %v16944_v30  ;;  %v14318_v13 = vld [vmem:[#allocation8 + $0x2a4] ss:$16 sps:$4 sm:$0xff]   ;;  %v14321_v16 = vld [vmem:[#allocation8 + $0x2ac] ss:$16 sps:$4 sm:$0xff]   ;;  %v14316_v37 = vld [vmem:[#allocation8 + $0x2a0] ss:$16 sps:$4 sm:$0xff]  }
 0x33f   :  { %12507 = vst.sshfl [vmem:[#allocation2 + $0x10] sm:$0x5 pattern:$0x73625140] %v5904_v44  ;;  %v6015_v38 = vrot.slane %v6008_v4, %v16944_v30  ;;  %v14319_v3 = vld [vmem:[#allocation8 + $0x2a8] ss:$16 sps:$4 sm:$0xff]  }
 0x340   :  { %v6858_v43 = vrot.slane %v6836_v36, %v16944_v30  ;;  %v5994_v20 = vrot.slane %v5987_v48, %v16944_v30  ;;  %v6837_v31 = vcombine.high %v6835_v14, %v6835_v14  ;;  %v17087_v59 = vrot.slane %v6835_v14, %v16944_v30  ;;  %v14324_v49 = vld [vmem:[#allocation8 + $0x2c4] ss:$16 sps:$4 sm:$0xff]   ;;  %v14327_v7 = vld [vmem:[#allocation8 + $0x2cc] ss:$16 sps:$4 sm:$0xff]   ;;  %v14322_v8 = vld [vmem:[#allocation8 + $0x2c0] ss:$16 sps:$4 sm:$0xff]  }
 0x341   :  { %v6026_v34 = vld [vmem:[#allocation2 + $0x8] sm:$0xff]  ;;  %12510 = vst.sshfl [vmem:[#allocation2 + $0x16] sm:$0x5 pattern:$0x73625140] %v6015_v38 }
 0x342   :  { %10864 = vmatprep.mubr.bf16.mxu0 %v6858_v43  ;;  %11356 = vmatprep.mubr.bf16.mxu1 %v6858_v43  ;;  %v6868_v42 = vcombine.high %v6858_v43, %v6858_v43  ;;  %v17090_v11 = vrot.slane %v6026_v34, %v16944_v30  ;;  %v6870_v0 = vcombine.high %v6026_v34, %v6026_v34  ;;  %v14325_v45 = vld [vmem:[#allocation8 + $0x2c8] ss:$16 sps:$4 sm:$0xff]   ;;  %v14330_v57 = vld [vmem:[#allocation8 + $0x2e4] ss:$16 sps:$4 sm:$0xff]   ;;  %v14333_v17 = vld [vmem:[#allocation8 + $0x2ec] ss:$16 sps:$4 sm:$0xff]  }
 0x343   :  { %10865 = vmatmul.mubr.bf16.vlgmr.msra.gmra.mrb[96].mxu0 %v17081_v55  ;;  %11357 = vmatmul.mubr.bf16.vlgmr.msra.gmra.mrb[96].mxu1 %v17081_v55  ;;  %12509 = vst.sshfl [vmem:[#allocation2 + $0x14] sm:$0x5 pattern:$0x73625140] %v5994_v20  ;;  %v17093_v35 = vrot.slane %v6837_v31, %v16944_v30  ;;  %v14328_v26 = vld [vmem:[#allocation8 + $0x2e0] ss:$16 sps:$4 sm:$0xff]  }
 0x344   :  { %10874 = vmatpush1.bf16.msra.mxu0 %v14286_v47  ;;  %11366 = vmatpush1.bf16.msra.mxu1 %v14289_v39  ;;  %v17097_v25 = vrot.slane %v17090_v11, %v16944_v30  ;;  %v6884_v5 = vrot.slane %v6870_v0, %v16944_v30  ;;  %v14331_v36 = vld [vmem:[#allocation8 + $0x2e8] ss:$16 sps:$4 sm:$0xff]   ;;  %v14336_v44 = vld [vmem:[#allocation8 + $0x304] ss:$16 sps:$4 sm:$0xff]   ;;  %v14339_v2 = vld [vmem:[#allocation8 + $0x30c] ss:$16 sps:$4 sm:$0xff]  }
 0x345   :  { %10905 = vmatprep.mubr.bf16.mxu0 %v6868_v42  ;;  %11397 = vmatprep.mubr.bf16.mxu1 %v6868_v42  ;;  %v14334_v41 = vld [vmem:[#allocation8 + $0x300] ss:$16 sps:$4 sm:$0xff]   ;;  %v14337_v4 = vld [vmem:[#allocation8 + $0x308] ss:$16 sps:$4 sm:$0xff]   ;;  %v14342_v48 = vld [vmem:[#allocation8 + $0x324] ss:$16 sps:$4 sm:$0xff]  }
 0x346   :  { %10875 = vmatprep.subr.bf16.mxu0 %v14294_v40  ;;  %11367 = vmatprep.subr.bf16.mxu1 %v14297_v27  ;;  %v6886_v15 = vcombine.high %v6884_v5, %v6884_v5  ;;  %v17101_v51 = vrot.slane %v6884_v5, %v16944_v30  ;;  %v14345_v43 = vld [vmem:[#allocation8 + $0x32c] ss:$16 sps:$4 sm:$0xff]   ;;  %v14340_v47 = vld [vmem:[#allocation8 + $0x320] ss:$16 sps:$4 sm:$0xff]   ;;  %v14343_v39 = vld [vmem:[#allocation8 + $0x328] ss:$16 sps:$4 sm:$0xff]  }
 0x347   :  { %v14348_v14 = vld [vmem:[#allocation8 + $0x344] ss:$16 sps:$4 sm:$0xff]   ;;  %v14351_v38 = vld [vmem:[#allocation8 + $0x34c] ss:$16 sps:$4 sm:$0xff]   ;;  %v14346_v34 = vld [vmem:[#allocation8 + $0x340] ss:$16 sps:$4 sm:$0xff]  }
 0x348   :  { %10876 = vmatpush1.bf16.msra.mxu0 %v14292_v50  ;;  %11368 = vmatpush1.bf16.msra.mxu1 %v14295_v22  ;;  %v17104_v62 = vrot.slane %v6886_v15, %v16944_v30  ;;  %v14349_v20 = vld [vmem:[#allocation8 + $0x348] ss:$16 sps:$4 sm:$0xff]   ;;  %v14354_v42 = vld [vmem:[#allocation8 + $0x364] ss:$16 sps:$4 sm:$0xff]   ;;  %v14357_v40 = vld [vmem:[#allocation8 + $0x36c] ss:$16 sps:$4 sm:$0xff]  }
 0x349   :  { %10877 = vmatprep.subr.bf16.mxu0 %v14300_v24  ;;  %11369 = vmatprep.subr.bf16.mxu1 %v14303_v33  ;;  %v14352_v27 = vld [vmem:[#allocation8 + $0x360] ss:$16 sps:$4 sm:$0xff]   ;;  %v14355_v31 = vld [vmem:[#allocation8 + $0x368] ss:$16 sps:$4 sm:$0xff]   ;;  %v14360_v0 = vld [vmem:[#allocation8 + $0x384] ss:$16 sps:$4 sm:$0xff]  }
 0x34a   :  { %v6027_v32 = vld [vmem:[#allocation2 + $0x10] sm:$0xff]  ;;  %v14358_v22 = vld [vmem:[#allocation8 + $0x380] ss:$16 sps:$4 sm:$0xff]  }
 0x34b   :  { %v17107_v29 = vrot.slane %v6027_v32, %v16944_v30  ;;  %v6919_v53 = vcombine.high %v6027_v32, %v6027_v32  ;;  %v14363_v50 = vld [vmem:[#allocation8 + $0x38c] ss:$16 sps:$4 sm:$0xff]   ;;  %v14361_v24 = vld [vmem:[#allocation8 + $0x388] ss:$16 sps:$4 sm:$0xff]   ;;  %v14366_v33 = vld [vmem:[#allocation8 + $0x3a4] ss:$16 sps:$4 sm:$0xff]  }
 0x34c   :  { %10878 = vmatpush1.bf16.msra.mxu0 %v14298_v12  ;;  %11370 = vmatpush1.bf16.msra.mxu1 %v14301_v9  ;;  %v14369_v5 = vld [vmem:[#allocation8 + $0x3ac] ss:$16 sps:$4 sm:$0xff]   ;;  %v14364_v12 = vld [vmem:[#allocation8 + $0x3a0] ss:$16 sps:$4 sm:$0xff]   ;;  %v14367_v9 = vld [vmem:[#allocation8 + $0x3a8] ss:$16 sps:$4 sm:$0xff]  }
 0x34d   :  { %10879 = vmatprep.subr.bf16.mxu0 %v14306_v60  ;;  %11371 = vmatprep.subr.bf16.mxu1 %v14309_v52  ;;  %v17111_v56 = vrot.slane %v17107_v29, %v16944_v30  ;;  %v6933_v18 = vrot.slane %v6919_v53, %v16944_v30  ;;  %v14372_v15 = vld [vmem:[#allocation8 + $0x3c4] ss:$16 sps:$4 sm:$0xff]   ;;  %v14375_v60 = vld [vmem:[#allocation8 + $0x3cc] ss:$16 sps:$4 sm:$0xff]   ;;  %v14370_v52 = vld [vmem:[#allocation8 + $0x3c0] ss:$16 sps:$4 sm:$0xff]  }
 0x34e   :  { %v14373_v32 = vld [vmem:[#allocation8 + $0x3c8] ss:$16 sps:$4 sm:$0xff]   ;;  %v14376_v53 = vld [vmem:[#allocation8 + $0x3e0] ss:$16 sps:$4 sm:$0xff]  }
 0x34f   :  { %v6935_v54 = vcombine.high %v6933_v18, %v6933_v18  ;;  %v17115_v6 = vrot.slane %v6933_v18, %v16944_v30  ;;  %v14387_v18 = vld [vmem:[#allocation8 + $0x40c] ss:$16 sps:$4 sm:$0xff]  }
 0x350   :  { %10880 = vmatpush1.bf16.msra.mxu0 %v14304_v63  ;;  %11372 = vmatpush1.bf16.msra.mxu1 %v14307_v1  ;;  %v14378_v63 = vld [vmem:[#allocation8 + $0x3e4] ss:$16 sps:$4 sm:$0xff]   ;;  %v14381_v1 = vld [vmem:[#allocation8 + $0x3ec] ss:$16 sps:$4 sm:$0xff]  }
 0x351   :  { %10881 = vmatprep.subr.bf16.mxu0 %v14312_v19  ;;  %11373 = vmatprep.subr.bf16.mxu1 %v14315_v23  ;;  %v17118_v10 = vrot.slane %v6935_v54, %v16944_v30  ;;  %v14379_v19 = vld [vmem:[#allocation8 + $0x3e8] ss:$16 sps:$4 sm:$0xff]   ;;  %v14384_v23 = vld [vmem:[#allocation8 + $0x404] ss:$16 sps:$4 sm:$0xff]  }
 0x352   :  { %v14385_v54 = vld [vmem:[#allocation8 + $0x408] ss:$16 sps:$4 sm:$0xff]  }
 0x354   :  { %10882 = vmatpush1.bf16.msra.mxu0 %v14310_v58  ;;  %11374 = vmatpush1.bf16.msra.mxu1 %v14313_v28  ;;  %v14382_v58 = vld [vmem:[#allocation8 + $0x400] ss:$16 sps:$4 sm:$0xff]   ;;  %v6866_v28 = vcombine.high %v17081_v55, %v17081_v55 }
 0x355   :  { %10883 = vmatprep.subr.bf16.mxu0 %v14318_v13  ;;  %11375 = vmatprep.subr.bf16.mxu1 %v14321_v16  ;;  %v14391_v13 = vld [vmem:[#allocation8 + $0x424] ss:$16 sps:$4 sm:$0xff]   ;;  %v14394_v16 = vld [vmem:[#allocation8 + $0x42c] ss:$16 sps:$4 sm:$0xff]   ;;  %v14395_v55 = vld [vmem:[#allocation8 + $0x440] ss:$16 sps:$4 sm:$0xff]  }
 0x358   :  { %10884 = vmatpush1.bf16.msra.mxu0 %v14316_v37  ;;  %11376 = vmatpush1.bf16.msra.mxu1 %v14319_v3  ;;  %v14389_v37 = vld [vmem:[#allocation8 + $0x420] ss:$16 sps:$4 sm:$0xff]   ;;  %v14392_v3 = vld [vmem:[#allocation8 + $0x428] ss:$16 sps:$4 sm:$0xff]  }
 0x359   :  { %10885 = vmatprep.subr.bf16.mxu0 %v14324_v49  ;;  %11377 = vmatprep.subr.bf16.mxu1 %v14327_v7  ;;  %v14397_v49 = vld [vmem:[#allocation8 + $0x444] ss:$16 sps:$4 sm:$0xff]   ;;  %v14400_v7 = vld [vmem:[#allocation8 + $0x44c] ss:$16 sps:$4 sm:$0xff]  }
 0x35c   :  { %10886 = vmatpush1.bf16.msra.mxu0 %v14322_v8  ;;  %11378 = vmatpush1.bf16.msra.mxu1 %v14325_v45  ;;  %v14398_v8 = vld [vmem:[#allocation8 + $0x448] ss:$16 sps:$4 sm:$0xff]   ;;  %v14403_v45 = vld [vmem:[#allocation8 + $0x464] ss:$16 sps:$4 sm:$0xff]  }
 0x35d   :  { %10887 = vmatprep.subr.bf16.mxu0 %v14330_v57  ;;  %11379 = vmatprep.subr.bf16.mxu1 %v14333_v17  ;;  %v14406_v57 = vld [vmem:[#allocation8 + $0x46c] ss:$16 sps:$4 sm:$0xff]   ;;  %v14401_v17 = vld [vmem:[#allocation8 + $0x460] ss:$16 sps:$4 sm:$0xff]  }
 0x360   :  { %10888 = vmatpush1.bf16.msra.mxu0 %v14328_v26  ;;  %11380 = vmatpush1.bf16.msra.mxu1 %v14331_v36  ;;  %v14404_v26 = vld [vmem:[#allocation8 + $0x468] ss:$16 sps:$4 sm:$0xff]   ;;  %v14409_v36 = vld [vmem:[#allocation8 + $0x484] ss:$16 sps:$4 sm:$0xff]  }
 0x361   :  { %10889 = vmatprep.subr.bf16.mxu0 %v14336_v44  ;;  %11381 = vmatprep.subr.bf16.mxu1 %v14339_v2  ;;  %v14412_v44 = vld [vmem:[#allocation8 + $0x48c] ss:$16 sps:$4 sm:$0xff]   ;;  %v14407_v2 = vld [vmem:[#allocation8 + $0x480] ss:$16 sps:$4 sm:$0xff]  }
 0x364   :  { %10890 = vmatpush1.bf16.msra.mxu0 %v14334_v41  ;;  %11382 = vmatpush1.bf16.msra.mxu1 %v14337_v4  ;;  %v14410_v41 = vld [vmem:[#allocation8 + $0x488] ss:$16 sps:$4 sm:$0xff]   ;;  %v14415_v4 = vld [vmem:[#allocation8 + $0x4a4] ss:$16 sps:$4 sm:$0xff]  }
 0x365   :  { %10891 = vmatprep.subr.bf16.mxu0 %v14342_v48  ;;  %11383 = vmatprep.subr.bf16.mxu1 %v14345_v43  ;;  %v14418_v48 = vld [vmem:[#allocation8 + $0x4ac] ss:$16 sps:$4 sm:$0xff]   ;;  %v14413_v43 = vld [vmem:[#allocation8 + $0x4a0] ss:$16 sps:$4 sm:$0xff]  }
 0x368   :  { %10892 = vmatpush1.bf16.msra.mxu0 %v14340_v47  ;;  %11384 = vmatpush1.bf16.msra.mxu1 %v14343_v39  ;;  %v14416_v47 = vld [vmem:[#allocation8 + $0x4a8] ss:$16 sps:$4 sm:$0xff]   ;;  %v14421_v39 = vld [vmem:[#allocation8 + $0x4c4] ss:$16 sps:$4 sm:$0xff]  }
 0x369   :  { %10893 = vmatprep.subr.bf16.mxu0 %v14348_v14  ;;  %11385 = vmatprep.subr.bf16.mxu1 %v14351_v38  ;;  %v14424_v14 = vld [vmem:[#allocation8 + $0x4cc] ss:$16 sps:$4 sm:$0xff]   ;;  %v14419_v38 = vld [vmem:[#allocation8 + $0x4c0] ss:$16 sps:$4 sm:$0xff]  }
 0x36c   :  { %10894 = vmatpush1.bf16.msra.mxu0 %v14346_v34  ;;  %11386 = vmatpush1.bf16.msra.mxu1 %v14349_v20  ;;  %v14422_v34 = vld [vmem:[#allocation8 + $0x4c8] ss:$16 sps:$4 sm:$0xff]   ;;  %v14427_v20 = vld [vmem:[#allocation8 + $0x4e4] ss:$16 sps:$4 sm:$0xff]  }
 0x36d   :  { %10895 = vmatprep.subr.bf16.mxu0 %v14354_v42  ;;  %11387 = vmatprep.subr.bf16.mxu1 %v14357_v40  ;;  %v14430_v42 = vld [vmem:[#allocation8 + $0x4ec] ss:$16 sps:$4 sm:$0xff]   ;;  %v14425_v40 = vld [vmem:[#allocation8 + $0x4e0] ss:$16 sps:$4 sm:$0xff]  }
 0x370   :  { %10896 = vmatpush1.bf16.msra.mxu0 %v14352_v27  ;;  %11388 = vmatpush1.bf16.msra.mxu1 %v14355_v31  ;;  %v14428_v27 = vld [vmem:[#allocation8 + $0x4e8] ss:$16 sps:$4 sm:$0xff]   ;;  %v14433_v31 = vld [vmem:[#allocation8 + $0x504] ss:$16 sps:$4 sm:$0xff]  }
 0x371   :  { %10897 = vmatprep.subr.bf16.mxu0 %v14360_v0  ;;  %11389 = vmatprep.subr.bf16.mxu1 %v14363_v50  ;;  %v14436_v0 = vld [vmem:[#allocation8 + $0x50c] ss:$16 sps:$4 sm:$0xff]   ;;  %v14431_v50 = vld [vmem:[#allocation8 + $0x500] ss:$16 sps:$4 sm:$0xff]  }
 0x374   :  { %10898 = vmatpush1.bf16.msra.mxu0 %v14358_v22  ;;  %11390 = vmatpush1.bf16.msra.mxu1 %v14361_v24  ;;  %v14434_v22 = vld [vmem:[#allocation8 + $0x508] ss:$16 sps:$4 sm:$0xff]   ;;  %v14439_v24 = vld [vmem:[#allocation8 + $0x524] ss:$16 sps:$4 sm:$0xff]  }
 0x375   :  { %10899 = vmatprep.subr.bf16.mxu0 %v14366_v33  ;;  %11391 = vmatprep.subr.bf16.mxu1 %v14369_v5  ;;  %v14442_v33 = vld [vmem:[#allocation8 + $0x52c] ss:$16 sps:$4 sm:$0xff]   ;;  %v14437_v5 = vld [vmem:[#allocation8 + $0x520] ss:$16 sps:$4 sm:$0xff]  }
 0x378   :  { %10900 = vmatpush1.bf16.msra.mxu0 %v14364_v12  ;;  %11392 = vmatpush1.bf16.msra.mxu1 %v14367_v9  ;;  %v14440_v12 = vld [vmem:[#allocation8 + $0x528] ss:$16 sps:$4 sm:$0xff]   ;;  %v14445_v9 = vld [vmem:[#allocation8 + $0x544] ss:$16 sps:$4 sm:$0xff]  }
 0x379   :  { %10901 = vmatprep.subr.bf16.mxu0 %v14372_v15  ;;  %11393 = vmatprep.subr.bf16.mxu1 %v14375_v60  ;;  %v14448_v15 = vld [vmem:[#allocation8 + $0x54c] ss:$16 sps:$4 sm:$0xff]   ;;  %v14443_v60 = vld [vmem:[#allocation8 + $0x540] ss:$16 sps:$4 sm:$0xff]  }
 0x37c   :  { %10902 = vmatpush1.bf16.msra.mxu0 %v14370_v52  ;;  %11394 = vmatpush1.bf16.msra.mxu1 %v14373_v32  ;;  %v14446_v52 = vld [vmem:[#allocation8 + $0x548] ss:$16 sps:$4 sm:$0xff]   ;;  %v14451_v32 = vld [vmem:[#allocation8 + $0x564] ss:$16 sps:$4 sm:$0xff]  }
 0x37d   :  { %10903 = vmatprep.subr.bf16.mxu0 %v14378_v63  ;;  %11395 = vmatprep.subr.bf16.mxu1 %v14381_v1  ;;  %v14454_v63 = vld [vmem:[#allocation8 + $0x56c] ss:$16 sps:$4 sm:$0xff]   ;;  %v14449_v1 = vld [vmem:[#allocation8 + $0x560] ss:$16 sps:$4 sm:$0xff]  }
 0x380   :  { %10904 = vmatpush1.bf16.msra.mxu0 %v14376_v53  ;;  %11396 = vmatpush1.bf16.msra.mxu1 %v14379_v19  ;;  %v14452_v53 = vld [vmem:[#allocation8 + $0x568] ss:$16 sps:$4 sm:$0xff]   ;;  %v14457_v19 = vld [vmem:[#allocation8 + $0x584] ss:$16 sps:$4 sm:$0xff]  }
 0x381   :  { %10914 = vmatprep.subr.bf16.mxu0 %v14384_v23  ;;  %11406 = vmatprep.subr.bf16.mxu1 %v14387_v18  ;;  %v14460_v23 = vld [vmem:[#allocation8 + $0x58c] ss:$16 sps:$4 sm:$0xff]   ;;  %v14455_v18 = vld [vmem:[#allocation8 + $0x580] ss:$16 sps:$4 sm:$0xff]  }
 0x383   :  { %10906 = vmatmul.mubr.bf16.vlgmr.msra.gmra.mrb[96].mxu0 %v6866_v28  ;;  %11398 = vmatmul.mubr.bf16.vlgmr.msra.gmra.mrb[96].mxu1 %v6866_v28  ;;  %v14463_v28 = vld [vmem:[#allocation8 + $0x5a4] ss:$16 sps:$4 sm:$0xff]  }
 0x384   :  { %10915 = vmatpush1.bf16.msra.mxu0 %v14382_v58  ;;  %10946 = vmatprep.mubr.bf16.mxu0 %v17093_v35  ;;  %v14458_v58 = vld [vmem:[#allocation8 + $0x588] ss:$16 sps:$4 sm:$0xff]  }
 0x385   :  { %11407 = vmatpush1.bf16.msra.mxu1 %v14385_v54  ;;  %11438 = vmatprep.mubr.bf16.mxu1 %v17093_v35  ;;  %v14466_v54 = vld [vmem:[#allocation8 + $0x5ac] ss:$16 sps:$4 sm:$0xff]  }
 0x386   :  { %10916 = vmatprep.subr.bf16.mxu0 %v14391_v13  ;;  %11408 = vmatprep.subr.bf16.mxu1 %v14394_v16  ;;  %v14461_v13 = vld [vmem:[#allocation8 + $0x5a0] ss:$16 sps:$4 sm:$0xff]   ;;  %v14464_v16 = vld [vmem:[#allocation8 + $0x5a8] ss:$16 sps:$4 sm:$0xff]  }
 0x388   :  { %10917 = vmatpush1.bf16.msra.mxu0 %v14389_v37  ;;  %v14469_v37 = vld [vmem:[#allocation8 + $0x5c4] ss:$16 sps:$4 sm:$0xff]  }
 0x389   :  { %11409 = vmatpush1.bf16.msra.mxu1 %v14392_v3  ;;  %10918 = vmatprep.subr.bf16.mxu0 %v14397_v49  ;;  %v14472_v3 = vld [vmem:[#allocation8 + $0x5cc] ss:$16 sps:$4 sm:$0xff]   ;;  %v14467_v49 = vld [vmem:[#allocation8 + $0x5c0] ss:$16 sps:$4 sm:$0xff]  }
 0x38a   :  { %11410 = vmatprep.subr.bf16.mxu1 %v14400_v7  ;;  %v14470_v7 = vld [vmem:[#allocation8 + $0x5c8] ss:$16 sps:$4 sm:$0xff]  }
 0x38c   :  { %10919 = vmatpush1.bf16.msra.mxu0 %v14395_v55  ;;  %v14475_v55 = vld [vmem:[#allocation8 + $0x5e4] ss:$16 sps:$4 sm:$0xff]  }
 0x38d   :  { %11411 = vmatpush1.bf16.msra.mxu1 %v14398_v8  ;;  %10920 = vmatprep.subr.bf16.mxu0 %v14403_v45  ;;  %v14478_v8 = vld [vmem:[#allocation8 + $0x5ec] ss:$16 sps:$4 sm:$0xff]   ;;  %v14473_v45 = vld [vmem:[#allocation8 + $0x5e0] ss:$16 sps:$4 sm:$0xff]  }
 0x38e   :  { %11412 = vmatprep.subr.bf16.mxu1 %v14406_v57  ;;  %v14476_v57 = vld [vmem:[#allocation8 + $0x5e8] ss:$16 sps:$4 sm:$0xff]  }
 0x390   :  { %10921 = vmatpush1.bf16.msra.mxu0 %v14401_v17  ;;  %v14481_v17 = vld [vmem:[#allocation8 + $0x604] ss:$16 sps:$4 sm:$0xff]  }
 0x391   :  { %11413 = vmatpush1.bf16.msra.mxu1 %v14404_v26  ;;  %10922 = vmatprep.subr.bf16.mxu0 %v14409_v36  ;;  %v14484_v26 = vld [vmem:[#allocation8 + $0x60c] ss:$16 sps:$4 sm:$0xff]   ;;  %v14479_v36 = vld [vmem:[#allocation8 + $0x600] ss:$16 sps:$4 sm:$0xff]  }
 0x392   :  { %11414 = vmatprep.subr.bf16.mxu1 %v14412_v44  ;;  %v14482_v44 = vld [vmem:[#allocation8 + $0x608] ss:$16 sps:$4 sm:$0xff]  }
 0x394   :  { %10923 = vmatpush1.bf16.msra.mxu0 %v14407_v2  ;;  %v14487_v2 = vld [vmem:[#allocation8 + $0x624] ss:$16 sps:$4 sm:$0xff]  }
 0x395   :  { %11415 = vmatpush1.bf16.msra.mxu1 %v14410_v41  ;;  %10924 = vmatprep.subr.bf16.mxu0 %v14415_v4  ;;  %v6869_v41 = vcombine.high %v17093_v35, %v17093_v35  ;;  %v14490_v4 = vld [vmem:[#allocation8 + $0x62c] ss:$16 sps:$4 sm:$0xff]  }
 0x396   :  { %11416 = vmatprep.subr.bf16.mxu1 %v14418_v48  ;;  %v14485_v48 = vld [vmem:[#allocation8 + $0x620] ss:$16 sps:$4 sm:$0xff]   ;;  %v14502_v35 = vld [vmem:[#allocation8 + $0x66c] ss:$16 sps:$4 sm:$0xff]  }
 0x398   :  { %10925 = vmatpush1.bf16.msra.mxu0 %v14413_v43  ;;  %v14488_v43 = vld [vmem:[#allocation8 + $0x628] ss:$16 sps:$4 sm:$0xff]  }
 0x399   :  { %11417 = vmatpush1.bf16.msra.mxu1 %v14416_v47  ;;  %10926 = vmatprep.subr.bf16.mxu0 %v14421_v39  ;;  %v14493_v47 = vld [vmem:[#allocation8 + $0x644] ss:$16 sps:$4 sm:$0xff]   ;;  %v14496_v39 = vld [vmem:[#allocation8 + $0x64c] ss:$16 sps:$4 sm:$0xff]  }
 0x39a   :  { %11418 = vmatprep.subr.bf16.mxu1 %v14424_v14  ;;  %v14491_v14 = vld [vmem:[#allocation8 + $0x640] ss:$16 sps:$4 sm:$0xff]  }
 0x39c   :  { %10927 = vmatpush1.bf16.msra.mxu0 %v14419_v38  ;;  %v14494_v38 = vld [vmem:[#allocation8 + $0x648] ss:$16 sps:$4 sm:$0xff]  }
 0x39d   :  { %11419 = vmatpush1.bf16.msra.mxu1 %v14422_v34  ;;  %10928 = vmatprep.subr.bf16.mxu0 %v14427_v20  ;;  %v14499_v34 = vld [vmem:[#allocation8 + $0x664] ss:$16 sps:$4 sm:$0xff]   ;;  %v14497_v20 = vld [vmem:[#allocation8 + $0x660] ss:$16 sps:$4 sm:$0xff]  }
 0x39e   :  { %11420 = vmatprep.subr.bf16.mxu1 %v14430_v42  ;;  %v14500_v42 = vld [vmem:[#allocation8 + $0x668] ss:$16 sps:$4 sm:$0xff]  }
 0x3a0   :  { %10929 = vmatpush1.bf16.msra.mxu0 %v14425_v40  ;;  %v14505_v40 = vld [vmem:[#allocation8 + $0x684] ss:$16 sps:$4 sm:$0xff]  }
 0x3a1   :  { %11421 = vmatpush1.bf16.msra.mxu1 %v14428_v27  ;;  %10930 = vmatprep.subr.bf16.mxu0 %v14433_v31  ;;  %v14508_v27 = vld [vmem:[#allocation8 + $0x68c] ss:$16 sps:$4 sm:$0xff]   ;;  %v14503_v31 = vld [vmem:[#allocation8 + $0x680] ss:$16 sps:$4 sm:$0xff]  }
 0x3a2   :  { %11422 = vmatprep.subr.bf16.mxu1 %v14436_v0  ;;  %v14506_v0 = vld [vmem:[#allocation8 + $0x688] ss:$16 sps:$4 sm:$0xff]  }
 0x3a4   :  { %10931 = vmatpush1.bf16.msra.mxu0 %v14431_v50  ;;  %v14511_v50 = vld [vmem:[#allocation8 + $0x6a4] ss:$16 sps:$4 sm:$0xff]  }
 0x3a5   :  { %11423 = vmatpush1.bf16.msra.mxu1 %v14434_v22  ;;  %10932 = vmatprep.subr.bf16.mxu0 %v14439_v24  ;;  %v14514_v22 = vld [vmem:[#allocation8 + $0x6ac] ss:$16 sps:$4 sm:$0xff]   ;;  %v14509_v24 = vld [vmem:[#allocation8 + $0x6a0] ss:$16 sps:$4 sm:$0xff]  }
 0x3a6   :  { %11424 = vmatprep.subr.bf16.mxu1 %v14442_v33  ;;  %v14512_v33 = vld [vmem:[#allocation8 + $0x6a8] ss:$16 sps:$4 sm:$0xff]  }
 0x3a8   :  { %10933 = vmatpush1.bf16.msra.mxu0 %v14437_v5  ;;  %v14517_v5 = vld [vmem:[#allocation8 + $0x6c4] ss:$16 sps:$4 sm:$0xff]  }
 0x3a9   :  { %11425 = vmatpush1.bf16.msra.mxu1 %v14440_v12  ;;  %10934 = vmatprep.subr.bf16.mxu0 %v14445_v9  ;;  %v14520_v12 = vld [vmem:[#allocation8 + $0x6cc] ss:$16 sps:$4 sm:$0xff]   ;;  %v14515_v9 = vld [vmem:[#allocation8 + $0x6c0] ss:$16 sps:$4 sm:$0xff]  }
 0x3aa   :  { %11426 = vmatprep.subr.bf16.mxu1 %v14448_v15  ;;  %v14518_v15 = vld [vmem:[#allocation8 + $0x6c8] ss:$16 sps:$4 sm:$0xff]  }
 0x3ac   :  { %10935 = vmatpush1.bf16.msra.mxu0 %v14443_v60  ;;  %v14523_v60 = vld [vmem:[#allocation8 + $0x6e4] ss:$16 sps:$4 sm:$0xff]  }
 0x3ad   :  { %11427 = vmatpush1.bf16.msra.mxu1 %v14446_v52  ;;  %10936 = vmatprep.subr.bf16.mxu0 %v14451_v32  ;;  %v14526_v52 = vld [vmem:[#allocation8 + $0x6ec] ss:$16 sps:$4 sm:$0xff]   ;;  %v14521_v32 = vld [vmem:[#allocation8 + $0x6e0] ss:$16 sps:$4 sm:$0xff]  }
 0x3ae   :  { %11428 = vmatprep.subr.bf16.mxu1 %v14454_v63  ;;  %v14524_v63 = vld [vmem:[#allocation8 + $0x6e8] ss:$16 sps:$4 sm:$0xff]  }
 0x3b0   :  { %10937 = vmatpush1.bf16.msra.mxu0 %v14449_v1  ;;  %v14529_v1 = vld [vmem:[#allocation8 + $0x704] ss:$16 sps:$4 sm:$0xff]  }
 0x3b1   :  { %11429 = vmatpush1.bf16.msra.mxu1 %v14452_v53  ;;  %10938 = vmatprep.subr.bf16.mxu0 %v14457_v19  ;;  %v14532_v53 = vld [vmem:[#allocation8 + $0x70c] ss:$16 sps:$4 sm:$0xff]   ;;  %v14527_v19 = vld [vmem:[#allocation8 + $0x700] ss:$16 sps:$4 sm:$0xff]  }
 0x3b2   :  { %11430 = vmatprep.subr.bf16.mxu1 %v14460_v23  ;;  %v14530_v23 = vld [vmem:[#allocation8 + $0x708] ss:$16 sps:$4 sm:$0xff]  }
 0x3b4   :  { %10939 = vmatpush1.bf16.msra.mxu0 %v14455_v18  ;;  %v14535_v18 = vld [vmem:[#allocation8 + $0x724] ss:$16 sps:$4 sm:$0xff]  }
 0x3b5   :  { %11431 = vmatpush1.bf16.msra.mxu1 %v14458_v58  ;;  %10940 = vmatprep.subr.bf16.mxu0 %v14463_v28  ;;  %v14538_v58 = vld [vmem:[#allocation8 + $0x72c] ss:$16 sps:$4 sm:$0xff]   ;;  %v14533_v28 = vld [vmem:[#allocation8 + $0x720] ss:$16 sps:$4 sm:$0xff]  }
 0x3b6   :  { %11432 = vmatprep.subr.bf16.mxu1 %v14466_v54  ;;  %v14536_v54 = vld [vmem:[#allocation8 + $0x728] ss:$16 sps:$4 sm:$0xff]  }
 0x3b8   :  { %10941 = vmatpush1.bf16.msra.mxu0 %v14461_v13  ;;  %v14541_v13 = vld [vmem:[#allocation8 + $0x744] ss:$16 sps:$4 sm:$0xff]  }
 0x3b9   :  { %11433 = vmatpush1.bf16.msra.mxu1 %v14464_v16  ;;  %10942 = vmatprep.subr.bf16.mxu0 %v14469_v37  ;;  %v14544_v16 = vld [vmem:[#allocation8 + $0x74c] ss:$16 sps:$4 sm:$0xff]   ;;  %v14539_v37 = vld [vmem:[#allocation8 + $0x740] ss:$16 sps:$4 sm:$0xff]  }
 0x3ba   :  { %11434 = vmatprep.subr.bf16.mxu1 %v14472_v3  ;;  %v14542_v3 = vld [vmem:[#allocation8 + $0x748] ss:$16 sps:$4 sm:$0xff]  }
 0x3bc   :  { %10943 = vmatpush1.bf16.msra.mxu0 %v14467_v49  ;;  %v14547_v49 = vld [vmem:[#allocation8 + $0x764] ss:$16 sps:$4 sm:$0xff]  }
 0x3bd   :  { %11435 = vmatpush1.bf16.msra.mxu1 %v14470_v7  ;;  %10944 = vmatprep.subr.bf16.mxu0 %v14475_v55  ;;  %v14550_v7 = vld [vmem:[#allocation8 + $0x76c] ss:$16 sps:$4 sm:$0xff]   ;;  %v14545_v55 = vld [vmem:[#allocation8 + $0x760] ss:$16 sps:$4 sm:$0xff]  }
 0x3be   :  { %11436 = vmatprep.subr.bf16.mxu1 %v14478_v8  ;;  %v14548_v8 = vld [vmem:[#allocation8 + $0x768] ss:$16 sps:$4 sm:$0xff]  }
 0x3c0   :  { %10945 = vmatpush1.bf16.msra.mxu0 %v14473_v45  ;;  %v14553_v45 = vld [vmem:[#allocation8 + $0x784] ss:$16 sps:$4 sm:$0xff]  }
 0x3c1   :  { %11437 = vmatpush1.bf16.msra.mxu1 %v14476_v57  ;;  %10955 = vmatprep.subr.bf16.mxu0 %v14481_v17  ;;  %v14556_v57 = vld [vmem:[#allocation8 + $0x78c] ss:$16 sps:$4 sm:$0xff]   ;;  %v14551_v17 = vld [vmem:[#allocation8 + $0x780] ss:$16 sps:$4 sm:$0xff]  }
 0x3c2   :  { %11447 = vmatprep.subr.bf16.mxu1 %v14484_v26  ;;  %v14554_v26 = vld [vmem:[#allocation8 + $0x788] ss:$16 sps:$4 sm:$0xff]  }
 0x3c3   :  { %10947 = vmatmul.mubr.bf16.vlgmr.msra.gmra.mrb[96].mxu0 %v17087_v59 }
 0x3c4   :  { %11439 = vmatmul.mubr.bf16.vlgmr.msra.gmra.mrb[96].mxu1 %v17087_v59  ;;  %10956 = vmatpush1.bf16.msra.mxu0 %v14479_v36  ;;  %v14559_v36 = vld [vmem:[#allocation8 + $0x7a4] ss:$16 sps:$4 sm:$0xff]  }
 0x3c5   :  { %10987 = vmatprep.mubr.bf16.mxu0 %v6869_v41  ;;  %11448 = vmatpush1.bf16.msra.mxu1 %v14482_v44  ;;  %v14562_v44 = vld [vmem:[#allocation8 + $0x7ac] ss:$16 sps:$4 sm:$0xff]  }
 0x3c6   :  { %11479 = vmatprep.mubr.bf16.mxu1 %v6869_v41  ;;  %10957 = vmatprep.subr.bf16.mxu0 %v14487_v2  ;;  %v14557_v2 = vld [vmem:[#allocation8 + $0x7a0] ss:$16 sps:$4 sm:$0xff]   ;;  %v14560_v41 = vld [vmem:[#allocation8 + $0x7a8] ss:$16 sps:$4 sm:$0xff]  }
 0x3c7   :  { %11449 = vmatprep.subr.bf16.mxu1 %v14490_v4  ;;  %v14565_v4 = vld [vmem:[#allocation8 + $0x7c4] ss:$16 sps:$4 sm:$0xff]  }
 0x3c8   :  { %10958 = vmatpush1.bf16.msra.mxu0 %v14485_v48  ;;  %v14568_v48 = vld [vmem:[#allocation8 + $0x7cc] ss:$16 sps:$4 sm:$0xff]  }
 0x3c9   :  { %11450 = vmatpush1.bf16.msra.mxu1 %v14488_v43  ;;  %10959 = vmatprep.subr.bf16.mxu0 %v14493_v47  ;;  %v14563_v43 = vld [vmem:[#allocation8 + $0x7c0] ss:$16 sps:$4 sm:$0xff]   ;;  %v14566_v47 = vld [vmem:[#allocation8 + $0x7c8] ss:$16 sps:$4 sm:$0xff]  }
 0x3ca   :  { %11451 = vmatprep.subr.bf16.mxu1 %v14496_v39  ;;  %v14571_v39 = vld [vmem:[#allocation8 + $0x7e4] ss:$16 sps:$4 sm:$0xff]  }
 0x3cc   :  { %10960 = vmatpush1.bf16.msra.mxu0 %v14491_v14  ;;  %v14574_v14 = vld [vmem:[#allocation8 + $0x7ec] ss:$16 sps:$4 sm:$0xff]  }
 0x3cd   :  { %11452 = vmatpush1.bf16.msra.mxu1 %v14494_v38  ;;  %10961 = vmatprep.subr.bf16.mxu0 %v14499_v34  ;;  %v14569_v38 = vld [vmem:[#allocation8 + $0x7e0] ss:$16 sps:$4 sm:$0xff]   ;;  %v14572_v34 = vld [vmem:[#allocation8 + $0x7e8] ss:$16 sps:$4 sm:$0xff]  }
 0x3ce   :  { %11453 = vmatprep.subr.bf16.mxu1 %v14502_v35  ;;  %v14577_v35 = vld [vmem:[#allocation8 + $0x804] ss:$16 sps:$4 sm:$0xff]  }
 0x3d0   :  { %10962 = vmatpush1.bf16.msra.mxu0 %v14497_v20  ;;  %v14580_v20 = vld [vmem:[#allocation8 + $0x80c] ss:$16 sps:$4 sm:$0xff]  }
 0x3d1   :  { %11454 = vmatpush1.bf16.msra.mxu1 %v14500_v42  ;;  %10963 = vmatprep.subr.bf16.mxu0 %v14505_v40  ;;  %v6885_v42 = vcombine.high %v17090_v11, %v17090_v11  ;;  %v14575_v40 = vld [vmem:[#allocation8 + $0x800] ss:$16 sps:$4 sm:$0xff]   ;;  %v14584_v11 = vld [vmem:[#allocation8 + $0x828] ss:$16 sps:$4 sm:$0xff]  }
 0x3d2   :  { %11455 = vmatprep.subr.bf16.mxu1 %v14508_v27  ;;  %v6867_v27 = vcombine.high %v17087_v59, %v17087_v59  ;;  %v14592_v59 = vld [vmem:[#allocation8 + $0x84c] ss:$16 sps:$4 sm:$0xff]  }
 0x3d4   :  { %10964 = vmatpush1.bf16.msra.mxu0 %v14503_v31  ;;  %v14578_v31 = vld [vmem:[#allocation8 + $0x808] ss:$16 sps:$4 sm:$0xff]  }
 0x3d5   :  { %11456 = vmatpush1.bf16.msra.mxu1 %v14506_v0  ;;  %10965 = vmatprep.subr.bf16.mxu0 %v14511_v50  ;;  %v14583_v0 = vld [vmem:[#allocation8 + $0x824] ss:$16 sps:$4 sm:$0xff]   ;;  %v17133_v50 = vrot.slane %v6885_v42, %v16944_v30 }
 0x3d6   :  { %11457 = vmatprep.subr.bf16.mxu1 %v14514_v22  ;;  %v14586_v22 = vld [vmem:[#allocation8 + $0x82c] ss:$16 sps:$4 sm:$0xff]   ;;  %v14655_v42 = vld [vmem:[#allocation8 + $0x9a4] ss:$16 sps:$4 sm:$0xff]  }
 0x3d8   :  { %10966 = vmatpush1.bf16.msra.mxu0 %v14509_v24  ;;  %v14581_v24 = vld [vmem:[#allocation8 + $0x820] ss:$16 sps:$4 sm:$0xff]  }
 0x3d9   :  { %11458 = vmatpush1.bf16.msra.mxu1 %v14512_v33  ;;  %10967 = vmatprep.subr.bf16.mxu0 %v14517_v5  ;;  %v14589_v33 = vld [vmem:[#allocation8 + $0x844] ss:$16 sps:$4 sm:$0xff]   ;;  %v14587_v5 = vld [vmem:[#allocation8 + $0x840] ss:$16 sps:$4 sm:$0xff]  }
 0x3da   :  { %11459 = vmatprep.subr.bf16.mxu1 %v14520_v12  ;;  %v14590_v12 = vld [vmem:[#allocation8 + $0x848] ss:$16 sps:$4 sm:$0xff]  }
 0x3dc   :  { %10968 = vmatpush1.bf16.msra.mxu0 %v14515_v9  ;;  %v14595_v9 = vld [vmem:[#allocation8 + $0x864] ss:$16 sps:$4 sm:$0xff]  }
 0x3dd   :  { %11460 = vmatpush1.bf16.msra.mxu1 %v14518_v15  ;;  %10969 = vmatprep.subr.bf16.mxu0 %v14523_v60  ;;  %v14598_v15 = vld [vmem:[#allocation8 + $0x86c] ss:$16 sps:$4 sm:$0xff]   ;;  %v14593_v60 = vld [vmem:[#allocation8 + $0x860] ss:$16 sps:$4 sm:$0xff]  }
 0x3de   :  { %11461 = vmatprep.subr.bf16.mxu1 %v14526_v52  ;;  %v14596_v52 = vld [vmem:[#allocation8 + $0x868] ss:$16 sps:$4 sm:$0xff]  }
 0x3e0   :  { %10970 = vmatpush1.bf16.msra.mxu0 %v14521_v32  ;;  %v14601_v32 = vld [vmem:[#allocation8 + $0x884] ss:$16 sps:$4 sm:$0xff]  }
 0x3e1   :  { %11462 = vmatpush1.bf16.msra.mxu1 %v14524_v63  ;;  %10971 = vmatprep.subr.bf16.mxu0 %v14529_v1  ;;  %v14604_v63 = vld [vmem:[#allocation8 + $0x88c] ss:$16 sps:$4 sm:$0xff]   ;;  %v14599_v1 = vld [vmem:[#allocation8 + $0x880] ss:$16 sps:$4 sm:$0xff]  }
 0x3e2   :  { %11463 = vmatprep.subr.bf16.mxu1 %v14532_v53  ;;  %v14602_v53 = vld [vmem:[#allocation8 + $0x888] ss:$16 sps:$4 sm:$0xff]  }
 0x3e4   :  { %10972 = vmatpush1.bf16.msra.mxu0 %v14527_v19  ;;  %v14607_v19 = vld [vmem:[#allocation8 + $0x8a4] ss:$16 sps:$4 sm:$0xff]  }
 0x3e5   :  { %11464 = vmatpush1.bf16.msra.mxu1 %v14530_v23  ;;  %10973 = vmatprep.subr.bf16.mxu0 %v14535_v18  ;;  %v14610_v23 = vld [vmem:[#allocation8 + $0x8ac] ss:$16 sps:$4 sm:$0xff]   ;;  %v14605_v18 = vld [vmem:[#allocation8 + $0x8a0] ss:$16 sps:$4 sm:$0xff]  }
 0x3e6   :  { %11465 = vmatprep.subr.bf16.mxu1 %v14538_v58  ;;  %v14608_v58 = vld [vmem:[#allocation8 + $0x8a8] ss:$16 sps:$4 sm:$0xff]  }
 0x3e8   :  { %10974 = vmatpush1.bf16.msra.mxu0 %v14533_v28  ;;  %v14613_v28 = vld [vmem:[#allocation8 + $0x8c4] ss:$16 sps:$4 sm:$0xff]  }
 0x3e9   :  { %11466 = vmatpush1.bf16.msra.mxu1 %v14536_v54  ;;  %10975 = vmatprep.subr.bf16.mxu0 %v14541_v13  ;;  %v14616_v54 = vld [vmem:[#allocation8 + $0x8cc] ss:$16 sps:$4 sm:$0xff]   ;;  %v14611_v13 = vld [vmem:[#allocation8 + $0x8c0] ss:$16 sps:$4 sm:$0xff]  }
 0x3ea   :  { %11467 = vmatprep.subr.bf16.mxu1 %v14544_v16  ;;  %v14614_v16 = vld [vmem:[#allocation8 + $0x8c8] ss:$16 sps:$4 sm:$0xff]  }
 0x3ec   :  { %10976 = vmatpush1.bf16.msra.mxu0 %v14539_v37  ;;  %v14619_v37 = vld [vmem:[#allocation8 + $0x8e4] ss:$16 sps:$4 sm:$0xff]  }
 0x3ed   :  { %11468 = vmatpush1.bf16.msra.mxu1 %v14542_v3  ;;  %10977 = vmatprep.subr.bf16.mxu0 %v14547_v49  ;;  %v14622_v3 = vld [vmem:[#allocation8 + $0x8ec] ss:$16 sps:$4 sm:$0xff]   ;;  %v14617_v49 = vld [vmem:[#allocation8 + $0x8e0] ss:$16 sps:$4 sm:$0xff]  }
 0x3ee   :  { %11469 = vmatprep.subr.bf16.mxu1 %v14550_v7  ;;  %v14620_v7 = vld [vmem:[#allocation8 + $0x8e8] ss:$16 sps:$4 sm:$0xff]  }
 0x3f0   :  { %10978 = vmatpush1.bf16.msra.mxu0 %v14545_v55  ;;  %v14625_v55 = vld [vmem:[#allocation8 + $0x904] ss:$16 sps:$4 sm:$0xff]  }
 0x3f1   :  { %11470 = vmatpush1.bf16.msra.mxu1 %v14548_v8  ;;  %10979 = vmatprep.subr.bf16.mxu0 %v14553_v45  ;;  %v14628_v8 = vld [vmem:[#allocation8 + $0x90c] ss:$16 sps:$4 sm:$0xff]   ;;  %v14623_v45 = vld [vmem:[#allocation8 + $0x900] ss:$16 sps:$4 sm:$0xff]  }
 0x3f2   :  { %11471 = vmatprep.subr.bf16.mxu1 %v14556_v57  ;;  %v14626_v57 = vld [vmem:[#allocation8 + $0x908] ss:$16 sps:$4 sm:$0xff]  }
 0x3f4   :  { %10980 = vmatpush1.bf16.msra.mxu0 %v14551_v17  ;;  %v14631_v17 = vld [vmem:[#allocation8 + $0x924] ss:$16 sps:$4 sm:$0xff]  }
 0x3f5   :  { %11472 = vmatpush1.bf16.msra.mxu1 %v14554_v26  ;;  %10981 = vmatprep.subr.bf16.mxu0 %v14559_v36  ;;  %v14634_v26 = vld [vmem:[#allocation8 + $0x92c] ss:$16 sps:$4 sm:$0xff]   ;;  %v14629_v36 = vld [vmem:[#allocation8 + $0x920] ss:$16 sps:$4 sm:$0xff]  }
 0x3f6   :  { %11473 = vmatprep.subr.bf16.mxu1 %v14562_v44  ;;  %v14632_v44 = vld [vmem:[#allocation8 + $0x928] ss:$16 sps:$4 sm:$0xff]  }
 0x3f8   :  { %10982 = vmatpush1.bf16.msra.mxu0 %v14557_v2  ;;  %v14637_v2 = vld [vmem:[#allocation8 + $0x944] ss:$16 sps:$4 sm:$0xff]  }
 0x3f9   :  { %11474 = vmatpush1.bf16.msra.mxu1 %v14560_v41  ;;  %10983 = vmatprep.subr.bf16.mxu0 %v14565_v4  ;;  %v14640_v41 = vld [vmem:[#allocation8 + $0x94c] ss:$16 sps:$4 sm:$0xff]   ;;  %v14635_v4 = vld [vmem:[#allocation8 + $0x940] ss:$16 sps:$4 sm:$0xff]  }
 0x3fa   :  { %11475 = vmatprep.subr.bf16.mxu1 %v14568_v48  ;;  %v14638_v48 = vld [vmem:[#allocation8 + $0x948] ss:$16 sps:$4 sm:$0xff]  }
 0x3fc   :  { %10984 = vmatpush1.bf16.msra.mxu0 %v14563_v43  ;;  %v14643_v43 = vld [vmem:[#allocation8 + $0x964] ss:$16 sps:$4 sm:$0xff]  }
 0x3fd   :  { %11476 = vmatpush1.bf16.msra.mxu1 %v14566_v47  ;;  %10985 = vmatprep.subr.bf16.mxu0 %v14571_v39  ;;  %v14646_v47 = vld [vmem:[#allocation8 + $0x96c] ss:$16 sps:$4 sm:$0xff]   ;;  %v14641_v39 = vld [vmem:[#allocation8 + $0x960] ss:$16 sps:$4 sm:$0xff]  }
 0x3fe   :  { %11477 = vmatprep.subr.bf16.mxu1 %v14574_v14  ;;  %v14644_v14 = vld [vmem:[#allocation8 + $0x968] ss:$16 sps:$4 sm:$0xff]  }
 0x400   :  { %10986 = vmatpush1.bf16.msra.mxu0 %v14569_v38  ;;  %v14649_v38 = vld [vmem:[#allocation8 + $0x984] ss:$16 sps:$4 sm:$0xff]  }
 0x401   :  { %11478 = vmatpush1.bf16.msra.mxu1 %v14572_v34  ;;  %10996 = vmatprep.subr.bf16.mxu0 %v14577_v35  ;;  %v14652_v34 = vld [vmem:[#allocation8 + $0x98c] ss:$16 sps:$4 sm:$0xff]   ;;  %v14647_v35 = vld [vmem:[#allocation8 + $0x980] ss:$16 sps:$4 sm:$0xff]  }
 0x402   :  { %11488 = vmatprep.subr.bf16.mxu1 %v14580_v20  ;;  %v14650_v20 = vld [vmem:[#allocation8 + $0x988] ss:$16 sps:$4 sm:$0xff]  }
 0x403   :  { %10988 = vmatmul.mubr.bf16.vlgmr.msra.gmra.mrb[96].mxu0 %v6867_v27 }
 0x404   :  { %11480 = vmatmul.mubr.bf16.vlgmr.msra.gmra.mrb[96].mxu1 %v6867_v27  ;;  %10997 = vmatpush1.bf16.msra.mxu0 %v14575_v40  ;;  %v14658_v40 = vld [vmem:[#allocation8 + $0x9ac] ss:$16 sps:$4 sm:$0xff]   ;;  %v14653_v27 = vld [vmem:[#allocation8 + $0x9a0] ss:$16 sps:$4 sm:$0xff]  }
 0x405   :  { %11028 = vmatprep.mubr.bf16.mxu0 %v17133_v50  ;;  %11489 = vmatpush1.bf16.msra.mxu1 %v14578_v31  ;;  %v14656_v31 = vld [vmem:[#allocation8 + $0x9a8] ss:$16 sps:$4 sm:$0xff]  }
 0x406   :  { %11520 = vmatprep.mubr.bf16.mxu1 %v17133_v50  ;;  %10998 = vmatprep.subr.bf16.mxu0 %v14583_v0  ;;  %v14661_v0 = vld [vmem:[#allocation8 + $0x9c4] ss:$16 sps:$4 sm:$0xff]  }
 0x407   :  { %11490 = vmatprep.subr.bf16.mxu1 %v14586_v22  ;;  %v14664_v22 = vld [vmem:[#allocation8 + $0x9cc] ss:$16 sps:$4 sm:$0xff]  }
 0x408   :  { %10999 = vmatpush1.bf16.msra.mxu0 %v14581_v24  ;;  %v14659_v24 = vld [vmem:[#allocation8 + $0x9c0] ss:$16 sps:$4 sm:$0xff]  }
 0x409   :  { %11491 = vmatpush1.bf16.msra.mxu1 %v14584_v11  ;;  %11000 = vmatprep.subr.bf16.mxu0 %v14589_v33  ;;  %v14662_v11 = vld [vmem:[#allocation8 + $0x9c8] ss:$16 sps:$4 sm:$0xff]   ;;  %v14667_v33 = vld [vmem:[#allocation8 + $0x9e4] ss:$16 sps:$4 sm:$0xff]  }
 0x40a   :  { %11492 = vmatprep.subr.bf16.mxu1 %v14592_v59  ;;  %v14670_v59 = vld [vmem:[#allocation8 + $0x9ec] ss:$16 sps:$4 sm:$0xff]  }
 0x40c   :  { %11001 = vmatpush1.bf16.msra.mxu0 %v14587_v5  ;;  %v14665_v5 = vld [vmem:[#allocation8 + $0x9e0] ss:$16 sps:$4 sm:$0xff]  }
 0x40d   :  { %11493 = vmatpush1.bf16.msra.mxu1 %v14590_v12  ;;  %11002 = vmatprep.subr.bf16.mxu0 %v14595_v9  ;;  %v14668_v12 = vld [vmem:[#allocation8 + $0x9e8] ss:$16 sps:$4 sm:$0xff]   ;;  %v14673_v9 = vld [vmem:[#allocation8 + $0xa04] ss:$16 sps:$4 sm:$0xff]  }
 0x40e   :  { %11494 = vmatprep.subr.bf16.mxu1 %v14598_v15  ;;  %v14676_v15 = vld [vmem:[#allocation8 + $0xa0c] ss:$16 sps:$4 sm:$0xff]  }
 0x410   :  { %11003 = vmatpush1.bf16.msra.mxu0 %v14593_v60  ;;  %v14671_v60 = vld [vmem:[#allocation8 + $0xa00] ss:$16 sps:$4 sm:$0xff]  }
 0x411   :  { %11495 = vmatpush1.bf16.msra.mxu1 %v14596_v52  ;;  %11004 = vmatprep.subr.bf16.mxu0 %v14601_v32  ;;  %v14674_v52 = vld [vmem:[#allocation8 + $0xa08] ss:$16 sps:$4 sm:$0xff]   ;;  %v14679_v32 = vld [vmem:[#allocation8 + $0xa24] ss:$16 sps:$4 sm:$0xff]  }
 0x412   :  { %11496 = vmatprep.subr.bf16.mxu1 %v14604_v63  ;;  %v6917_v63 = vcombine.high %v17133_v50, %v17133_v50  ;;  %v14694_v50 = vld [vmem:[#allocation8 + $0xa6c] ss:$16 sps:$4 sm:$0xff]  }
 0x414   :  { %11005 = vmatpush1.bf16.msra.mxu0 %v14599_v1  ;;  %v14682_v1 = vld [vmem:[#allocation8 + $0xa2c] ss:$16 sps:$4 sm:$0xff]  }
 0x415   :  { %11497 = vmatpush1.bf16.msra.mxu1 %v14602_v53  ;;  %11006 = vmatprep.subr.bf16.mxu0 %v14607_v19  ;;  %v14677_v53 = vld [vmem:[#allocation8 + $0xa20] ss:$16 sps:$4 sm:$0xff]   ;;  %v14680_v19 = vld [vmem:[#allocation8 + $0xa28] ss:$16 sps:$4 sm:$0xff]  }
 0x416   :  { %11498 = vmatprep.subr.bf16.mxu1 %v14610_v23  ;;  %v14685_v23 = vld [vmem:[#allocation8 + $0xa44] ss:$16 sps:$4 sm:$0xff]  }
 0x418   :  { %11007 = vmatpush1.bf16.msra.mxu0 %v14605_v18  ;;  %v14688_v18 = vld [vmem:[#allocation8 + $0xa4c] ss:$16 sps:$4 sm:$0xff]  }
 0x419   :  { %11499 = vmatpush1.bf16.msra.mxu1 %v14608_v58  ;;  %11008 = vmatprep.subr.bf16.mxu0 %v14613_v28  ;;  %v14683_v58 = vld [vmem:[#allocation8 + $0xa40] ss:$16 sps:$4 sm:$0xff]   ;;  %v14686_v28 = vld [vmem:[#allocation8 + $0xa48] ss:$16 sps:$4 sm:$0xff]  }
 0x41a   :  { %11500 = vmatprep.subr.bf16.mxu1 %v14616_v54  ;;  %v14691_v54 = vld [vmem:[#allocation8 + $0xa64] ss:$16 sps:$4 sm:$0xff]  }
 0x41c   :  { %11009 = vmatpush1.bf16.msra.mxu0 %v14611_v13  ;;  %v14689_v13 = vld [vmem:[#allocation8 + $0xa60] ss:$16 sps:$4 sm:$0xff]  }
 0x41d   :  { %11501 = vmatpush1.bf16.msra.mxu1 %v14614_v16  ;;  %11010 = vmatprep.subr.bf16.mxu0 %v14619_v37  ;;  %v14692_v16 = vld [vmem:[#allocation8 + $0xa68] ss:$16 sps:$4 sm:$0xff]   ;;  %v14697_v37 = vld [vmem:[#allocation8 + $0xa84] ss:$16 sps:$4 sm:$0xff]  }
 0x41e   :  { %11502 = vmatprep.subr.bf16.mxu1 %v14622_v3  ;;  %v14700_v3 = vld [vmem:[#allocation8 + $0xa8c] ss:$16 sps:$4 sm:$0xff]  }
 0x420   :  { %11011 = vmatpush1.bf16.msra.mxu0 %v14617_v49  ;;  %v14695_v49 = vld [vmem:[#allocation8 + $0xa80] ss:$16 sps:$4 sm:$0xff]  }
 0x421   :  { %11503 = vmatpush1.bf16.msra.mxu1 %v14620_v7  ;;  %11012 = vmatprep.subr.bf16.mxu0 %v14625_v55  ;;  %v14698_v7 = vld [vmem:[#allocation8 + $0xa88] ss:$16 sps:$4 sm:$0xff]   ;;  %v14703_v55 = vld [vmem:[#allocation8 + $0xaa4] ss:$16 sps:$4 sm:$0xff]  }
 0x422   :  { %11504 = vmatprep.subr.bf16.mxu1 %v14628_v8  ;;  %v14706_v8 = vld [vmem:[#allocation8 + $0xaac] ss:$16 sps:$4 sm:$0xff]  }
 0x424   :  { %11013 = vmatpush1.bf16.msra.mxu0 %v14623_v45  ;;  %v14701_v45 = vld [vmem:[#allocation8 + $0xaa0] ss:$16 sps:$4 sm:$0xff]  }
 0x425   :  { %11505 = vmatpush1.bf16.msra.mxu1 %v14626_v57  ;;  %11014 = vmatprep.subr.bf16.mxu0 %v14631_v17  ;;  %v14704_v57 = vld [vmem:[#allocation8 + $0xaa8] ss:$16 sps:$4 sm:$0xff]   ;;  %v14709_v17 = vld [vmem:[#allocation8 + $0xac4] ss:$16 sps:$4 sm:$0xff]  }
 0x426   :  { %11506 = vmatprep.subr.bf16.mxu1 %v14634_v26  ;;  %v14712_v26 = vld [vmem:[#allocation8 + $0xacc] ss:$16 sps:$4 sm:$0xff]  }
 0x428   :  { %11015 = vmatpush1.bf16.msra.mxu0 %v14629_v36  ;;  %v14707_v36 = vld [vmem:[#allocation8 + $0xac0] ss:$16 sps:$4 sm:$0xff]  }
 0x429   :  { %11507 = vmatpush1.bf16.msra.mxu1 %v14632_v44  ;;  %11016 = vmatprep.subr.bf16.mxu0 %v14637_v2  ;;  %v14710_v44 = vld [vmem:[#allocation8 + $0xac8] ss:$16 sps:$4 sm:$0xff]   ;;  %v14715_v2 = vld [vmem:[#allocation8 + $0xae4] ss:$16 sps:$4 sm:$0xff]  }
 0x42a   :  { %11508 = vmatprep.subr.bf16.mxu1 %v14640_v41  ;;  %v14718_v41 = vld [vmem:[#allocation8 + $0xaec] ss:$16 sps:$4 sm:$0xff]  }
 0x42c   :  { %11017 = vmatpush1.bf16.msra.mxu0 %v14635_v4  ;;  %v14713_v4 = vld [vmem:[#allocation8 + $0xae0] ss:$16 sps:$4 sm:$0xff]  }
 0x42d   :  { %11509 = vmatpush1.bf16.msra.mxu1 %v14638_v48  ;;  %11018 = vmatprep.subr.bf16.mxu0 %v14643_v43  ;;  %v14716_v48 = vld [vmem:[#allocation8 + $0xae8] ss:$16 sps:$4 sm:$0xff]   ;;  %v14721_v43 = vld [vmem:[#allocation8 + $0xb04] ss:$16 sps:$4 sm:$0xff]  }
 0x42e   :  { %11510 = vmatprep.subr.bf16.mxu1 %v14646_v47  ;;  %v14724_v47 = vld [vmem:[#allocation8 + $0xb0c] ss:$16 sps:$4 sm:$0xff]  }
 0x430   :  { %11019 = vmatpush1.bf16.msra.mxu0 %v14641_v39  ;;  %v14719_v39 = vld [vmem:[#allocation8 + $0xb00] ss:$16 sps:$4 sm:$0xff]  }
 0x431   :  { %11511 = vmatpush1.bf16.msra.mxu1 %v14644_v14  ;;  %11020 = vmatprep.subr.bf16.mxu0 %v14649_v38  ;;  %v14722_v14 = vld [vmem:[#allocation8 + $0xb08] ss:$16 sps:$4 sm:$0xff]   ;;  %v14727_v38 = vld [vmem:[#allocation8 + $0xb24] ss:$16 sps:$4 sm:$0xff]  }
 0x432   :  { %11512 = vmatprep.subr.bf16.mxu1 %v14652_v34  ;;  %v14730_v34 = vld [vmem:[#allocation8 + $0xb2c] ss:$16 sps:$4 sm:$0xff]  }
 0x434   :  { %11021 = vmatpush1.bf16.msra.mxu0 %v14647_v35  ;;  %v14725_v35 = vld [vmem:[#allocation8 + $0xb20] ss:$16 sps:$4 sm:$0xff]  }
 0x435   :  { %11513 = vmatpush1.bf16.msra.mxu1 %v14650_v20  ;;  %11022 = vmatprep.subr.bf16.mxu0 %v14655_v42  ;;  %v14728_v20 = vld [vmem:[#allocation8 + $0xb28] ss:$16 sps:$4 sm:$0xff]   ;;  %v14733_v42 = vld [vmem:[#allocation8 + $0xb44] ss:$16 sps:$4 sm:$0xff]  }
 0x436   :  { %11514 = vmatprep.subr.bf16.mxu1 %v14658_v40  ;;  %v14736_v40 = vld [vmem:[#allocation8 + $0xb4c] ss:$16 sps:$4 sm:$0xff]  }
 0x438   :  { %11023 = vmatpush1.bf16.msra.mxu0 %v14653_v27  ;;  %v14731_v27 = vld [vmem:[#allocation8 + $0xb40] ss:$16 sps:$4 sm:$0xff]  }
 0x439   :  { %11515 = vmatpush1.bf16.msra.mxu1 %v14656_v31  ;;  %11024 = vmatprep.subr.bf16.mxu0 %v14661_v0  ;;  %v14734_v31 = vld [vmem:[#allocation8 + $0xb48] ss:$16 sps:$4 sm:$0xff]   ;;  %v14739_v0 = vld [vmem:[#allocation8 + $0xb64] ss:$16 sps:$4 sm:$0xff]  }
 0x43a   :  { %11516 = vmatprep.subr.bf16.mxu1 %v14664_v22  ;;  %v14742_v22 = vld [vmem:[#allocation8 + $0xb6c] ss:$16 sps:$4 sm:$0xff]  }
 0x43c   :  { %11025 = vmatpush1.bf16.msra.mxu0 %v14659_v24  ;;  %v14737_v24 = vld [vmem:[#allocation8 + $0xb60] ss:$16 sps:$4 sm:$0xff]  }
 0x43d   :  { %11517 = vmatpush1.bf16.msra.mxu1 %v14662_v11  ;;  %11026 = vmatprep.subr.bf16.mxu0 %v14667_v33  ;;  %v14740_v11 = vld [vmem:[#allocation8 + $0xb68] ss:$16 sps:$4 sm:$0xff]   ;;  %v14745_v33 = vld [vmem:[#allocation8 + $0xb84] ss:$16 sps:$4 sm:$0xff]  }
 0x43e   :  { %11518 = vmatprep.subr.bf16.mxu1 %v14670_v59  ;;  %v14748_v59 = vld [vmem:[#allocation8 + $0xb8c] ss:$16 sps:$4 sm:$0xff]  }
 0x440   :  { %11027 = vmatpush1.bf16.msra.mxu0 %v14665_v5  ;;  %v14743_v5 = vld [vmem:[#allocation8 + $0xb80] ss:$16 sps:$4 sm:$0xff]  }
 0x441   :  { %11519 = vmatpush1.bf16.msra.mxu1 %v14668_v12  ;;  %11037 = vmatprep.subr.bf16.mxu0 %v14673_v9  ;;  %v14746_v12 = vld [vmem:[#allocation8 + $0xb88] ss:$16 sps:$4 sm:$0xff]   ;;  %v14751_v9 = vld [vmem:[#allocation8 + $0xba4] ss:$16 sps:$4 sm:$0xff]  }
 0x442   :  { %11529 = vmatprep.subr.bf16.mxu1 %v14676_v15  ;;  %v14754_v15 = vld [vmem:[#allocation8 + $0xbac] ss:$16 sps:$4 sm:$0xff]  }
 0x443   :  { %11029 = vmatmul.mubr.bf16.vlgmr.msra.gmra.mrb[96].mxu0 %v17097_v25 }
 0x444   :  { %11521 = vmatmul.mubr.bf16.vlgmr.msra.gmra.mrb[96].mxu1 %v17097_v25  ;;  %11038 = vmatpush1.bf16.msra.mxu0 %v14671_v60  ;;  %v14749_v60 = vld [vmem:[#allocation8 + $0xba0] ss:$16 sps:$4 sm:$0xff]  }
 0x445   :  { %11069 = vmatprep.mubr.bf16.mxu0 %v6917_v63  ;;  %11530 = vmatpush1.bf16.msra.mxu1 %v14674_v52  ;;  %v14752_v52 = vld [vmem:[#allocation8 + $0xba8] ss:$16 sps:$4 sm:$0xff]  }
 0x446   :  { %11561 = vmatprep.mubr.bf16.mxu1 %v6917_v63  ;;  %11039 = vmatprep.subr.bf16.mxu0 %v14679_v32  ;;  %v14757_v32 = vld [vmem:[#allocation8 + $0xbc4] ss:$16 sps:$4 sm:$0xff]   ;;  %v14760_v63 = vld [vmem:[#allocation8 + $0xbcc] ss:$16 sps:$4 sm:$0xff]  }
 0x447   :  { %11531 = vmatprep.subr.bf16.mxu1 %v14682_v1  ;;  %v14755_v1 = vld [vmem:[#allocation8 + $0xbc0] ss:$16 sps:$4 sm:$0xff]  }
 0x448   :  { %11040 = vmatpush1.bf16.msra.mxu0 %v14677_v53  ;;  %v14758_v53 = vld [vmem:[#allocation8 + $0xbc8] ss:$16 sps:$4 sm:$0xff]  }
 0x449   :  { %11532 = vmatpush1.bf16.msra.mxu1 %v14680_v19  ;;  %11041 = vmatprep.subr.bf16.mxu0 %v14685_v23  ;;  %v14763_v19 = vld [vmem:[#allocation8 + $0xbe4] ss:$16 sps:$4 sm:$0xff]   ;;  %v14766_v23 = vld [vmem:[#allocation8 + $0xbec] ss:$16 sps:$4 sm:$0xff]  }
 0x44a   :  { %11533 = vmatprep.subr.bf16.mxu1 %v14688_v18  ;;  %v14761_v18 = vld [vmem:[#allocation8 + $0xbe0] ss:$16 sps:$4 sm:$0xff]  }
 0x44c   :  { %11042 = vmatpush1.bf16.msra.mxu0 %v14683_v58  ;;  %v14764_v58 = vld [vmem:[#allocation8 + $0xbe8] ss:$16 sps:$4 sm:$0xff]  }
 0x44d   :  { %11534 = vmatpush1.bf16.msra.mxu1 %v14686_v28  ;;  %11043 = vmatprep.subr.bf16.mxu0 %v14691_v54  ;;  %v14769_v28 = vld [vmem:[#allocation8 + $0xc04] ss:$16 sps:$4 sm:$0xff]   ;;  %v14772_v54 = vld [vmem:[#allocation8 + $0xc0c] ss:$16 sps:$4 sm:$0xff]  }
 0x44e   :  { %11535 = vmatprep.subr.bf16.mxu1 %v14694_v50  ;;  %v14767_v50 = vld [vmem:[#allocation8 + $0xc00] ss:$16 sps:$4 sm:$0xff]  }
 0x450   :  { %11044 = vmatpush1.bf16.msra.mxu0 %v14689_v13  ;;  %v6915_v13 = vcombine.high %v17097_v25, %v17097_v25  ;;  %v14780_v25 = vld [vmem:[#allocation8 + $0xc40] ss:$16 sps:$4 sm:$0xff]  }
 0x451   :  { %11536 = vmatpush1.bf16.msra.mxu1 %v14692_v16  ;;  %11045 = vmatprep.subr.bf16.mxu0 %v14697_v37  ;;  %v14770_v16 = vld [vmem:[#allocation8 + $0xc08] ss:$16 sps:$4 sm:$0xff]   ;;  %v14776_v37 = vld [vmem:[#allocation8 + $0xc24] ss:$16 sps:$4 sm:$0xff]  }
 0x452   :  { %11537 = vmatprep.subr.bf16.mxu1 %v14700_v3  ;;  %v14779_v3 = vld [vmem:[#allocation8 + $0xc2c] ss:$16 sps:$4 sm:$0xff]  }
 0x454   :  { %11046 = vmatpush1.bf16.msra.mxu0 %v14695_v49  ;;  %v14774_v49 = vld [vmem:[#allocation8 + $0xc20] ss:$16 sps:$4 sm:$0xff]  }
 0x455   :  { %11538 = vmatpush1.bf16.msra.mxu1 %v14698_v7  ;;  %11047 = vmatprep.subr.bf16.mxu0 %v14703_v55  ;;  %v14777_v7 = vld [vmem:[#allocation8 + $0xc28] ss:$16 sps:$4 sm:$0xff]   ;;  %v14782_v55 = vld [vmem:[#allocation8 + $0xc44] ss:$16 sps:$4 sm:$0xff]  }
 0x456   :  { %11539 = vmatprep.subr.bf16.mxu1 %v14706_v8  ;;  %v14785_v8 = vld [vmem:[#allocation8 + $0xc4c] ss:$16 sps:$4 sm:$0xff]  }
 0x458   :  { %11048 = vmatpush1.bf16.msra.mxu0 %v14701_v45  ;;  %v14783_v45 = vld [vmem:[#allocation8 + $0xc48] ss:$16 sps:$4 sm:$0xff]  }
 0x459   :  { %11540 = vmatpush1.bf16.msra.mxu1 %v14704_v57  ;;  %11049 = vmatprep.subr.bf16.mxu0 %v14709_v17  ;;  %v14788_v57 = vld [vmem:[#allocation8 + $0xc64] ss:$16 sps:$4 sm:$0xff]   ;;  %v14791_v17 = vld [vmem:[#allocation8 + $0xc6c] ss:$16 sps:$4 sm:$0xff]  }
 0x45a   :  { %11541 = vmatprep.subr.bf16.mxu1 %v14712_v26  ;;  %v14786_v26 = vld [vmem:[#allocation8 + $0xc60] ss:$16 sps:$4 sm:$0xff]  }
 0x45c   :  { %11050 = vmatpush1.bf16.msra.mxu0 %v14707_v36  ;;  %v14789_v36 = vld [vmem:[#allocation8 + $0xc68] ss:$16 sps:$4 sm:$0xff]  }
 0x45d   :  { %11542 = vmatpush1.bf16.msra.mxu1 %v14710_v44  ;;  %11051 = vmatprep.subr.bf16.mxu0 %v14715_v2  ;;  %v14794_v44 = vld [vmem:[#allocation8 + $0xc84] ss:$16 sps:$4 sm:$0xff]   ;;  %v14797_v2 = vld [vmem:[#allocation8 + $0xc8c] ss:$16 sps:$4 sm:$0xff]  }
 0x45e   :  { %11543 = vmatprep.subr.bf16.mxu1 %v14718_v41  ;;  %v14792_v41 = vld [vmem:[#allocation8 + $0xc80] ss:$16 sps:$4 sm:$0xff]  }
 0x460   :  { %11052 = vmatpush1.bf16.msra.mxu0 %v14713_v4  ;;  %v14795_v4 = vld [vmem:[#allocation8 + $0xc88] ss:$16 sps:$4 sm:$0xff]  }
 0x461   :  { %11544 = vmatpush1.bf16.msra.mxu1 %v14716_v48  ;;  %11053 = vmatprep.subr.bf16.mxu0 %v14721_v43  ;;  %v14800_v48 = vld [vmem:[#allocation8 + $0xca4] ss:$16 sps:$4 sm:$0xff]   ;;  %v14803_v43 = vld [vmem:[#allocation8 + $0xcac] ss:$16 sps:$4 sm:$0xff]  }
 0x462   :  { %11545 = vmatprep.subr.bf16.mxu1 %v14724_v47  ;;  %v14798_v47 = vld [vmem:[#allocation8 + $0xca0] ss:$16 sps:$4 sm:$0xff]  }
 0x464   :  { %11054 = vmatpush1.bf16.msra.mxu0 %v14719_v39  ;;  %v14801_v39 = vld [vmem:[#allocation8 + $0xca8] ss:$16 sps:$4 sm:$0xff]  }
 0x465   :  { %11546 = vmatpush1.bf16.msra.mxu1 %v14722_v14  ;;  %11055 = vmatprep.subr.bf16.mxu0 %v14727_v38  ;;  %v14806_v14 = vld [vmem:[#allocation8 + $0xcc4] ss:$16 sps:$4 sm:$0xff]   ;;  %v14809_v38 = vld [vmem:[#allocation8 + $0xccc] ss:$16 sps:$4 sm:$0xff]  }
 0x466   :  { %11547 = vmatprep.subr.bf16.mxu1 %v14730_v34  ;;  %v14804_v34 = vld [vmem:[#allocation8 + $0xcc0] ss:$16 sps:$4 sm:$0xff]  }
 0x468   :  { %11056 = vmatpush1.bf16.msra.mxu0 %v14725_v35  ;;  %v14807_v35 = vld [vmem:[#allocation8 + $0xcc8] ss:$16 sps:$4 sm:$0xff]  }
 0x469   :  { %11548 = vmatpush1.bf16.msra.mxu1 %v14728_v20  ;;  %11057 = vmatprep.subr.bf16.mxu0 %v14733_v42  ;;  %v14812_v20 = vld [vmem:[#allocation8 + $0xce4] ss:$16 sps:$4 sm:$0xff]   ;;  %v14815_v42 = vld [vmem:[#allocation8 + $0xcec] ss:$16 sps:$4 sm:$0xff]  }
 0x46a   :  { %11549 = vmatprep.subr.bf16.mxu1 %v14736_v40  ;;  %v14810_v40 = vld [vmem:[#allocation8 + $0xce0] ss:$16 sps:$4 sm:$0xff]  }
 0x46c   :  { %11058 = vmatpush1.bf16.msra.mxu0 %v14731_v27  ;;  %v14813_v27 = vld [vmem:[#allocation8 + $0xce8] ss:$16 sps:$4 sm:$0xff]  }
 0x46d   :  { %11550 = vmatpush1.bf16.msra.mxu1 %v14734_v31  ;;  %11059 = vmatprep.subr.bf16.mxu0 %v14739_v0  ;;  %v14818_v31 = vld [vmem:[#allocation8 + $0xd04] ss:$16 sps:$4 sm:$0xff]   ;;  %v14821_v0 = vld [vmem:[#allocation8 + $0xd0c] ss:$16 sps:$4 sm:$0xff]  }
 0x46e   :  { %11551 = vmatprep.subr.bf16.mxu1 %v14742_v22  ;;  %v14816_v22 = vld [vmem:[#allocation8 + $0xd00] ss:$16 sps:$4 sm:$0xff]  }
 0x470   :  { %11060 = vmatpush1.bf16.msra.mxu0 %v14737_v24  ;;  %v14819_v24 = vld [vmem:[#allocation8 + $0xd08] ss:$16 sps:$4 sm:$0xff]  }
 0x471   :  { %11552 = vmatpush1.bf16.msra.mxu1 %v14740_v11  ;;  %11061 = vmatprep.subr.bf16.mxu0 %v14745_v33  ;;  %v14824_v11 = vld [vmem:[#allocation8 + $0xd24] ss:$16 sps:$4 sm:$0xff]   ;;  %v14827_v33 = vld [vmem:[#allocation8 + $0xd2c] ss:$16 sps:$4 sm:$0xff]  }
 0x472   :  { %11553 = vmatprep.subr.bf16.mxu1 %v14748_v59  ;;  %v14822_v59 = vld [vmem:[#allocation8 + $0xd20] ss:$16 sps:$4 sm:$0xff]  }
 0x474   :  { %11062 = vmatpush1.bf16.msra.mxu0 %v14743_v5  ;;  %v14825_v5 = vld [vmem:[#allocation8 + $0xd28] ss:$16 sps:$4 sm:$0xff]  }
 0x475   :  { %11554 = vmatpush1.bf16.msra.mxu1 %v14746_v12  ;;  %11063 = vmatprep.subr.bf16.mxu0 %v14751_v9  ;;  %v14830_v12 = vld [vmem:[#allocation8 + $0xd44] ss:$16 sps:$4 sm:$0xff]   ;;  %v14833_v9 = vld [vmem:[#allocation8 + $0xd4c] ss:$16 sps:$4 sm:$0xff]  }
 0x476   :  { %11555 = vmatprep.subr.bf16.mxu1 %v14754_v15  ;;  %v14828_v15 = vld [vmem:[#allocation8 + $0xd40] ss:$16 sps:$4 sm:$0xff]  }
 0x478   :  { %11064 = vmatpush1.bf16.msra.mxu0 %v14749_v60  ;;  %v14831_v60 = vld [vmem:[#allocation8 + $0xd48] ss:$16 sps:$4 sm:$0xff]  }
 0x479   :  { %11556 = vmatpush1.bf16.msra.mxu1 %v14752_v52  ;;  %11065 = vmatprep.subr.bf16.mxu0 %v14757_v32  ;;  %v14836_v52 = vld [vmem:[#allocation8 + $0xd64] ss:$16 sps:$4 sm:$0xff]   ;;  %v14839_v32 = vld [vmem:[#allocation8 + $0xd6c] ss:$16 sps:$4 sm:$0xff]  }
 0x47a   :  { %11557 = vmatprep.subr.bf16.mxu1 %v14760_v63  ;;  %v14834_v63 = vld [vmem:[#allocation8 + $0xd60] ss:$16 sps:$4 sm:$0xff]  }
 0x47c   :  { %11066 = vmatpush1.bf16.msra.mxu0 %v14755_v1  ;;  %v14837_v1 = vld [vmem:[#allocation8 + $0xd68] ss:$16 sps:$4 sm:$0xff]  }
 0x47d   :  { %11558 = vmatpush1.bf16.msra.mxu1 %v14758_v53  ;;  %11067 = vmatprep.subr.bf16.mxu0 %v14763_v19  ;;  %v14842_v53 = vld [vmem:[#allocation8 + $0xd84] ss:$16 sps:$4 sm:$0xff]   ;;  %v14845_v19 = vld [vmem:[#allocation8 + $0xd8c] ss:$16 sps:$4 sm:$0xff]  }
 0x47e   :  { %11559 = vmatprep.subr.bf16.mxu1 %v14766_v23  ;;  %v14840_v23 = vld [vmem:[#allocation8 + $0xd80] ss:$16 sps:$4 sm:$0xff]  }
 0x480   :  { %11068 = vmatpush1.bf16.msra.mxu0 %v14761_v18  ;;  %v14843_v18 = vld [vmem:[#allocation8 + $0xd88] ss:$16 sps:$4 sm:$0xff]  }
 0x481   :  { %11560 = vmatpush1.bf16.msra.mxu1 %v14764_v58  ;;  %11078 = vmatprep.subr.bf16.mxu0 %v14769_v28  ;;  %v14848_v58 = vld [vmem:[#allocation8 + $0xda4] ss:$16 sps:$4 sm:$0xff]   ;;  %v14851_v28 = vld [vmem:[#allocation8 + $0xdac] ss:$16 sps:$4 sm:$0xff]  }
 0x482   :  { %11570 = vmatprep.subr.bf16.mxu1 %v14772_v54  ;;  %v14846_v54 = vld [vmem:[#allocation8 + $0xda0] ss:$16 sps:$4 sm:$0xff]  }
 0x483   :  { %11070 = vmatmul.mubr.bf16.vlgmr.msra.gmra.mrb[96].mxu0 %v6915_v13 }
 0x484   :  { %11562 = vmatmul.mubr.bf16.vlgmr.msra.gmra.mrb[96].mxu1 %v6915_v13  ;;  %11079 = vmatpush1.bf16.msra.mxu0 %v14767_v50  ;;  %v14849_v50 = vld [vmem:[#allocation8 + $0xda8] ss:$16 sps:$4 sm:$0xff]   ;;  %v14854_v13 = vld [vmem:[#allocation8 + $0xdc4] ss:$16 sps:$4 sm:$0xff]  }
 0x485   :  { %11110 = vmatprep.mubr.bf16.mxu0 %v17104_v62  ;;  %11571 = vmatpush1.bf16.msra.mxu1 %v14770_v16  ;;  %v14857_v16 = vld [vmem:[#allocation8 + $0xdcc] ss:$16 sps:$4 sm:$0xff]  }
 0x486   :  { %11602 = vmatprep.mubr.bf16.mxu1 %v17104_v62  ;;  %11080 = vmatprep.subr.bf16.mxu0 %v14776_v37  ;;  %v14852_v37 = vld [vmem:[#allocation8 + $0xdc0] ss:$16 sps:$4 sm:$0xff]  }
 0x487   :  { %11572 = vmatprep.subr.bf16.mxu1 %v14779_v3  ;;  %v14855_v3 = vld [vmem:[#allocation8 + $0xdc8] ss:$16 sps:$4 sm:$0xff]  }
 0x488   :  { %11081 = vmatpush1.bf16.msra.mxu0 %v14774_v49  ;;  %v14860_v49 = vld [vmem:[#allocation8 + $0xde4] ss:$16 sps:$4 sm:$0xff]  }
 0x489   :  { %11573 = vmatpush1.bf16.msra.mxu1 %v14777_v7  ;;  %11082 = vmatprep.subr.bf16.mxu0 %v14782_v55  ;;  %v14863_v7 = vld [vmem:[#allocation8 + $0xdec] ss:$16 sps:$4 sm:$0xff]   ;;  %v14858_v55 = vld [vmem:[#allocation8 + $0xde0] ss:$16 sps:$4 sm:$0xff]  }
 0x48a   :  { %11574 = vmatprep.subr.bf16.mxu1 %v14785_v8  ;;  %v14861_v8 = vld [vmem:[#allocation8 + $0xde8] ss:$16 sps:$4 sm:$0xff]  }
 0x48c   :  { %11083 = vmatpush1.bf16.msra.mxu0 %v14780_v25  ;;  %v14866_v25 = vld [vmem:[#allocation8 + $0xe04] ss:$16 sps:$4 sm:$0xff]  }
 0x48d   :  { %11575 = vmatpush1.bf16.msra.mxu1 %v14783_v45  ;;  %11084 = vmatprep.subr.bf16.mxu0 %v14788_v57  ;;  %v14869_v45 = vld [vmem:[#allocation8 + $0xe0c] ss:$16 sps:$4 sm:$0xff]   ;;  %v14864_v57 = vld [vmem:[#allocation8 + $0xe00] ss:$16 sps:$4 sm:$0xff]  }
 0x48e   :  { %11576 = vmatprep.subr.bf16.mxu1 %v14791_v17  ;;  %v14867_v17 = vld [vmem:[#allocation8 + $0xe08] ss:$16 sps:$4 sm:$0xff]  }
 0x490   :  { %11085 = vmatpush1.bf16.msra.mxu0 %v14786_v26  ;;  %v14872_v26 = vld [vmem:[#allocation8 + $0xe24] ss:$16 sps:$4 sm:$0xff]  }
 0x491   :  { %11577 = vmatpush1.bf16.msra.mxu1 %v14789_v36  ;;  %11086 = vmatprep.subr.bf16.mxu0 %v14794_v44  ;;  %v6918_v36 = vcombine.high %v17104_v62, %v17104_v62  ;;  %v14875_v44 = vld [vmem:[#allocation8 + $0xe2c] ss:$16 sps:$4 sm:$0xff]  }
 0x492   :  { %11578 = vmatprep.subr.bf16.mxu1 %v14797_v2  ;;  %v14870_v2 = vld [vmem:[#allocation8 + $0xe20] ss:$16 sps:$4 sm:$0xff]   ;;  %v14887_v62 = vld [vmem:[#allocation8 + $0xe6c] ss:$16 sps:$4 sm:$0xff]  }
 0x494   :  { %11087 = vmatpush1.bf16.msra.mxu0 %v14792_v41  ;;  %v14873_v41 = vld [vmem:[#allocation8 + $0xe28] ss:$16 sps:$4 sm:$0xff]  }
 0x495   :  { %11579 = vmatpush1.bf16.msra.mxu1 %v14795_v4  ;;  %11088 = vmatprep.subr.bf16.mxu0 %v14800_v48  ;;  %v14878_v4 = vld [vmem:[#allocation8 + $0xe44] ss:$16 sps:$4 sm:$0xff]   ;;  %v14881_v48 = vld [vmem:[#allocation8 + $0xe4c] ss:$16 sps:$4 sm:$0xff]  }
 0x496   :  { %11580 = vmatprep.subr.bf16.mxu1 %v14803_v43  ;;  %v14876_v43 = vld [vmem:[#allocation8 + $0xe40] ss:$16 sps:$4 sm:$0xff]  }
 0x498   :  { %11089 = vmatpush1.bf16.msra.mxu0 %v14798_v47  ;;  %v14879_v47 = vld [vmem:[#allocation8 + $0xe48] ss:$16 sps:$4 sm:$0xff]  }
 0x499   :  { %11581 = vmatpush1.bf16.msra.mxu1 %v14801_v39  ;;  %11090 = vmatprep.subr.bf16.mxu0 %v14806_v14  ;;  %v14884_v39 = vld [vmem:[#allocation8 + $0xe64] ss:$16 sps:$4 sm:$0xff]   ;;  %v14882_v14 = vld [vmem:[#allocation8 + $0xe60] ss:$16 sps:$4 sm:$0xff]  }
 0x49a   :  { %11582 = vmatprep.subr.bf16.mxu1 %v14809_v38  ;;  %v14885_v38 = vld [vmem:[#allocation8 + $0xe68] ss:$16 sps:$4 sm:$0xff]  }
 0x49c   :  { %11091 = vmatpush1.bf16.msra.mxu0 %v14804_v34  ;;  %v14890_v34 = vld [vmem:[#allocation8 + $0xe84] ss:$16 sps:$4 sm:$0xff]  }
 0x49d   :  { %11583 = vmatpush1.bf16.msra.mxu1 %v14807_v35  ;;  %11092 = vmatprep.subr.bf16.mxu0 %v14812_v20  ;;  %v14893_v35 = vld [vmem:[#allocation8 + $0xe8c] ss:$16 sps:$4 sm:$0xff]   ;;  %v14888_v20 = vld [vmem:[#allocation8 + $0xe80] ss:$16 sps:$4 sm:$0xff]  }
 0x49e   :  { %11584 = vmatprep.subr.bf16.mxu1 %v14815_v42  ;;  %v14891_v42 = vld [vmem:[#allocation8 + $0xe88] ss:$16 sps:$4 sm:$0xff]  }
 0x4a0   :  { %11093 = vmatpush1.bf16.msra.mxu0 %v14810_v40  ;;  %v14896_v40 = vld [vmem:[#allocation8 + $0xea4] ss:$16 sps:$4 sm:$0xff]  }
 0x4a1   :  { %11585 = vmatpush1.bf16.msra.mxu1 %v14813_v27  ;;  %11094 = vmatprep.subr.bf16.mxu0 %v14818_v31  ;;  %v14899_v27 = vld [vmem:[#allocation8 + $0xeac] ss:$16 sps:$4 sm:$0xff]   ;;  %v14894_v31 = vld [vmem:[#allocation8 + $0xea0] ss:$16 sps:$4 sm:$0xff]  }
 0x4a2   :  { %11586 = vmatprep.subr.bf16.mxu1 %v14821_v0  ;;  %v14897_v0 = vld [vmem:[#allocation8 + $0xea8] ss:$16 sps:$4 sm:$0xff]  }
 0x4a4   :  { %11095 = vmatpush1.bf16.msra.mxu0 %v14816_v22  ;;  %v14902_v22 = vld [vmem:[#allocation8 + $0xec4] ss:$16 sps:$4 sm:$0xff]  }
 0x4a5   :  { %11587 = vmatpush1.bf16.msra.mxu1 %v14819_v24  ;;  %11096 = vmatprep.subr.bf16.mxu0 %v14824_v11  ;;  %v14905_v24 = vld [vmem:[#allocation8 + $0xecc] ss:$16 sps:$4 sm:$0xff]   ;;  %v14900_v11 = vld [vmem:[#allocation8 + $0xec0] ss:$16 sps:$4 sm:$0xff]  }
 0x4a6   :  { %11588 = vmatprep.subr.bf16.mxu1 %v14827_v33  ;;  %v14903_v33 = vld [vmem:[#allocation8 + $0xec8] ss:$16 sps:$4 sm:$0xff]  }
 0x4a8   :  { %11097 = vmatpush1.bf16.msra.mxu0 %v14822_v59  ;;  %v14908_v59 = vld [vmem:[#allocation8 + $0xee4] ss:$16 sps:$4 sm:$0xff]  }
 0x4a9   :  { %11589 = vmatpush1.bf16.msra.mxu1 %v14825_v5  ;;  %11098 = vmatprep.subr.bf16.mxu0 %v14830_v12  ;;  %v14911_v5 = vld [vmem:[#allocation8 + $0xeec] ss:$16 sps:$4 sm:$0xff]   ;;  %v14906_v12 = vld [vmem:[#allocation8 + $0xee0] ss:$16 sps:$4 sm:$0xff]  }
 0x4aa   :  { %11590 = vmatprep.subr.bf16.mxu1 %v14833_v9  ;;  %v14909_v9 = vld [vmem:[#allocation8 + $0xee8] ss:$16 sps:$4 sm:$0xff]  }
 0x4ac   :  { %11099 = vmatpush1.bf16.msra.mxu0 %v14828_v15  ;;  %v14914_v15 = vld [vmem:[#allocation8 + $0xf04] ss:$16 sps:$4 sm:$0xff]  }
 0x4ad   :  { %11591 = vmatpush1.bf16.msra.mxu1 %v14831_v60  ;;  %11100 = vmatprep.subr.bf16.mxu0 %v14836_v52  ;;  %v14917_v60 = vld [vmem:[#allocation8 + $0xf0c] ss:$16 sps:$4 sm:$0xff]   ;;  %v14912_v52 = vld [vmem:[#allocation8 + $0xf00] ss:$16 sps:$4 sm:$0xff]  }
 0x4ae   :  { %11592 = vmatprep.subr.bf16.mxu1 %v14839_v32  ;;  %v14915_v32 = vld [vmem:[#allocation8 + $0xf08] ss:$16 sps:$4 sm:$0xff]  }
 0x4b0   :  { %11101 = vmatpush1.bf16.msra.mxu0 %v14834_v63  ;;  %v14920_v63 = vld [vmem:[#allocation8 + $0xf24] ss:$16 sps:$4 sm:$0xff]  }
 0x4b1   :  { %11593 = vmatpush1.bf16.msra.mxu1 %v14837_v1  ;;  %11102 = vmatprep.subr.bf16.mxu0 %v14842_v53  ;;  %v14923_v1 = vld [vmem:[#allocation8 + $0xf2c] ss:$16 sps:$4 sm:$0xff]   ;;  %v14918_v53 = vld [vmem:[#allocation8 + $0xf20] ss:$16 sps:$4 sm:$0xff]  }
 0x4b2   :  { %11594 = vmatprep.subr.bf16.mxu1 %v14845_v19  ;;  %v14921_v19 = vld [vmem:[#allocation8 + $0xf28] ss:$16 sps:$4 sm:$0xff]  }
 0x4b4   :  { %11103 = vmatpush1.bf16.msra.mxu0 %v14840_v23  ;;  %v14926_v23 = vld [vmem:[#allocation8 + $0xf44] ss:$16 sps:$4 sm:$0xff]  }
 0x4b5   :  { %11595 = vmatpush1.bf16.msra.mxu1 %v14843_v18  ;;  %11104 = vmatprep.subr.bf16.mxu0 %v14848_v58  ;;  %v14929_v18 = vld [vmem:[#allocation8 + $0xf4c] ss:$16 sps:$4 sm:$0xff]   ;;  %v14924_v58 = vld [vmem:[#allocation8 + $0xf40] ss:$16 sps:$4 sm:$0xff]  }
 0x4b6   :  { %11596 = vmatprep.subr.bf16.mxu1 %v14851_v28  ;;  %v14927_v28 = vld [vmem:[#allocation8 + $0xf48] ss:$16 sps:$4 sm:$0xff]  }
 0x4b8   :  { %11105 = vmatpush1.bf16.msra.mxu0 %v14846_v54  ;;  %v14932_v54 = vld [vmem:[#allocation8 + $0xf64] ss:$16 sps:$4 sm:$0xff]  }
 0x4b9   :  { %11597 = vmatpush1.bf16.msra.mxu1 %v14849_v50  ;;  %11106 = vmatprep.subr.bf16.mxu0 %v14854_v13  ;;  %v14935_v50 = vld [vmem:[#allocation8 + $0xf6c] ss:$16 sps:$4 sm:$0xff]   ;;  %v14930_v13 = vld [vmem:[#allocation8 + $0xf60] ss:$16 sps:$4 sm:$0xff]  }
 0x4ba   :  { %11598 = vmatprep.subr.bf16.mxu1 %v14857_v16  ;;  %v14933_v16 = vld [vmem:[#allocation8 + $0xf68] ss:$16 sps:$4 sm:$0xff]  }
 0x4bc   :  { %11107 = vmatpush1.bf16.msra.mxu0 %v14852_v37  ;;  %v14938_v37 = vld [vmem:[#allocation8 + $0xf84] ss:$16 sps:$4 sm:$0xff]  }
 0x4bd   :  { %11599 = vmatpush1.bf16.msra.mxu1 %v14855_v3  ;;  %11108 = vmatprep.subr.bf16.mxu0 %v14860_v49  ;;  %v14941_v3 = vld [vmem:[#allocation8 + $0xf8c] ss:$16 sps:$4 sm:$0xff]   ;;  %v14936_v49 = vld [vmem:[#allocation8 + $0xf80] ss:$16 sps:$4 sm:$0xff]  }
 0x4be   :  { %11600 = vmatprep.subr.bf16.mxu1 %v14863_v7  ;;  %v14939_v7 = vld [vmem:[#allocation8 + $0xf88] ss:$16 sps:$4 sm:$0xff]  }
 0x4c0   :  { %11109 = vmatpush1.bf16.msra.mxu0 %v14858_v55  ;;  %v14944_v55 = vld [vmem:[#allocation8 + $0xfa4] ss:$16 sps:$4 sm:$0xff]  }
 0x4c1   :  { %11601 = vmatpush1.bf16.msra.mxu1 %v14861_v8  ;;  %11119 = vmatprep.subr.bf16.mxu0 %v14866_v25  ;;  %v14947_v8 = vld [vmem:[#allocation8 + $0xfac] ss:$16 sps:$4 sm:$0xff]   ;;  %v14942_v25 = vld [vmem:[#allocation8 + $0xfa0] ss:$16 sps:$4 sm:$0xff]  }
 0x4c2   :  { %11611 = vmatprep.subr.bf16.mxu1 %v14869_v45  ;;  %v14945_v45 = vld [vmem:[#allocation8 + $0xfa8] ss:$16 sps:$4 sm:$0xff]  }
 0x4c3   :  { %11111 = vmatmul.mubr.bf16.vlgmr.msra.gmra.mrb[96].mxu0 %v17101_v51 }
 0x4c4   :  { %11603 = vmatmul.mubr.bf16.vlgmr.msra.gmra.mrb[96].mxu1 %v17101_v51  ;;  %11120 = vmatpush1.bf16.msra.mxu0 %v14864_v57  ;;  %v14950_v57 = vld [vmem:[#allocation8 + $0xfc4] ss:$16 sps:$4 sm:$0xff]  }
 0x4c5   :  { %11151 = vmatprep.mubr.bf16.mxu0 %v6918_v36  ;;  %11612 = vmatpush1.bf16.msra.mxu1 %v14867_v17  ;;  %v14953_v17 = vld [vmem:[#allocation8 + $0xfcc] ss:$16 sps:$4 sm:$0xff]  }
 0x4c6   :  { %11643 = vmatprep.mubr.bf16.mxu1 %v6918_v36  ;;  %11121 = vmatprep.subr.bf16.mxu0 %v14872_v26  ;;  %v14948_v26 = vld [vmem:[#allocation8 + $0xfc0] ss:$16 sps:$4 sm:$0xff]   ;;  %v14951_v36 = vld [vmem:[#allocation8 + $0xfc8] ss:$16 sps:$4 sm:$0xff]  }
 0x4c7   :  { %11613 = vmatprep.subr.bf16.mxu1 %v14875_v44  ;;  %v14956_v44 = vld [vmem:[#allocation8 + $0xfe4] ss:$16 sps:$4 sm:$0xff]  }
 0x4c8   :  { %11122 = vmatpush1.bf16.msra.mxu0 %v14870_v2  ;;  %v14959_v2 = vld [vmem:[#allocation8 + $0xfec] ss:$16 sps:$4 sm:$0xff]  }
 0x4c9   :  { %11614 = vmatpush1.bf16.msra.mxu1 %v14873_v41  ;;  %11123 = vmatprep.subr.bf16.mxu0 %v14878_v4  ;;  %v14954_v41 = vld [vmem:[#allocation8 + $0xfe0] ss:$16 sps:$4 sm:$0xff]   ;;  %v14957_v4 = vld [vmem:[#allocation8 + $0xfe8] ss:$16 sps:$4 sm:$0xff]  }
 0x4ca   :  { %11615 = vmatprep.subr.bf16.mxu1 %v14881_v48  ;;  %v14962_v48 = vld [vmem:[#allocation8 + $0x1004] ss:$16 sps:$4 sm:$0xff]  }
 0x4cc   :  { %11124 = vmatpush1.bf16.msra.mxu0 %v14876_v43  ;;  %v14965_v43 = vld [vmem:[#allocation8 + $0x100c] ss:$16 sps:$4 sm:$0xff]  }
 0x4cd   :  { %11616 = vmatpush1.bf16.msra.mxu1 %v14879_v47  ;;  %11125 = vmatprep.subr.bf16.mxu0 %v14884_v39  ;;  %v6934_v47 = vcombine.high %v17107_v29, %v17107_v29  ;;  %v14960_v39 = vld [vmem:[#allocation8 + $0x1000] ss:$16 sps:$4 sm:$0xff]   ;;  %v14969_v29 = vld [vmem:[#allocation8 + $0x1028] ss:$16 sps:$4 sm:$0xff]  }
 0x4ce   :  { %11617 = vmatprep.subr.bf16.mxu1 %v14887_v62  ;;  %v6916_v62 = vcombine.high %v17101_v51, %v17101_v51  ;;  %v14977_v51 = vld [vmem:[#allocation8 + $0x104c] ss:$16 sps:$4 sm:$0xff]  }
 0x4d0   :  { %11126 = vmatpush1.bf16.msra.mxu0 %v14882_v14  ;;  %v14963_v14 = vld [vmem:[#allocation8 + $0x1008] ss:$16 sps:$4 sm:$0xff]  }
 0x4d1   :  { %11618 = vmatpush1.bf16.msra.mxu1 %v14885_v38  ;;  %11127 = vmatprep.subr.bf16.mxu0 %v14890_v34  ;;  %v14968_v38 = vld [vmem:[#allocation8 + $0x1024] ss:$16 sps:$4 sm:$0xff]   ;;  %v17154_v34 = vrot.slane %v6934_v47, %v16944_v30  ;;  %v14975_v30 = vld [vmem:[#allocation8 + $0x1048] ss:$16 sps:$4 sm:$0xff]   ;;  %v15049_v47 = vld [vmem:[#allocation8 + $0x11cc] ss:$16 sps:$4 sm:$0xff]  }
 0x4d2   :  { %11619 = vmatprep.subr.bf16.mxu1 %v14893_v35  ;;  %v14971_v35 = vld [vmem:[#allocation8 + $0x102c] ss:$16 sps:$4 sm:$0xff]  }
 0x4d4   :  { %11128 = vmatpush1.bf16.msra.mxu0 %v14888_v20  ;;  %v14966_v20 = vld [vmem:[#allocation8 + $0x1020] ss:$16 sps:$4 sm:$0xff]  }
 0x4d5   :  { %11620 = vmatpush1.bf16.msra.mxu1 %v14891_v42  ;;  %11129 = vmatprep.subr.bf16.mxu0 %v14896_v40  ;;  %v14974_v42 = vld [vmem:[#allocation8 + $0x1044] ss:$16 sps:$4 sm:$0xff]   ;;  %v14972_v40 = vld [vmem:[#allocation8 + $0x1040] ss:$16 sps:$4 sm:$0xff]  }
 0x4d6   :  { %11621 = vmatprep.subr.bf16.mxu1 %v14899_v27  ;;  %v14980_v27 = vld [vmem:[#allocation8 + $0x1064] ss:$16 sps:$4 sm:$0xff]  }
 0x4d8   :  { %11130 = vmatpush1.bf16.msra.mxu0 %v14894_v31  ;;  %v14983_v31 = vld [vmem:[#allocation8 + $0x106c] ss:$16 sps:$4 sm:$0xff]  }
 0x4d9   :  { %11622 = vmatpush1.bf16.msra.mxu1 %v14897_v0  ;;  %11131 = vmatprep.subr.bf16.mxu0 %v14902_v22  ;;  %v14978_v0 = vld [vmem:[#allocation8 + $0x1060] ss:$16 sps:$4 sm:$0xff]   ;;  %v14981_v22 = vld [vmem:[#allocation8 + $0x1068] ss:$16 sps:$4 sm:$0xff]  }
 0x4da   :  { %11623 = vmatprep.subr.bf16.mxu1 %v14905_v24  ;;  %v14986_v24 = vld [vmem:[#allocation8 + $0x1084] ss:$16 sps:$4 sm:$0xff]  }
 0x4dc   :  { %11132 = vmatpush1.bf16.msra.mxu0 %v14900_v11  ;;  %v14989_v11 = vld [vmem:[#allocation8 + $0x108c] ss:$16 sps:$4 sm:$0xff]  }
 0x4dd   :  { %11624 = vmatpush1.bf16.msra.mxu1 %v14903_v33  ;;  %11133 = vmatprep.subr.bf16.mxu0 %v14908_v59  ;;  %v14984_v33 = vld [vmem:[#allocation8 + $0x1080] ss:$16 sps:$4 sm:$0xff]   ;;  %v14987_v59 = vld [vmem:[#allocation8 + $0x1088] ss:$16 sps:$4 sm:$0xff]  }
 0x4de   :  { %11625 = vmatprep.subr.bf16.mxu1 %v14911_v5  ;;  %v14992_v5 = vld [vmem:[#allocation8 + $0x10a4] ss:$16 sps:$4 sm:$0xff]  }
 0x4e0   :  { %11134 = vmatpush1.bf16.msra.mxu0 %v14906_v12  ;;  %v14995_v12 = vld [vmem:[#allocation8 + $0x10ac] ss:$16 sps:$4 sm:$0xff]  }
 0x4e1   :  { %11626 = vmatpush1.bf16.msra.mxu1 %v14909_v9  ;;  %11135 = vmatprep.subr.bf16.mxu0 %v14914_v15  ;;  %v14990_v9 = vld [vmem:[#allocation8 + $0x10a0] ss:$16 sps:$4 sm:$0xff]   ;;  %v14993_v15 = vld [vmem:[#allocation8 + $0x10a8] ss:$16 sps:$4 sm:$0xff]  }
 0x4e2   :  { %11627 = vmatprep.subr.bf16.mxu1 %v14917_v60  ;;  %v14998_v60 = vld [vmem:[#allocation8 + $0x10c4] ss:$16 sps:$4 sm:$0xff]  }
 0x4e4   :  { %11136 = vmatpush1.bf16.msra.mxu0 %v14912_v52  ;;  %v15001_v52 = vld [vmem:[#allocation8 + $0x10cc] ss:$16 sps:$4 sm:$0xff]  }
 0x4e5   :  { %11628 = vmatpush1.bf16.msra.mxu1 %v14915_v32  ;;  %11137 = vmatprep.subr.bf16.mxu0 %v14920_v63  ;;  %v14996_v32 = vld [vmem:[#allocation8 + $0x10c0] ss:$16 sps:$4 sm:$0xff]   ;;  %v14999_v63 = vld [vmem:[#allocation8 + $0x10c8] ss:$16 sps:$4 sm:$0xff]  }
 0x4e6   :  { %11629 = vmatprep.subr.bf16.mxu1 %v14923_v1  ;;  %v15004_v1 = vld [vmem:[#allocation8 + $0x10e4] ss:$16 sps:$4 sm:$0xff]  }
 0x4e8   :  { %11138 = vmatpush1.bf16.msra.mxu0 %v14918_v53  ;;  %v15007_v53 = vld [vmem:[#allocation8 + $0x10ec] ss:$16 sps:$4 sm:$0xff]  }
 0x4e9   :  { %11630 = vmatpush1.bf16.msra.mxu1 %v14921_v19  ;;  %11139 = vmatprep.subr.bf16.mxu0 %v14926_v23  ;;  %v15002_v19 = vld [vmem:[#allocation8 + $0x10e0] ss:$16 sps:$4 sm:$0xff]   ;;  %v15005_v23 = vld [vmem:[#allocation8 + $0x10e8] ss:$16 sps:$4 sm:$0xff]  }
 0x4ea   :  { %11631 = vmatprep.subr.bf16.mxu1 %v14929_v18  ;;  %v15010_v18 = vld [vmem:[#allocation8 + $0x1104] ss:$16 sps:$4 sm:$0xff]  }
 0x4ec   :  { %11140 = vmatpush1.bf16.msra.mxu0 %v14924_v58  ;;  %v15013_v58 = vld [vmem:[#allocation8 + $0x110c] ss:$16 sps:$4 sm:$0xff]  }
 0x4ed   :  { %11632 = vmatpush1.bf16.msra.mxu1 %v14927_v28  ;;  %11141 = vmatprep.subr.bf16.mxu0 %v14932_v54  ;;  %v15008_v28 = vld [vmem:[#allocation8 + $0x1100] ss:$16 sps:$4 sm:$0xff]   ;;  %v15011_v54 = vld [vmem:[#allocation8 + $0x1108] ss:$16 sps:$4 sm:$0xff]  }
 0x4ee   :  { %11633 = vmatprep.subr.bf16.mxu1 %v14935_v50  ;;  %v15016_v50 = vld [vmem:[#allocation8 + $0x1124] ss:$16 sps:$4 sm:$0xff]  }
 0x4f0   :  { %11142 = vmatpush1.bf16.msra.mxu0 %v14930_v13  ;;  %v15019_v13 = vld [vmem:[#allocation8 + $0x112c] ss:$16 sps:$4 sm:$0xff]  }
 0x4f1   :  { %11634 = vmatpush1.bf16.msra.mxu1 %v14933_v16  ;;  %11143 = vmatprep.subr.bf16.mxu0 %v14938_v37  ;;  %v15014_v16 = vld [vmem:[#allocation8 + $0x1120] ss:$16 sps:$4 sm:$0xff]   ;;  %v15017_v37 = vld [vmem:[#allocation8 + $0x1128] ss:$16 sps:$4 sm:$0xff]  }
 0x4f2   :  { %11635 = vmatprep.subr.bf16.mxu1 %v14941_v3  ;;  %v15022_v3 = vld [vmem:[#allocation8 + $0x1144] ss:$16 sps:$4 sm:$0xff]  }
 0x4f4   :  { %11144 = vmatpush1.bf16.msra.mxu0 %v14936_v49  ;;  %v15025_v49 = vld [vmem:[#allocation8 + $0x114c] ss:$16 sps:$4 sm:$0xff]  }
 0x4f5   :  { %11636 = vmatpush1.bf16.msra.mxu1 %v14939_v7  ;;  %11145 = vmatprep.subr.bf16.mxu0 %v14944_v55  ;;  %v15020_v7 = vld [vmem:[#allocation8 + $0x1140] ss:$16 sps:$4 sm:$0xff]   ;;  %v15023_v55 = vld [vmem:[#allocation8 + $0x1148] ss:$16 sps:$4 sm:$0xff]  }
 0x4f6   :  { %11637 = vmatprep.subr.bf16.mxu1 %v14947_v8  ;;  %v15028_v8 = vld [vmem:[#allocation8 + $0x1164] ss:$16 sps:$4 sm:$0xff]  }
 0x4f8   :  { %11146 = vmatpush1.bf16.msra.mxu0 %v14942_v25  ;;  %v15031_v25 = vld [vmem:[#allocation8 + $0x116c] ss:$16 sps:$4 sm:$0xff]  }
 0x4f9   :  { %11638 = vmatpush1.bf16.msra.mxu1 %v14945_v45  ;;  %11147 = vmatprep.subr.bf16.mxu0 %v14950_v57  ;;  %v15026_v45 = vld [vmem:[#allocation8 + $0x1160] ss:$16 sps:$4 sm:$0xff]   ;;  %v15029_v57 = vld [vmem:[#allocation8 + $0x1168] ss:$16 sps:$4 sm:$0xff]  }
 0x4fa   :  { %11639 = vmatprep.subr.bf16.mxu1 %v14953_v17  ;;  %v15034_v17 = vld [vmem:[#allocation8 + $0x1184] ss:$16 sps:$4 sm:$0xff]  }
 0x4fc   :  { %11148 = vmatpush1.bf16.msra.mxu0 %v14948_v26  ;;  %v15037_v26 = vld [vmem:[#allocation8 + $0x118c] ss:$16 sps:$4 sm:$0xff]  }
 0x4fd   :  { %11640 = vmatpush1.bf16.msra.mxu1 %v14951_v36  ;;  %11149 = vmatprep.subr.bf16.mxu0 %v14956_v44  ;;  %v15032_v36 = vld [vmem:[#allocation8 + $0x1180] ss:$16 sps:$4 sm:$0xff]   ;;  %v15035_v44 = vld [vmem:[#allocation8 + $0x1188] ss:$16 sps:$4 sm:$0xff]  }
 0x4fe   :  { %11641 = vmatprep.subr.bf16.mxu1 %v14959_v2  ;;  %v15040_v2 = vld [vmem:[#allocation8 + $0x11a4] ss:$16 sps:$4 sm:$0xff]  }
 0x500   :  { %11150 = vmatpush1.bf16.msra.mxu0 %v14954_v41  ;;  %v15043_v41 = vld [vmem:[#allocation8 + $0x11ac] ss:$16 sps:$4 sm:$0xff]  }
 0x501   :  { %11642 = vmatpush1.bf16.msra.mxu1 %v14957_v4  ;;  %11160 = vmatprep.subr.bf16.mxu0 %v14962_v48  ;;  %v15038_v4 = vld [vmem:[#allocation8 + $0x11a0] ss:$16 sps:$4 sm:$0xff]   ;;  %v15041_v48 = vld [vmem:[#allocation8 + $0x11a8] ss:$16 sps:$4 sm:$0xff]  }
 0x502   :  { %11652 = vmatprep.subr.bf16.mxu1 %v14965_v43  ;;  %v15046_v43 = vld [vmem:[#allocation8 + $0x11c4] ss:$16 sps:$4 sm:$0xff]  }
 0x503   :  { %11152 = vmatmul.mubr.bf16.vlgmr.msra.gmra.mrb[96].mxu0 %v6916_v62 }
 0x504   :  { %11644 = vmatmul.mubr.bf16.vlgmr.msra.gmra.mrb[96].mxu1 %v6916_v62  ;;  %11161 = vmatpush1.bf16.msra.mxu0 %v14960_v39  ;;  %v15044_v39 = vld [vmem:[#allocation8 + $0x11c0] ss:$16 sps:$4 sm:$0xff]   ;;  %v15047_v62 = vld [vmem:[#allocation8 + $0x11c8] ss:$16 sps:$4 sm:$0xff]  }
 0x505   :  { %11192 = vmatprep.mubr.bf16.mxu0 %v17154_v34  ;;  %11653 = vmatpush1.bf16.msra.mxu1 %v14963_v14  ;;  %v15052_v14 = vld [vmem:[#allocation8 + $0x11e4] ss:$16 sps:$4 sm:$0xff]  }
 0x506   :  { %11684 = vmatprep.mubr.bf16.mxu1 %v17154_v34  ;;  %11162 = vmatprep.subr.bf16.mxu0 %v14968_v38  ;;  %v15055_v38 = vld [vmem:[#allocation8 + $0x11ec] ss:$16 sps:$4 sm:$0xff]  }
 0x507   :  { %11654 = vmatprep.subr.bf16.mxu1 %v14971_v35  ;;  %v15050_v35 = vld [vmem:[#allocation8 + $0x11e0] ss:$16 sps:$4 sm:$0xff]  }
 0x508   :  { %11163 = vmatpush1.bf16.msra.mxu0 %v14966_v20  ;;  %v15053_v20 = vld [vmem:[#allocation8 + $0x11e8] ss:$16 sps:$4 sm:$0xff]  }
 0x509   :  { %11655 = vmatpush1.bf16.msra.mxu1 %v14969_v29  ;;  %11164 = vmatprep.subr.bf16.mxu0 %v14974_v42  ;;  %v15058_v29 = vld [vmem:[#allocation8 + $0x1204] ss:$16 sps:$4 sm:$0xff]   ;;  %v15061_v42 = vld [vmem:[#allocation8 + $0x120c] ss:$16 sps:$4 sm:$0xff]  }
 0x50a   :  { %11656 = vmatprep.subr.bf16.mxu1 %v14977_v51  ;;  %v15056_v51 = vld [vmem:[#allocation8 + $0x1200] ss:$16 sps:$4 sm:$0xff]  }
 0x50c   :  { %11165 = vmatpush1.bf16.msra.mxu0 %v14972_v40  ;;  %v15059_v40 = vld [vmem:[#allocation8 + $0x1208] ss:$16 sps:$4 sm:$0xff]  }
 0x50d   :  { %11657 = vmatpush1.bf16.msra.mxu1 %v14975_v30  ;;  %11166 = vmatprep.subr.bf16.mxu0 %v14980_v27  ;;  %v15064_v30 = vld [vmem:[#allocation8 + $0x1224] ss:$16 sps:$4 sm:$0xff]   ;;  %v6966_v27 = vcombine.high %v17154_v34, %v17154_v34  ;;  %v15079_v34 = vld [vmem:[#allocation8 + $0x126c] ss:$16 sps:$4 sm:$0xff]  }
 0x50e   :  { %11658 = vmatprep.subr.bf16.mxu1 %v14983_v31  ;;  %v15067_v31 = vld [vmem:[#allocation8 + $0x122c] ss:$16 sps:$4 sm:$0xff]  }
 0x510   :  { %11167 = vmatpush1.bf16.msra.mxu0 %v14978_v0  ;;  %v15062_v0 = vld [vmem:[#allocation8 + $0x1220] ss:$16 sps:$4 sm:$0xff]  }
 0x511   :  { %11659 = vmatpush1.bf16.msra.mxu1 %v14981_v22  ;;  %11168 = vmatprep.subr.bf16.mxu0 %v14986_v24  ;;  %v15065_v22 = vld [vmem:[#allocation8 + $0x1228] ss:$16 sps:$4 sm:$0xff]   ;;  %v15070_v24 = vld [vmem:[#allocation8 + $0x1244] ss:$16 sps:$4 sm:$0xff]  }
 0x512   :  { %11660 = vmatprep.subr.bf16.mxu1 %v14989_v11  ;;  %v15073_v11 = vld [vmem:[#allocation8 + $0x124c] ss:$16 sps:$4 sm:$0xff]  }
 0x514   :  { %11169 = vmatpush1.bf16.msra.mxu0 %v14984_v33  ;;  %v15068_v33 = vld [vmem:[#allocation8 + $0x1240] ss:$16 sps:$4 sm:$0xff]  }
 0x515   :  { %11661 = vmatpush1.bf16.msra.mxu1 %v14987_v59  ;;  %11170 = vmatprep.subr.bf16.mxu0 %v14992_v5  ;;  %v15071_v59 = vld [vmem:[#allocation8 + $0x1248] ss:$16 sps:$4 sm:$0xff]   ;;  %v15076_v5 = vld [vmem:[#allocation8 + $0x1264] ss:$16 sps:$4 sm:$0xff]  }
 0x516   :  { %11662 = vmatprep.subr.bf16.mxu1 %v14995_v12  ;;  %v15074_v12 = vld [vmem:[#allocation8 + $0x1260] ss:$16 sps:$4 sm:$0xff]  }
 0x518   :  { %11171 = vmatpush1.bf16.msra.mxu0 %v14990_v9  ;;  %v15077_v9 = vld [vmem:[#allocation8 + $0x1268] ss:$16 sps:$4 sm:$0xff]  }
 0x519   :  { %11663 = vmatpush1.bf16.msra.mxu1 %v14993_v15  ;;  %11172 = vmatprep.subr.bf16.mxu0 %v14998_v60  ;;  %v15082_v15 = vld [vmem:[#allocation8 + $0x1284] ss:$16 sps:$4 sm:$0xff]   ;;  %v15085_v60 = vld [vmem:[#allocation8 + $0x128c] ss:$16 sps:$4 sm:$0xff]  }
 0x51a   :  { %11664 = vmatprep.subr.bf16.mxu1 %v15001_v52  ;;  %v15080_v52 = vld [vmem:[#allocation8 + $0x1280] ss:$16 sps:$4 sm:$0xff]  }
 0x51c   :  { %11173 = vmatpush1.bf16.msra.mxu0 %v14996_v32  ;;  %v15083_v32 = vld [vmem:[#allocation8 + $0x1288] ss:$16 sps:$4 sm:$0xff]  }
 0x51d   :  { %11665 = vmatpush1.bf16.msra.mxu1 %v14999_v63  ;;  %11174 = vmatprep.subr.bf16.mxu0 %v15004_v1  ;;  %v15088_v63 = vld [vmem:[#allocation8 + $0x12a4] ss:$16 sps:$4 sm:$0xff]   ;;  %v15091_v1 = vld [vmem:[#allocation8 + $0x12ac] ss:$16 sps:$4 sm:$0xff]  }
 0x51e   :  { %11666 = vmatprep.subr.bf16.mxu1 %v15007_v53  ;;  %v15086_v53 = vld [vmem:[#allocation8 + $0x12a0] ss:$16 sps:$4 sm:$0xff]  }
 0x520   :  { %11175 = vmatpush1.bf16.msra.mxu0 %v15002_v19  ;;  %v15089_v19 = vld [vmem:[#allocation8 + $0x12a8] ss:$16 sps:$4 sm:$0xff]  }
 0x521   :  { %11667 = vmatpush1.bf16.msra.mxu1 %v15005_v23  ;;  %11176 = vmatprep.subr.bf16.mxu0 %v15010_v18  ;;  %v15094_v23 = vld [vmem:[#allocation8 + $0x12c4] ss:$16 sps:$4 sm:$0xff]   ;;  %v15097_v18 = vld [vmem:[#allocation8 + $0x12cc] ss:$16 sps:$4 sm:$0xff]  }
 0x522   :  { %11668 = vmatprep.subr.bf16.mxu1 %v15013_v58  ;;  %v15092_v58 = vld [vmem:[#allocation8 + $0x12c0] ss:$16 sps:$4 sm:$0xff]  }
 0x524   :  { %11177 = vmatpush1.bf16.msra.mxu0 %v15008_v28  ;;  %v15095_v28 = vld [vmem:[#allocation8 + $0x12c8] ss:$16 sps:$4 sm:$0xff]  }
 0x525   :  { %11669 = vmatpush1.bf16.msra.mxu1 %v15011_v54  ;;  %11178 = vmatprep.subr.bf16.mxu0 %v15016_v50  ;;  %v15100_v54 = vld [vmem:[#allocation8 + $0x12e4] ss:$16 sps:$4 sm:$0xff]   ;;  %v15103_v50 = vld [vmem:[#allocation8 + $0x12ec] ss:$16 sps:$4 sm:$0xff]  }
 0x526   :  { %11670 = vmatprep.subr.bf16.mxu1 %v15019_v13  ;;  %v15098_v13 = vld [vmem:[#allocation8 + $0x12e0] ss:$16 sps:$4 sm:$0xff]  }
 0x528   :  { %11179 = vmatpush1.bf16.msra.mxu0 %v15014_v16  ;;  %v15101_v16 = vld [vmem:[#allocation8 + $0x12e8] ss:$16 sps:$4 sm:$0xff]  }
 0x529   :  { %11671 = vmatpush1.bf16.msra.mxu1 %v15017_v37  ;;  %11180 = vmatprep.subr.bf16.mxu0 %v15022_v3  ;;  %v15106_v37 = vld [vmem:[#allocation8 + $0x1304] ss:$16 sps:$4 sm:$0xff]   ;;  %v15109_v3 = vld [vmem:[#allocation8 + $0x130c] ss:$16 sps:$4 sm:$0xff]  }
 0x52a   :  { %11672 = vmatprep.subr.bf16.mxu1 %v15025_v49  ;;  %v15104_v49 = vld [vmem:[#allocation8 + $0x1300] ss:$16 sps:$4 sm:$0xff]  }
 0x52c   :  { %11181 = vmatpush1.bf16.msra.mxu0 %v15020_v7  ;;  %v15107_v7 = vld [vmem:[#allocation8 + $0x1308] ss:$16 sps:$4 sm:$0xff]  }
 0x52d   :  { %11673 = vmatpush1.bf16.msra.mxu1 %v15023_v55  ;;  %11182 = vmatprep.subr.bf16.mxu0 %v15028_v8  ;;  %v15112_v55 = vld [vmem:[#allocation8 + $0x1324] ss:$16 sps:$4 sm:$0xff]   ;;  %v15115_v8 = vld [vmem:[#allocation8 + $0x132c] ss:$16 sps:$4 sm:$0xff]  }
 0x52e   :  { %11674 = vmatprep.subr.bf16.mxu1 %v15031_v25  ;;  %v15110_v25 = vld [vmem:[#allocation8 + $0x1320] ss:$16 sps:$4 sm:$0xff]  }
 0x530   :  { %11183 = vmatpush1.bf16.msra.mxu0 %v15026_v45  ;;  %v15113_v45 = vld [vmem:[#allocation8 + $0x1328] ss:$16 sps:$4 sm:$0xff]  }
 0x531   :  { %11675 = vmatpush1.bf16.msra.mxu1 %v15029_v57  ;;  %11184 = vmatprep.subr.bf16.mxu0 %v15034_v17  ;;  %v15118_v57 = vld [vmem:[#allocation8 + $0x1344] ss:$16 sps:$4 sm:$0xff]   ;;  %v15121_v17 = vld [vmem:[#allocation8 + $0x134c] ss:$16 sps:$4 sm:$0xff]  }
 0x532   :  { %11676 = vmatprep.subr.bf16.mxu1 %v15037_v26  ;;  %v15116_v26 = vld [vmem:[#allocation8 + $0x1340] ss:$16 sps:$4 sm:$0xff]  }
 0x534   :  { %11185 = vmatpush1.bf16.msra.mxu0 %v15032_v36  ;;  %v15119_v36 = vld [vmem:[#allocation8 + $0x1348] ss:$16 sps:$4 sm:$0xff]  }
 0x535   :  { %11677 = vmatpush1.bf16.msra.mxu1 %v15035_v44  ;;  %11186 = vmatprep.subr.bf16.mxu0 %v15040_v2  ;;  %v15124_v44 = vld [vmem:[#allocation8 + $0x1364] ss:$16 sps:$4 sm:$0xff]   ;;  %v15127_v2 = vld [vmem:[#allocation8 + $0x136c] ss:$16 sps:$4 sm:$0xff]  }
 0x536   :  { %11678 = vmatprep.subr.bf16.mxu1 %v15043_v41  ;;  %v15122_v41 = vld [vmem:[#allocation8 + $0x1360] ss:$16 sps:$4 sm:$0xff]  }
 0x538   :  { %11187 = vmatpush1.bf16.msra.mxu0 %v15038_v4  ;;  %v15125_v4 = vld [vmem:[#allocation8 + $0x1368] ss:$16 sps:$4 sm:$0xff]  }
 0x539   :  { %11679 = vmatpush1.bf16.msra.mxu1 %v15041_v48  ;;  %11188 = vmatprep.subr.bf16.mxu0 %v15046_v43  ;;  %v15130_v48 = vld [vmem:[#allocation8 + $0x1384] ss:$16 sps:$4 sm:$0xff]   ;;  %v15133_v43 = vld [vmem:[#allocation8 + $0x138c] ss:$16 sps:$4 sm:$0xff]  }
 0x53a   :  { %11680 = vmatprep.subr.bf16.mxu1 %v15049_v47  ;;  %v15128_v47 = vld [vmem:[#allocation8 + $0x1380] ss:$16 sps:$4 sm:$0xff]  }
 0x53c   :  { %11189 = vmatpush1.bf16.msra.mxu0 %v15044_v39  ;;  %v15131_v39 = vld [vmem:[#allocation8 + $0x1388] ss:$16 sps:$4 sm:$0xff]  }
 0x53d   :  { %11681 = vmatpush1.bf16.msra.mxu1 %v15047_v62  ;;  %11190 = vmatprep.subr.bf16.mxu0 %v15052_v14  ;;  %v15136_v62 = vld [vmem:[#allocation8 + $0x13a4] ss:$16 sps:$4 sm:$0xff]   ;;  %v15139_v14 = vld [vmem:[#allocation8 + $0x13ac] ss:$16 sps:$4 sm:$0xff]  }
 0x53e   :  { %11682 = vmatprep.subr.bf16.mxu1 %v15055_v38  ;;  %v15134_v38 = vld [vmem:[#allocation8 + $0x13a0] ss:$16 sps:$4 sm:$0xff]  }
 0x540   :  { %11191 = vmatpush1.bf16.msra.mxu0 %v15050_v35  ;;  %v15137_v35 = vld [vmem:[#allocation8 + $0x13a8] ss:$16 sps:$4 sm:$0xff]  }
 0x541   :  { %11683 = vmatpush1.bf16.msra.mxu1 %v15053_v20  ;;  %11201 = vmatprep.subr.bf16.mxu0 %v15058_v29  ;;  %v15142_v20 = vld [vmem:[#allocation8 + $0x13c4] ss:$16 sps:$4 sm:$0xff]   ;;  %v15145_v29 = vld [vmem:[#allocation8 + $0x13cc] ss:$16 sps:$4 sm:$0xff]  }
 0x542   :  { %11693 = vmatprep.subr.bf16.mxu1 %v15061_v42  ;;  %v15140_v42 = vld [vmem:[#allocation8 + $0x13c0] ss:$16 sps:$4 sm:$0xff]  }
 0x543   :  { %11193 = vmatmul.mubr.bf16.vlgmr.msra.gmra.mrb[96].mxu0 %v17111_v56 }
 0x544   :  { %11685 = vmatmul.mubr.bf16.vlgmr.msra.gmra.mrb[96].mxu1 %v17111_v56  ;;  %11202 = vmatpush1.bf16.msra.mxu0 %v15056_v51  ;;  %v15143_v51 = vld [vmem:[#allocation8 + $0x13c8] ss:$16 sps:$4 sm:$0xff]  }
 0x545   :  { %11233 = vmatprep.mubr.bf16.mxu0 %v6966_v27  ;;  %11694 = vmatpush1.bf16.msra.mxu1 %v15059_v40  ;;  %v15148_v40 = vld [vmem:[#allocation8 + $0x13e4] ss:$16 sps:$4 sm:$0xff]  }
 0x546   :  { %11725 = vmatprep.mubr.bf16.mxu1 %v6966_v27  ;;  %11203 = vmatprep.subr.bf16.mxu0 %v15064_v30  ;;  %v15151_v30 = vld [vmem:[#allocation8 + $0x13ec] ss:$16 sps:$4 sm:$0xff]   ;;  %v15146_v27 = vld [vmem:[#allocation8 + $0x13e0] ss:$16 sps:$4 sm:$0xff]  }
 0x547   :  { %11695 = vmatprep.subr.bf16.mxu1 %v15067_v31  ;;  %v15149_v31 = vld [vmem:[#allocation8 + $0x13e8] ss:$16 sps:$4 sm:$0xff]  }
 0x548   :  { %11204 = vmatpush1.bf16.msra.mxu0 %v15062_v0  ;;  %v15154_v0 = vld [vmem:[#allocation8 + $0x1404] ss:$16 sps:$4 sm:$0xff]  }
 0x549   :  { %11696 = vmatpush1.bf16.msra.mxu1 %v15065_v22  ;;  %11205 = vmatprep.subr.bf16.mxu0 %v15070_v24  ;;  %v15157_v22 = vld [vmem:[#allocation8 + $0x140c] ss:$16 sps:$4 sm:$0xff]   ;;  %v15152_v24 = vld [vmem:[#allocation8 + $0x1400] ss:$16 sps:$4 sm:$0xff]  }
 0x54a   :  { %11697 = vmatprep.subr.bf16.mxu1 %v15073_v11  ;;  %v6964_v11 = vcombine.high %v17111_v56, %v17111_v56  ;;  %v15165_v56 = vld [vmem:[#allocation8 + $0x1440] ss:$16 sps:$4 sm:$0xff]  }
 0x54c   :  { %11206 = vmatpush1.bf16.msra.mxu0 %v15068_v33  ;;  %v15155_v33 = vld [vmem:[#allocation8 + $0x1408] ss:$16 sps:$4 sm:$0xff]  }
 0x54d   :  { %11698 = vmatpush1.bf16.msra.mxu1 %v15071_v59  ;;  %11207 = vmatprep.subr.bf16.mxu0 %v15076_v5  ;;  %v15161_v59 = vld [vmem:[#allocation8 + $0x1424] ss:$16 sps:$4 sm:$0xff]   ;;  %v15164_v5 = vld [vmem:[#allocation8 + $0x142c] ss:$16 sps:$4 sm:$0xff]  }
 0x54e   :  { %11699 = vmatprep.subr.bf16.mxu1 %v15079_v34  ;;  %v15159_v34 = vld [vmem:[#allocation8 + $0x1420] ss:$16 sps:$4 sm:$0xff]  }
 0x550   :  { %11208 = vmatpush1.bf16.msra.mxu0 %v15074_v12  ;;  %v15162_v12 = vld [vmem:[#allocation8 + $0x1428] ss:$16 sps:$4 sm:$0xff]  }
 0x551   :  { %11700 = vmatpush1.bf16.msra.mxu1 %v15077_v9  ;;  %11209 = vmatprep.subr.bf16.mxu0 %v15082_v15  ;;  %v15167_v9 = vld [vmem:[#allocation8 + $0x1444] ss:$16 sps:$4 sm:$0xff]   ;;  %v15170_v15 = vld [vmem:[#allocation8 + $0x144c] ss:$16 sps:$4 sm:$0xff]  }
 0x552   :  { %11701 = vmatprep.subr.bf16.mxu1 %v15085_v60  ;;  %v15168_v60 = vld [vmem:[#allocation8 + $0x1448] ss:$16 sps:$4 sm:$0xff]  }
 0x554   :  { %11210 = vmatpush1.bf16.msra.mxu0 %v15080_v52  ;;  %v15173_v52 = vld [vmem:[#allocation8 + $0x1464] ss:$16 sps:$4 sm:$0xff]  }
 0x555   :  { %11702 = vmatpush1.bf16.msra.mxu1 %v15083_v32  ;;  %11211 = vmatprep.subr.bf16.mxu0 %v15088_v63  ;;  %v15176_v32 = vld [vmem:[#allocation8 + $0x146c] ss:$16 sps:$4 sm:$0xff]   ;;  %v15171_v63 = vld [vmem:[#allocation8 + $0x1460] ss:$16 sps:$4 sm:$0xff]  }
 0x556   :  { %11703 = vmatprep.subr.bf16.mxu1 %v15091_v1  ;;  %v15174_v1 = vld [vmem:[#allocation8 + $0x1468] ss:$16 sps:$4 sm:$0xff]  }
 0x558   :  { %11212 = vmatpush1.bf16.msra.mxu0 %v15086_v53  ;;  %v15179_v53 = vld [vmem:[#allocation8 + $0x1484] ss:$16 sps:$4 sm:$0xff]  }
 0x559   :  { %11704 = vmatpush1.bf16.msra.mxu1 %v15089_v19  ;;  %11213 = vmatprep.subr.bf16.mxu0 %v15094_v23  ;;  %v15182_v19 = vld [vmem:[#allocation8 + $0x148c] ss:$16 sps:$4 sm:$0xff]   ;;  %v15177_v23 = vld [vmem:[#allocation8 + $0x1480] ss:$16 sps:$4 sm:$0xff]  }
 0x55a   :  { %11705 = vmatprep.subr.bf16.mxu1 %v15097_v18  ;;  %v15180_v18 = vld [vmem:[#allocation8 + $0x1488] ss:$16 sps:$4 sm:$0xff]  }
 0x55c   :  { %11214 = vmatpush1.bf16.msra.mxu0 %v15092_v58  ;;  %v15185_v58 = vld [vmem:[#allocation8 + $0x14a4] ss:$16 sps:$4 sm:$0xff]  }
 0x55d   :  { %11706 = vmatpush1.bf16.msra.mxu1 %v15095_v28  ;;  %11215 = vmatprep.subr.bf16.mxu0 %v15100_v54  ;;  %v15188_v28 = vld [vmem:[#allocation8 + $0x14ac] ss:$16 sps:$4 sm:$0xff]   ;;  %v15183_v54 = vld [vmem:[#allocation8 + $0x14a0] ss:$16 sps:$4 sm:$0xff]  }
 0x55e   :  { %11707 = vmatprep.subr.bf16.mxu1 %v15103_v50  ;;  %v15186_v50 = vld [vmem:[#allocation8 + $0x14a8] ss:$16 sps:$4 sm:$0xff]  }
 0x560   :  { %11216 = vmatpush1.bf16.msra.mxu0 %v15098_v13  ;;  %v15191_v13 = vld [vmem:[#allocation8 + $0x14c4] ss:$16 sps:$4 sm:$0xff]  }
 0x561   :  { %11708 = vmatpush1.bf16.msra.mxu1 %v15101_v16  ;;  %11217 = vmatprep.subr.bf16.mxu0 %v15106_v37  ;;  %v15194_v16 = vld [vmem:[#allocation8 + $0x14cc] ss:$16 sps:$4 sm:$0xff]   ;;  %v15189_v37 = vld [vmem:[#allocation8 + $0x14c0] ss:$16 sps:$4 sm:$0xff]  }
 0x562   :  { %11709 = vmatprep.subr.bf16.mxu1 %v15109_v3  ;;  %v15192_v3 = vld [vmem:[#allocation8 + $0x14c8] ss:$16 sps:$4 sm:$0xff]  }
 0x564   :  { %11218 = vmatpush1.bf16.msra.mxu0 %v15104_v49  ;;  %v15197_v49 = vld [vmem:[#allocation8 + $0x14e4] ss:$16 sps:$4 sm:$0xff]  }
 0x565   :  { %11710 = vmatpush1.bf16.msra.mxu1 %v15107_v7  ;;  %11219 = vmatprep.subr.bf16.mxu0 %v15112_v55  ;;  %v15200_v7 = vld [vmem:[#allocation8 + $0x14ec] ss:$16 sps:$4 sm:$0xff]   ;;  %v15195_v55 = vld [vmem:[#allocation8 + $0x14e0] ss:$16 sps:$4 sm:$0xff]  }
 0x566   :  { %11711 = vmatprep.subr.bf16.mxu1 %v15115_v8  ;;  %v15198_v8 = vld [vmem:[#allocation8 + $0x14e8] ss:$16 sps:$4 sm:$0xff]  }
 0x568   :  { %11220 = vmatpush1.bf16.msra.mxu0 %v15110_v25  ;;  %v15203_v25 = vld [vmem:[#allocation8 + $0x1504] ss:$16 sps:$4 sm:$0xff]  }
 0x569   :  { %11712 = vmatpush1.bf16.msra.mxu1 %v15113_v45  ;;  %11221 = vmatprep.subr.bf16.mxu0 %v15118_v57  ;;  %v15206_v45 = vld [vmem:[#allocation8 + $0x150c] ss:$16 sps:$4 sm:$0xff]   ;;  %v15201_v57 = vld [vmem:[#allocation8 + $0x1500] ss:$16 sps:$4 sm:$0xff]  }
 0x56a   :  { %11713 = vmatprep.subr.bf16.mxu1 %v15121_v17  ;;  %v15204_v17 = vld [vmem:[#allocation8 + $0x1508] ss:$16 sps:$4 sm:$0xff]  }
 0x56c   :  { %11222 = vmatpush1.bf16.msra.mxu0 %v15116_v26  ;;  %v15209_v26 = vld [vmem:[#allocation8 + $0x1524] ss:$16 sps:$4 sm:$0xff]  }
 0x56d   :  { %11714 = vmatpush1.bf16.msra.mxu1 %v15119_v36  ;;  %11223 = vmatprep.subr.bf16.mxu0 %v15124_v44  ;;  %v15212_v36 = vld [vmem:[#allocation8 + $0x152c] ss:$16 sps:$4 sm:$0xff]   ;;  %v15207_v44 = vld [vmem:[#allocation8 + $0x1520] ss:$16 sps:$4 sm:$0xff]  }
 0x56e   :  { %11715 = vmatprep.subr.bf16.mxu1 %v15127_v2  ;;  %v15210_v2 = vld [vmem:[#allocation8 + $0x1528] ss:$16 sps:$4 sm:$0xff]  }
 0x570   :  { %11224 = vmatpush1.bf16.msra.mxu0 %v15122_v41  ;;  %v15215_v41 = vld [vmem:[#allocation8 + $0x1544] ss:$16 sps:$4 sm:$0xff]  }
 0x571   :  { %11716 = vmatpush1.bf16.msra.mxu1 %v15125_v4  ;;  %11225 = vmatprep.subr.bf16.mxu0 %v15130_v48  ;;  %v15218_v4 = vld [vmem:[#allocation8 + $0x154c] ss:$16 sps:$4 sm:$0xff]   ;;  %v15213_v48 = vld [vmem:[#allocation8 + $0x1540] ss:$16 sps:$4 sm:$0xff]  }
 0x572   :  { %11717 = vmatprep.subr.bf16.mxu1 %v15133_v43  ;;  %v15216_v43 = vld [vmem:[#allocation8 + $0x1548] ss:$16 sps:$4 sm:$0xff]  }
 0x574   :  { %11226 = vmatpush1.bf16.msra.mxu0 %v15128_v47  ;;  %v15221_v47 = vld [vmem:[#allocation8 + $0x1564] ss:$16 sps:$4 sm:$0xff]  }
 0x575   :  { %11718 = vmatpush1.bf16.msra.mxu1 %v15131_v39  ;;  %11227 = vmatprep.subr.bf16.mxu0 %v15136_v62  ;;  %v15224_v39 = vld [vmem:[#allocation8 + $0x156c] ss:$16 sps:$4 sm:$0xff]   ;;  %v15219_v62 = vld [vmem:[#allocation8 + $0x1560] ss:$16 sps:$4 sm:$0xff]  }
 0x576   :  { %11719 = vmatprep.subr.bf16.mxu1 %v15139_v14  ;;  %v15222_v14 = vld [vmem:[#allocation8 + $0x1568] ss:$16 sps:$4 sm:$0xff]  }
 0x578   :  { %11228 = vmatpush1.bf16.msra.mxu0 %v15134_v38  ;;  %v15227_v38 = vld [vmem:[#allocation8 + $0x1584] ss:$16 sps:$4 sm:$0xff]  }
 0x579   :  { %11720 = vmatpush1.bf16.msra.mxu1 %v15137_v35  ;;  %11229 = vmatprep.subr.bf16.mxu0 %v15142_v20  ;;  %v15230_v35 = vld [vmem:[#allocation8 + $0x158c] ss:$16 sps:$4 sm:$0xff]   ;;  %v15225_v20 = vld [vmem:[#allocation8 + $0x1580] ss:$16 sps:$4 sm:$0xff]  }
 0x57a   :  { %11721 = vmatprep.subr.bf16.mxu1 %v15145_v29  ;;  %v15228_v29 = vld [vmem:[#allocation8 + $0x1588] ss:$16 sps:$4 sm:$0xff]  }
 0x57c   :  { %11230 = vmatpush1.bf16.msra.mxu0 %v15140_v42  ;;  %v15233_v42 = vld [vmem:[#allocation8 + $0x15a4] ss:$16 sps:$4 sm:$0xff]  }
 0x57d   :  { %11722 = vmatpush1.bf16.msra.mxu1 %v15143_v51  ;;  %11231 = vmatprep.subr.bf16.mxu0 %v15148_v40  ;;  %v15236_v51 = vld [vmem:[#allocation8 + $0x15ac] ss:$16 sps:$4 sm:$0xff]   ;;  %v15231_v40 = vld [vmem:[#allocation8 + $0x15a0] ss:$16 sps:$4 sm:$0xff]  }
 0x57e   :  { %11723 = vmatprep.subr.bf16.mxu1 %v15151_v30  ;;  %v15234_v30 = vld [vmem:[#allocation8 + $0x15a8] ss:$16 sps:$4 sm:$0xff]  }
 0x580   :  { %11232 = vmatpush1.bf16.msra.mxu0 %v15146_v27  ;;  %v15239_v27 = vld [vmem:[#allocation8 + $0x15c4] ss:$16 sps:$4 sm:$0xff]  }
 0x581   :  { %11724 = vmatpush1.bf16.msra.mxu1 %v15149_v31  ;;  %11242 = vmatprep.subr.bf16.mxu0 %v15154_v0  ;;  %v15242_v31 = vld [vmem:[#allocation8 + $0x15cc] ss:$16 sps:$4 sm:$0xff]   ;;  %v15237_v0 = vld [vmem:[#allocation8 + $0x15c0] ss:$16 sps:$4 sm:$0xff]  }
 0x582   :  { %11734 = vmatprep.subr.bf16.mxu1 %v15157_v22  ;;  %v15240_v22 = vld [vmem:[#allocation8 + $0x15c8] ss:$16 sps:$4 sm:$0xff]  }
 0x583   :  { %11234 = vmatmul.mubr.bf16.vlgmr.msra.gmra.mrb[96].mxu0 %v6964_v11 }
 0x584   :  { %11726 = vmatmul.mubr.bf16.vlgmr.msra.gmra.mrb[96].mxu1 %v6964_v11  ;;  %11243 = vmatpush1.bf16.msra.mxu0 %v15152_v24  ;;  %v15245_v24 = vld [vmem:[#allocation8 + $0x15e4] ss:$16 sps:$4 sm:$0xff]   ;;  %v15248_v11 = vld [vmem:[#allocation8 + $0x15ec] ss:$16 sps:$4 sm:$0xff]  }
 0x585   :  { %11274 = vmatprep.mubr.bf16.mxu0 %v17118_v10  ;;  %11735 = vmatpush1.bf16.msra.mxu1 %v15155_v33  ;;  %v15243_v33 = vld [vmem:[#allocation8 + $0x15e0] ss:$16 sps:$4 sm:$0xff]  }
 0x586   :  { %11766 = vmatprep.mubr.bf16.mxu1 %v17118_v10  ;;  %11244 = vmatprep.subr.bf16.mxu0 %v15161_v59  ;;  %v15246_v59 = vld [vmem:[#allocation8 + $0x15e8] ss:$16 sps:$4 sm:$0xff]  }
 0x587   :  { %11736 = vmatprep.subr.bf16.mxu1 %v15164_v5  ;;  %v15251_v5 = vld [vmem:[#allocation8 + $0x1604] ss:$16 sps:$4 sm:$0xff]  }
 0x588   :  { %11245 = vmatpush1.bf16.msra.mxu0 %v15159_v34  ;;  %v15254_v34 = vld [vmem:[#allocation8 + $0x160c] ss:$16 sps:$4 sm:$0xff]  }
 0x589   :  { %11737 = vmatpush1.bf16.msra.mxu1 %v15162_v12  ;;  %11246 = vmatprep.subr.bf16.mxu0 %v15167_v9  ;;  %v15249_v12 = vld [vmem:[#allocation8 + $0x1600] ss:$16 sps:$4 sm:$0xff]   ;;  %v15252_v9 = vld [vmem:[#allocation8 + $0x1608] ss:$16 sps:$4 sm:$0xff]  }
 0x58a   :  { %11738 = vmatprep.subr.bf16.mxu1 %v15170_v15  ;;  %v15257_v15 = vld [vmem:[#allocation8 + $0x1624] ss:$16 sps:$4 sm:$0xff]  }
 0x58c   :  { %11247 = vmatpush1.bf16.msra.mxu0 %v15165_v56  ;;  %v6967_v56 = vcombine.high %v17118_v10, %v17118_v10  ;;  %v15272_v10 = vld [vmem:[#allocation8 + $0x166c] ss:$16 sps:$4 sm:$0xff]  }
 0x58d   :  { %11739 = vmatpush1.bf16.msra.mxu1 %v15168_v60  ;;  %11248 = vmatprep.subr.bf16.mxu0 %v15173_v52  ;;  %v15260_v60 = vld [vmem:[#allocation8 + $0x162c] ss:$16 sps:$4 sm:$0xff]   ;;  %v15255_v52 = vld [vmem:[#allocation8 + $0x1620] ss:$16 sps:$4 sm:$0xff]  }
 0x58e   :  { %11740 = vmatprep.subr.bf16.mxu1 %v15176_v32  ;;  %v15258_v32 = vld [vmem:[#allocation8 + $0x1628] ss:$16 sps:$4 sm:$0xff]  }
 0x590   :  { %11249 = vmatpush1.bf16.msra.mxu0 %v15171_v63  ;;  %v15263_v63 = vld [vmem:[#allocation8 + $0x1644] ss:$16 sps:$4 sm:$0xff]  }
 0x591   :  { %11741 = vmatpush1.bf16.msra.mxu1 %v15174_v1  ;;  %11250 = vmatprep.subr.bf16.mxu0 %v15179_v53  ;;  %v15266_v1 = vld [vmem:[#allocation8 + $0x164c] ss:$16 sps:$4 sm:$0xff]   ;;  %v15261_v53 = vld [vmem:[#allocation8 + $0x1640] ss:$16 sps:$4 sm:$0xff]  }
 0x592   :  { %11742 = vmatprep.subr.bf16.mxu1 %v15182_v19  ;;  %v15264_v19 = vld [vmem:[#allocation8 + $0x1648] ss:$16 sps:$4 sm:$0xff]  }
 0x594   :  { %11251 = vmatpush1.bf16.msra.mxu0 %v15177_v23  ;;  %v15269_v23 = vld [vmem:[#allocation8 + $0x1664] ss:$16 sps:$4 sm:$0xff]  }
 0x595   :  { %11743 = vmatpush1.bf16.msra.mxu1 %v15180_v18  ;;  %11252 = vmatprep.subr.bf16.mxu0 %v15185_v58  ;;  %v15267_v18 = vld [vmem:[#allocation8 + $0x1660] ss:$16 sps:$4 sm:$0xff]   ;;  %v15270_v58 = vld [vmem:[#allocation8 + $0x1668] ss:$16 sps:$4 sm:$0xff]  }
 0x596   :  { %11744 = vmatprep.subr.bf16.mxu1 %v15188_v28  ;;  %v15275_v28 = vld [vmem:[#allocation8 + $0x1684] ss:$16 sps:$4 sm:$0xff]  }
 0x598   :  { %11253 = vmatpush1.bf16.msra.mxu0 %v15183_v54  ;;  %v15278_v54 = vld [vmem:[#allocation8 + $0x168c] ss:$16 sps:$4 sm:$0xff]  }
 0x599   :  { %11745 = vmatpush1.bf16.msra.mxu1 %v15186_v50  ;;  %11254 = vmatprep.subr.bf16.mxu0 %v15191_v13  ;;  %v15273_v50 = vld [vmem:[#allocation8 + $0x1680] ss:$16 sps:$4 sm:$0xff]   ;;  %v15276_v13 = vld [vmem:[#allocation8 + $0x1688] ss:$16 sps:$4 sm:$0xff]  }
 0x59a   :  { %11746 = vmatprep.subr.bf16.mxu1 %v15194_v16  ;;  %v15281_v16 = vld [vmem:[#allocation8 + $0x16a4] ss:$16 sps:$4 sm:$0xff]  }
 0x59c   :  { %11255 = vmatpush1.bf16.msra.mxu0 %v15189_v37  ;;  %v15284_v37 = vld [vmem:[#allocation8 + $0x16ac] ss:$16 sps:$4 sm:$0xff]  }
 0x59d   :  { %11747 = vmatpush1.bf16.msra.mxu1 %v15192_v3  ;;  %11256 = vmatprep.subr.bf16.mxu0 %v15197_v49  ;;  %v15279_v3 = vld [vmem:[#allocation8 + $0x16a0] ss:$16 sps:$4 sm:$0xff]   ;;  %v15282_v49 = vld [vmem:[#allocation8 + $0x16a8] ss:$16 sps:$4 sm:$0xff]  }
 0x59e   :  { %11748 = vmatprep.subr.bf16.mxu1 %v15200_v7  ;;  %v15287_v7 = vld [vmem:[#allocation8 + $0x16c4] ss:$16 sps:$4 sm:$0xff]  }
 0x5a0   :  { %11257 = vmatpush1.bf16.msra.mxu0 %v15195_v55  ;;  %v15290_v55 = vld [vmem:[#allocation8 + $0x16cc] ss:$16 sps:$4 sm:$0xff]  }
 0x5a1   :  { %11749 = vmatpush1.bf16.msra.mxu1 %v15198_v8  ;;  %11258 = vmatprep.subr.bf16.mxu0 %v15203_v25  ;;  %v15285_v8 = vld [vmem:[#allocation8 + $0x16c0] ss:$16 sps:$4 sm:$0xff]   ;;  %v15288_v25 = vld [vmem:[#allocation8 + $0x16c8] ss:$16 sps:$4 sm:$0xff]  }
 0x5a2   :  { %11750 = vmatprep.subr.bf16.mxu1 %v15206_v45  ;;  %v15293_v45 = vld [vmem:[#allocation8 + $0x16e4] ss:$16 sps:$4 sm:$0xff]  }
 0x5a4   :  { %11259 = vmatpush1.bf16.msra.mxu0 %v15201_v57  ;;  %v15296_v57 = vld [vmem:[#allocation8 + $0x16ec] ss:$16 sps:$4 sm:$0xff]  }
 0x5a5   :  { %11751 = vmatpush1.bf16.msra.mxu1 %v15204_v17  ;;  %11260 = vmatprep.subr.bf16.mxu0 %v15209_v26  ;;  %v15291_v17 = vld [vmem:[#allocation8 + $0x16e0] ss:$16 sps:$4 sm:$0xff]   ;;  %v15294_v26 = vld [vmem:[#allocation8 + $0x16e8] ss:$16 sps:$4 sm:$0xff]  }
 0x5a6   :  { %11752 = vmatprep.subr.bf16.mxu1 %v15212_v36  ;;  %v15299_v36 = vld [vmem:[#allocation8 + $0x1704] ss:$16 sps:$4 sm:$0xff]  }
 0x5a8   :  { %11261 = vmatpush1.bf16.msra.mxu0 %v15207_v44  ;;  %v15302_v44 = vld [vmem:[#allocation8 + $0x170c] ss:$16 sps:$4 sm:$0xff]  }
 0x5a9   :  { %11753 = vmatpush1.bf16.msra.mxu1 %v15210_v2  ;;  %11262 = vmatprep.subr.bf16.mxu0 %v15215_v41  ;;  %v15297_v2 = vld [vmem:[#allocation8 + $0x1700] ss:$16 sps:$4 sm:$0xff]   ;;  %v15300_v41 = vld [vmem:[#allocation8 + $0x1708] ss:$16 sps:$4 sm:$0xff]  }
 0x5aa   :  { %11754 = vmatprep.subr.bf16.mxu1 %v15218_v4  ;;  %v15305_v4 = vld [vmem:[#allocation8 + $0x1724] ss:$16 sps:$4 sm:$0xff]  }
 0x5ac   :  { %11263 = vmatpush1.bf16.msra.mxu0 %v15213_v48  ;;  %v15308_v48 = vld [vmem:[#allocation8 + $0x172c] ss:$16 sps:$4 sm:$0xff]  }
 0x5ad   :  { %11755 = vmatpush1.bf16.msra.mxu1 %v15216_v43  ;;  %11264 = vmatprep.subr.bf16.mxu0 %v15221_v47  ;;  %v15303_v43 = vld [vmem:[#allocation8 + $0x1720] ss:$16 sps:$4 sm:$0xff]   ;;  %v15306_v47 = vld [vmem:[#allocation8 + $0x1728] ss:$16 sps:$4 sm:$0xff]  }
 0x5ae   :  { %11756 = vmatprep.subr.bf16.mxu1 %v15224_v39  ;;  %v15311_v39 = vld [vmem:[#allocation8 + $0x1744] ss:$16 sps:$4 sm:$0xff]  }
 0x5b0   :  { %11265 = vmatpush1.bf16.msra.mxu0 %v15219_v62  ;;  %v15314_v62 = vld [vmem:[#allocation8 + $0x174c] ss:$16 sps:$4 sm:$0xff]  }
 0x5b1   :  { %11757 = vmatpush1.bf16.msra.mxu1 %v15222_v14  ;;  %11266 = vmatprep.subr.bf16.mxu0 %v15227_v38  ;;  %v15309_v14 = vld [vmem:[#allocation8 + $0x1740] ss:$16 sps:$4 sm:$0xff]   ;;  %v15312_v38 = vld [vmem:[#allocation8 + $0x1748] ss:$16 sps:$4 sm:$0xff]  }
 0x5b2   :  { %11758 = vmatprep.subr.bf16.mxu1 %v15230_v35  ;;  %v15317_v35 = vld [vmem:[#allocation8 + $0x1764] ss:$16 sps:$4 sm:$0xff]  }
 0x5b4   :  { %11267 = vmatpush1.bf16.msra.mxu0 %v15225_v20  ;;  %v15320_v20 = vld [vmem:[#allocation8 + $0x176c] ss:$16 sps:$4 sm:$0xff]  }
 0x5b5   :  { %11759 = vmatpush1.bf16.msra.mxu1 %v15228_v29  ;;  %11268 = vmatprep.subr.bf16.mxu0 %v15233_v42  ;;  %v15315_v29 = vld [vmem:[#allocation8 + $0x1760] ss:$16 sps:$4 sm:$0xff]   ;;  %v15318_v42 = vld [vmem:[#allocation8 + $0x1768] ss:$16 sps:$4 sm:$0xff]  }
 0x5b6   :  { %11760 = vmatprep.subr.bf16.mxu1 %v15236_v51  ;;  %v15323_v51 = vld [vmem:[#allocation8 + $0x1784] ss:$16 sps:$4 sm:$0xff]  }
 0x5b8   :  { %11269 = vmatpush1.bf16.msra.mxu0 %v15231_v40  ;;  %v15326_v40 = vld [vmem:[#allocation8 + $0x178c] ss:$16 sps:$4 sm:$0xff]  }
 0x5b9   :  { %11761 = vmatpush1.bf16.msra.mxu1 %v15234_v30  ;;  %11270 = vmatprep.subr.bf16.mxu0 %v15239_v27  ;;  %v15321_v30 = vld [vmem:[#allocation8 + $0x1780] ss:$16 sps:$4 sm:$0xff]   ;;  %v15324_v27 = vld [vmem:[#allocation8 + $0x1788] ss:$16 sps:$4 sm:$0xff]  }
 0x5ba   :  { %11762 = vmatprep.subr.bf16.mxu1 %v15242_v31  ;;  %v15329_v31 = vld [vmem:[#allocation8 + $0x17a4] ss:$16 sps:$4 sm:$0xff]  }
 0x5bc   :  { %11271 = vmatpush1.bf16.msra.mxu0 %v15237_v0  ;;  %v15332_v0 = vld [vmem:[#allocation8 + $0x17ac] ss:$16 sps:$4 sm:$0xff]  }
 0x5bd   :  { %11763 = vmatpush1.bf16.msra.mxu1 %v15240_v22  ;;  %11272 = vmatprep.subr.bf16.mxu0 %v15245_v24  ;;  %v15327_v22 = vld [vmem:[#allocation8 + $0x17a0] ss:$16 sps:$4 sm:$0xff]   ;;  %v15330_v24 = vld [vmem:[#allocation8 + $0x17a8] ss:$16 sps:$4 sm:$0xff]  }
 0x5be   :  { %11764 = vmatprep.subr.bf16.mxu1 %v15248_v11  ;;  %v15335_v11 = vld [vmem:[#allocation8 + $0x17c4] ss:$16 sps:$4 sm:$0xff]  }
 0x5c0   :  { %11273 = vmatpush1.bf16.msra.mxu0 %v15243_v33  ;;  %v15338_v33 = vld [vmem:[#allocation8 + $0x17cc] ss:$16 sps:$4 sm:$0xff]  }
 0x5c1   :  { %11765 = vmatpush1.bf16.msra.mxu1 %v15246_v59  ;;  %11283 = vmatprep.subr.bf16.mxu0 %v15251_v5  ;;  %v15333_v59 = vld [vmem:[#allocation8 + $0x17c0] ss:$16 sps:$4 sm:$0xff]   ;;  %v15336_v5 = vld [vmem:[#allocation8 + $0x17c8] ss:$16 sps:$4 sm:$0xff]  }
 0x5c2   :  { %11775 = vmatprep.subr.bf16.mxu1 %v15254_v34  ;;  %v15341_v34 = vld [vmem:[#allocation8 + $0x17e4] ss:$16 sps:$4 sm:$0xff]  }
 0x5c3   :  { %11275 = vmatmul.mubr.bf16.vlgmr.msra.gmra.mrb[96].mxu0 %v17115_v6 }
 0x5c4   :  { %11767 = vmatmul.mubr.bf16.vlgmr.msra.gmra.mrb[96].mxu1 %v17115_v6  ;;  %11284 = vmatpush1.bf16.msra.mxu0 %v15249_v12  ;;  %v15344_v12 = vld [vmem:[#allocation8 + $0x17ec] ss:$16 sps:$4 sm:$0xff]  }
 0x5c5   :  { %11315 = vmatprep.mubr.bf16.mxu0 %v6967_v56  ;;  %11776 = vmatpush1.bf16.msra.mxu1 %v15252_v9  ;;  %v15339_v9 = vld [vmem:[#allocation8 + $0x17e0] ss:$16 sps:$4 sm:$0xff]  }
 0x5c6   :  { %11807 = vmatprep.mubr.bf16.mxu1 %v6967_v56  ;;  %11285 = vmatprep.subr.bf16.mxu0 %v15257_v15  ;;  %v15342_v15 = vld [vmem:[#allocation8 + $0x17e8] ss:$16 sps:$4 sm:$0xff]  }
 0x5c7   :  { %11777 = vmatprep.subr.bf16.mxu1 %v15260_v60  ;;  %v15345_v56 = vld [vmem:[%s17295_s6 + $0x40] sm:$0xff]  }
 0x5c8   :  { %11286 = vmatpush1.bf16.msra.mxu0 %v15255_v52  ;;  %v15346_v60 = vld [vmem:[%s17295_s6 + $0xc0] sm:$0xff]  }
 0x5c9   :  { %11778 = vmatpush1.bf16.msra.mxu1 %v15258_v32  ;;  %11287 = vmatprep.subr.bf16.mxu0 %v15263_v63  ;;  %v15347_v52 = vld [vmem:[%s17295_s6] sm:$0xff]   ;;  %v6965_v32 = vcombine.high %v17115_v6, %v17115_v6  ;;  %v15351_v6 = vld [vmem:[%s17295_s6 + $0x8] sm:$0xff]  }
 0x5ca   :  { %11779 = vmatprep.subr.bf16.mxu1 %v15266_v1  ;;  %v15348_v63 = vld [vmem:[%s17295_s6 + $0x80] sm:$0xff]   ;;  %v15349_v1 = vld [vmem:[%s17295_s6 + $0x48] sm:$0xff]  }
 0x5cc   :  { %11288 = vmatpush1.bf16.msra.mxu0 %v15261_v53  ;;  %v15350_v53 = vld [vmem:[%s17295_s6 + $0xc8] sm:$0xff]  }
 0x5cd   :  { %11780 = vmatpush1.bf16.msra.mxu1 %v15264_v19  ;;  %11289 = vmatprep.subr.bf16.mxu0 %v15269_v23  ;;  %v15352_v19 = vld [vmem:[%s17295_s6 + $0x88] sm:$0xff]   ;;  %v15353_v23 = vld [vmem:[%s17295_s6 + $0x50] sm:$0xff]  }
 0x5ce   :  { %11781 = vmatprep.subr.bf16.mxu1 %v15272_v10  ;;  %v15354_v10 = vld [vmem:[%s17295_s6 + $0xd0] sm:$0xff]  }
 0x5d0   :  { %11290 = vmatpush1.bf16.msra.mxu0 %v15267_v18  ;;  %v15355_v18 = vld [vmem:[%s17295_s6 + $0x10] sm:$0xff]  }
 0x5d1   :  { %11782 = vmatpush1.bf16.msra.mxu1 %v15270_v58  ;;  %11291 = vmatprep.subr.bf16.mxu0 %v15275_v28  ;;  %v15356_v58 = vld [vmem:[%s17295_s6 + $0x90] sm:$0xff]   ;;  %v15357_v28 = vld [vmem:[%s17295_s6 + $0x58] sm:$0xff]  }
 0x5d2   :  { %11783 = vmatprep.subr.bf16.mxu1 %v15278_v54  ;;  %v15358_v54 = vld [vmem:[%s17295_s6 + $0xd8] sm:$0xff]  }
 0x5d4   :  { %11292 = vmatpush1.bf16.msra.mxu0 %v15273_v50  ;;  %v15359_v50 = vld [vmem:[%s17295_s6 + $0x18] sm:$0xff]  }
 0x5d5   :  { %11784 = vmatpush1.bf16.msra.mxu1 %v15276_v13  ;;  %11293 = vmatprep.subr.bf16.mxu0 %v15281_v16  ;;  %v15360_v13 = vld [vmem:[%s17295_s6 + $0x98] sm:$0xff]   ;;  %v15361_v16 = vld [vmem:[%s17295_s6 + $0x60] sm:$0xff]  }
 0x5d6   :  { %11785 = vmatprep.subr.bf16.mxu1 %v15284_v37  ;;  %v15362_v37 = vld [vmem:[%s17295_s6 + $0xe0] sm:$0xff]  }
 0x5d8   :  { %11294 = vmatpush1.bf16.msra.mxu0 %v15279_v3  ;;  %v15363_v3 = vld [vmem:[%s17295_s6 + $0x20] sm:$0xff]  }
 0x5d9   :  { %11786 = vmatpush1.bf16.msra.mxu1 %v15282_v49  ;;  %11295 = vmatprep.subr.bf16.mxu0 %v15287_v7  ;;  %v15364_v49 = vld [vmem:[%s17295_s6 + $0xa0] sm:$0xff]   ;;  %v15365_v7 = vld [vmem:[%s17295_s6 + $0x68] sm:$0xff]  }
 0x5da   :  { %11787 = vmatprep.subr.bf16.mxu1 %v15290_v55  ;;  %v15366_v55 = vld [vmem:[%s17295_s6 + $0xe8] sm:$0xff]  }
 0x5dc   :  { %11296 = vmatpush1.bf16.msra.mxu0 %v15285_v8  ;;  %v15367_v8 = vld [vmem:[%s17295_s6 + $0x28] sm:$0xff]  }
 0x5dd   :  { %11788 = vmatpush1.bf16.msra.mxu1 %v15288_v25  ;;  %11297 = vmatprep.subr.bf16.mxu0 %v15293_v45  ;;  %v15368_v25 = vld [vmem:[%s17295_s6 + $0xa8] sm:$0xff]   ;;  %v15369_v45 = vld [vmem:[%s17295_s6 + $0x70] sm:$0xff]  }
 0x5de   :  { %11789 = vmatprep.subr.bf16.mxu1 %v15296_v57  ;;  %v15370_v57 = vld [vmem:[%s17295_s6 + $0xf0] sm:$0xff]  }
 0x5e0   :  { %11298 = vmatpush1.bf16.msra.mxu0 %v15291_v17  ;;  %v15371_v17 = vld [vmem:[%s17295_s6 + $0x30] sm:$0xff]  }
 0x5e1   :  { %11790 = vmatpush1.bf16.msra.mxu1 %v15294_v26  ;;  %11299 = vmatprep.subr.bf16.mxu0 %v15299_v36  ;;  %v15372_v26 = vld [vmem:[%s17295_s6 + $0xb0] sm:$0xff]   ;;  %v15373_v36 = vld [vmem:[%s17295_s6 + $0x78] sm:$0xff]  }
 0x5e2   :  { %11791 = vmatprep.subr.bf16.mxu1 %v15302_v44  ;;  %v15374_v44 = vld [vmem:[%s17295_s6 + $0xf8] sm:$0xff]  }
 0x5e4   :  { %11300 = vmatpush1.bf16.msra.mxu0 %v15297_v2  ;;  %v15375_v2 = vld [vmem:[%s17295_s6 + $0x38] sm:$0xff]  }
 0x5e5   :  { %11792 = vmatpush1.bf16.msra.mxu1 %v15300_v41  ;;  %11301 = vmatprep.subr.bf16.mxu0 %v15305_v4  ;;  %v15376_v41 = vld [vmem:[%s17295_s6 + $0xb8] sm:$0xff]   ;;  %s15534_s6 = smov [#allocation12]  }
 0x5e6   :  { %11793 = vmatprep.subr.bf16.mxu1 %v15308_v48  ;;  %v6796_v4 = vld [vmem:[#allocation9] sm:$0xf]  ;;  %v6808_v48 = vsub.s32 2, %v16924_v46  ;;  %s12186_s24 = sshll.u32 %s15534_s6, 4  ;;  %s12187_s24 = int_to_ptr.vmem [resolvable:$true] %s12186_s24 }
 0x5e7   :  { %s15491_s25 = scalar_lea.vmem %s12187_s24, 32  ;;  %p15496_p13 = scmp.lt.s32.totalorder %s12187_s24, %s12187_s24 }
 0x5e8   :  { %11302 = vmatpush1.bf16.msra.mxu0 %v15303_v43  ;;  %v6812_v43 = vsub.s32 3, %v16924_v46  ;;  %p15492_p12 = scmp.ne.s32.totalorder %s12187_s24, %s15491_s25  ;;  %p15497_p0 = scmp.lt.s32.totalorder %s15491_s25, %s15491_s25 }
 0x5e9   :  { %11794 = vmatpush1.bf16.msra.mxu1 %v15306_v47  ;;  %11303 = vmatprep.subr.bf16.mxu0 %v15311_v39  ;;  %v6801_v47 = vrot.slane %v6796_v4, %v5460_v61  ;;  %v6809_v39 = vrot.slane %v6796_v4, %v6808_v48 }
 0x5ea   :  { %11795 = vmatprep.subr.bf16.mxu1 %v15314_v62  ;;  %v6805_v62 = vrot.slane %v6796_v4, %v5464_v21  ;;  %p15498_p1 = por %p15497_p0, %p15496_p13 }
 0x5ec   :  { %11304 = vmatpush1.bf16.msra.mxu0 %v15309_v14  ;;  %v6813_v14 = vrot.slane %v6796_v4, %v6812_v43  ;;  %p15499_p2 = pnand %p15498_p1, %p15492_p12 }
 0x5ed   :  { %11796 = vmatpush1.bf16.msra.mxu1 %v15312_v38  ;;  %11305 = vmatprep.subr.bf16.mxu0 %v15317_v35 }
 0x5ee   :  { %11797 = vmatprep.subr.bf16.mxu1 %v15320_v20 }
 0x5f0   :  { %11306 = vmatpush1.bf16.msra.mxu0 %v15315_v29 }
 0x5f1   :  { %11798 = vmatpush1.bf16.msra.mxu1 %v15318_v42  ;;  %11307 = vmatprep.subr.bf16.mxu0 %v15323_v51 }
 0x5f2   :  { %11799 = vmatprep.subr.bf16.mxu1 %v15326_v40 }
 0x5f4   :  { %11308 = vmatpush1.bf16.msra.mxu0 %v15321_v30 }
 0x5f5   :  { %11800 = vmatpush1.bf16.msra.mxu1 %v15324_v27  ;;  %11309 = vmatprep.subr.bf16.mxu0 %v15329_v31 }
 0x5f6   :  { %11801 = vmatprep.subr.bf16.mxu1 %v15332_v0 }
 0x5f8   :  { %11310 = vmatpush1.bf16.msra.mxu0 %v15327_v22 }
 0x5f9   :  { %11802 = vmatpush1.bf16.msra.mxu1 %v15330_v24  ;;  %11311 = vmatprep.subr.bf16.mxu0 %v15335_v11 }
 0x5fa   :  { %11803 = vmatprep.subr.bf16.mxu1 %v15338_v33 }
 0x5fc   :  { %11312 = vmatpush1.bf16.msra.mxu0 %v15333_v59 }
 0x5fd   :  { %11804 = vmatpush1.bf16.msra.mxu1 %v15336_v5  ;;  %11313 = vmatprep.subr.bf16.mxu0 %v15341_v34 }
 0x5fe   :  { %11805 = vmatprep.subr.bf16.mxu1 %v15344_v12 }
 0x600   :  { %11314 = vmatpush1.bf16.msra.mxu0 %v15339_v9  ;;  %v13279_v9 = vld [vmem:[#allocation11] ss:$0 sm:$0xff] }
 0x601   :  { %11806 = vmatpush1.bf16.msra.mxu1 %v15342_v15  ;;  %13312 = vmatprep.subr.bf16.mxu0 %v15345_v56 }
 0x602   :  { %13334 = vmatprep.subr.bf16.mxu1 %v15346_v60 }
 0x603   :  { %11316 = vmatmul.mubr.bf16.vlgmr.msra.gmra.mrb[96].mxu0 %v6965_v32 }
 0x604   :  { %11808 = vmatmul.mubr.bf16.vlgmr.msra.gmra.mrb[96].mxu1 %v6965_v32  ;;  %13313 = vmatpush3.bf16.msra.mxu0 %v15347_v52 }
 0x605   :  { %13335 = vmatpush3.bf16.msra.mxu1 %v15348_v63  ;;  %13314 = vmatprep.subr.bf16.mxu0 %v15349_v1 }
 0x606   :  { %13336 = vmatprep.subr.bf16.mxu1 %v15350_v53 }
 0x608   :  { %13315 = vmatpush3.bf16.msra.mxu0 %v15351_v6 }
 0x609   :  { %13337 = vmatpush3.bf16.msra.mxu1 %v15352_v19  ;;  %13316 = vmatprep.subr.bf16.mxu0 %v15353_v23 }
 0x60a   :  { %13338 = vmatprep.subr.bf16.mxu1 %v15354_v10 }
 0x60c   :  { %13317 = vmatpush3.bf16.msra.mxu0 %v15355_v18 }
 0x60d   :  { %13339 = vmatpush3.bf16.msra.mxu1 %v15356_v58  ;;  %13318 = vmatprep.subr.bf16.mxu0 %v15357_v28 }
 0x60e   :  { %13340 = vmatprep.subr.bf16.mxu1 %v15358_v54 }
 0x610   :  { %13319 = vmatpush3.bf16.msra.mxu0 %v15359_v50 }
 0x611   :  { %13341 = vmatpush3.bf16.msra.mxu1 %v15360_v13  ;;  %13320 = vmatprep.subr.bf16.mxu0 %v15361_v16 }
 0x612   :  { %13342 = vmatprep.subr.bf16.mxu1 %v15362_v37 }
 0x614   :  { %13321 = vmatpush3.bf16.msra.mxu0 %v15363_v3 }
 0x615   :  { %13343 = vmatpush3.bf16.msra.mxu1 %v15364_v49  ;;  %13322 = vmatprep.subr.bf16.mxu0 %v15365_v7 }
 0x616   :  { %13344 = vmatprep.subr.bf16.mxu1 %v15366_v55 }
 0x618   :  { %13323 = vmatpush3.bf16.msra.mxu0 %v15367_v8 }
 0x619   :  { %13345 = vmatpush3.bf16.msra.mxu1 %v15368_v25  ;;  %13324 = vmatprep.subr.bf16.mxu0 %v15369_v45 }
 0x61a   :  { %13346 = vmatprep.subr.bf16.mxu1 %v15370_v57 }
 0x61c   :  { %13325 = vmatpush3.bf16.msra.mxu0 %v15371_v17 }
 0x61d   :  { %13347 = vmatpush3.bf16.msra.mxu1 %v15372_v26  ;;  %13326 = vmatprep.subr.bf16.mxu0 %v15373_v36 }
 0x61e   :  { %13348 = vmatprep.subr.bf16.mxu1 %v15374_v44 }
 0x620   :  { %13327 = vmatpush3.bf16.msra.mxu0 %v15375_v2 }
 0x621   :  { %13349 = vmatpush3.bf16.msra.mxu1 %v15376_v41 }
 0x6d6   :  { %v11317_v38 = vpop.f32.mrb[96].mxu0 }
 0x6d7   :  { %v13956_v35 = vadd.f32 %v11317_v38, %v6801_v47  ;;  %v11809_v20 = vpop.f32.mrb[96].mxu1  ;;  %v11319_v29 = vpop.f32.mrb[97].mxu0 }
 0x6d8   :  { %v13958_v42 = vadd.f32 %v11809_v20, %v6809_v39  ;;  %v13957_v51 = vadd.f32 %v11319_v29, %v6805_v62  ;;  %v11811_v40 = vpop.f32.mrb[97].mxu1  ;;  %v11321_v30 = vpop.f32.mrb[98].mxu0 }
 0x6d9   :  { %v11816_v27 = vmax.f32 %v13956_v35, 0.0  ;;  %v13959_v31 = vadd.f32 %v11811_v40, %v6813_v14  ;;  %v11813_v0 = vpop.f32.mrb[98].mxu1  ;;  %v11322_v22 = vpop.f32.mrb[99].mxu0 }
 0x6da   :  { %v11818_v24 = vmax.f32 %v13958_v42, 0.0  ;;  %v11817_v11 = vmax.f32 %v13957_v51, 0.0  ;;  %v11814_v61 = vpop.f32.mrb[99].mxu1 }
 0x6db   :  { %v11819_v33 = vmax.f32 %v13959_v31, 0.0  ;;  %v11820_v46 = vpack.c.bf16 %v11816_v27, %v11816_v27 }
 0x6dc   :  { %v11821_v59 = vpack.c.bf16 %v11817_v11, %v11817_v11  ;;  %v11822_v5 = vpack.c.bf16 %v11818_v24, %v11818_v24 }
 0x6dd   :  { %v11823_v21 = vpack.c.bf16 %v11819_v33, %v11819_v33 }
 0x6de   :  { %12119 = vmatprep.mubr.bf16.mxu0 %v11821_v59 }
 0x6df   :  { %12159 = vmatprep.mubr.bf16.mxu1 %v11823_v21  ;;  %12120 = vmatmul.mubr.bf16.vlgmr.msra.gmra.mrb[100].mxu0 %v11820_v46 }
 0x6e0   :  { %12160 = vmatmul.mubr.bf16.vlgmr.msra.gmra.mrb[100].mxu1 %v11822_v5 }
 0x7b2   :  { %v13328_v34 = vpop.f32.mrb[100].mxu0 }
 0x7b3   :  { %v13350_v12 = vpop.f32.mrb[100].mxu1  ;;  %v13329_v15 = vpop.f32.mrb[101].mxu0 }
 0x7b4   :  { %v13330_v56 = vadd.f32 %v13329_v15, %v13328_v34  ;;  %v13351_v60 = vpop.f32.mrb[101].mxu1  ;;  %v13331_v52 = vpop.f32.mrb[102].mxu0 }
 0x7b5   :  { %v13352_v32 = vadd.f32 %v13351_v60, %v13350_v12  ;;  %v13353_v63 = vpop.f32.mrb[102].mxu1  ;;  %v13332_v1 = vpop.f32.mrb[103].mxu0 }
 0x7b6   :  { %v12122_v53 = vadd.f32 %v13330_v56, %v13279_v9  ;;  %v13354_v6 = vpop.f32.mrb[103].mxu1 }
 0x7b8   :  { %v12162_v19 = vadd.f32 %v13352_v32, %v12122_v53 }
 0x7ba   :  { %v12168_v23 = vsel %vm12167_vm5, %v12162_v19, -inf }
 0x7bb   :  { %12169 = vmax.xlane.f32.xlu0 %v12168_v23 }
 0x848   :  { %v12170_v10 = vpop.xlane.xlu0 %12169 }
 0x849   :  { %v12171_v18 = vsub.f32 %v12162_v19, %v12170_v10 }
 0x84b   :  { %v12172_v58 = vmul.f32 1.442695, %v12171_v18 }
 0x84d   :  { %15377 = vpow2.f32 %v12172_v58 }
 0x857   :  { %v15378_v28 = vpop.eup %15377 }
 0x858   :  { %v12174_v54 = vsel %vm12167_vm5, %v15378_v28, 0.0 }
 0x859   :  { %12175 = vadd.xlane.f32.xlu0 %v12174_v54 }
 0x8e6   :  { %v12176_v50 = vpop.xlane.xlu0 %12175 }
 0x8e7   :  { %15379 = vrcp.f32 %v12176_v50 }
 0x8f1   :  { %v15380_v13 = vpop.eup %15379 }
 0x8f2   :  { %v12178_v16 = vmul.f32 %v15380_v13, %v15378_v28 }
 0x8f4   :  { %12179 = vst.msk [vmem:[#allocation12] sm:$0x3] %vm12167_vm5, %v12178_v16 }
 0x8f5   :  { %15502 = shalt.err (!%p15499_p2)
}
 0x8f6   :  { %s15503_s27 = scalar_lea.hbm %s17297_s8, 32 }
 0x8f7   :  { %p15504_p3 = scmp.ne.s32.totalorder %s17297_s8, %s15503_s27  ;;  %p15507_p4 = scmp.lt.u32.totalorder %s15503_s27, %s17297_s8 }
 0x8f9   :  { %p15509_p5 = pnand %p15507_p4, %p15504_p3 }
 0x8fb   :  { %15512 = shalt.err (!%p15509_p5)
}
 0x8fc   :  { %12189 = dma.vmem_to_hbm [thread:$0]  %s12187_s24, 32, %s17297_s8, [#allocation5]  }
 0x8fd   :  { %15519 = dma.done.wait [#allocation5], 32  }
 0x8fe   :  { %15520 = vsyncadd [#allocation5], 4294967264 }
 0x8ff   :  { %12193 = vsyncpa [#allocation4], 1 }
 0x900   :  { %12194 = vsyncpa [#allocation7], 1 }
 0x901   :  { %12195 = vsyncpa [#allocation10], 1 }
 0x902   :  { %12196 = vsyncpa [#allocation5], 1 }

</bundles_post_ra>
